<compile_context>
chip_gen: v5e
topology: v5e:2x2
jax: 0.10.0
libtpu: 0.0.40
codegen_flags: <defaults>
</compile_context>

<pallas_src>
import functools

import jax
import jax.numpy as jnp
import numpy as np
from jax.experimental import pallas as pl
from jax.experimental.pallas import tpu as pltpu


# ---------------------------------------------------------------------------
# Host-side precomputation of the per-layer conv operands.
# ---------------------------------------------------------------------------
def _build_col_select(k, stride, pad, wi, wo):
    """B[kw, w, j] = 1  iff  w == stride*j + kw - pad  (and in range)."""
    b = np.zeros((k, wi, wo), np.float32)
    for kw in range(k):
        for j in range(wo):
            w = stride * j + kw - pad
            if 0 <= w < wi:
                b[kw, w, j] = 1.0
    return b


def _build_row_weight(weight, k, stride, pad, hi, ho):
    """L[kw, co*Ho+i, c*Hi+h] = sum_kh W[co,c,kh,kw] * [h == stride*i+kh-pad]."""
    w = np.asarray(weight, np.float32)              # (Co, Ci, K, K)
    co, ci = w.shape[0], w.shape[1]
    p = np.zeros((k, ho, hi), np.float32)
    for kh in range(k):
        for i in range(ho):
            h = stride * i + kh - pad
            if 0 <= h < hi:
                p[kh, i, h] = 1.0
    # (kw, Co, Ho, Ci, Hi)
    l = np.einsum('ocjw,jih->woich', w, p)
    return np.ascontiguousarray(l.reshape(k, co * ho, ci * hi), np.float32)


# ---------------------------------------------------------------------------
# Fused kernel: all UNetDown layers for one sample, fully VMEM resident.
# ---------------------------------------------------------------------------
def _encoder_kernel(*refs, cfgs, eps, slope):
    n_layers = len(cfgs)
    out_refs = refs[1 + 2 * n_layers:]
    feat = refs[0][...].astype(jnp.float32)          # (Ci*Hi, Wi)

    for li, (k, co, ho, wo, normalize) in enumerate(cfgs):
        b_ref = refs[1 + 2 * li]                     # (K, Wi, Wo)
        l_ref = refs[2 + 2 * li]                     # (K, Co*Ho, Ci*Hi)

        # Conv2d(k, stride=2, pad=1, bias=False) as K matmul pairs.
        y = jnp.zeros((co * ho, wo), jnp.float32)
        for kw in range(k):
            cols = jnp.dot(feat, b_ref[kw], preferred_element_type=jnp.float32)
            y = y + jnp.dot(l_ref[kw], cols, preferred_element_type=jnp.float32)

        if normalize:
            # InstanceNorm2d(affine=False): per-channel biased variance over
            # spatial, computed in a single fused pass (E[x^2] - mean^2).
            inv_n = 1.0 / (ho * wo)
            blocks = []
            for c in range(co):
                blk = y[c * ho:(c + 1) * ho, :]
                s = jnp.sum(blk, axis=1, keepdims=True)
                ss = jnp.sum(blk * blk, axis=1, keepdims=True)
                mean = jnp.sum(s, axis=0, keepdims=True) * inv_n
                mean_sq = jnp.sum(ss, axis=0, keepdims=True) * inv_n
                var = jnp.maximum(mean_sq - mean * mean, 0.0)
                blocks.append((blk - mean) * jax.lax.rsqrt(var + eps))
            y = jnp.concatenate(blocks, axis=0)

        # LeakyReLU(0.2)
        y = jnp.where(y >= 0, y, slope * y)

        out_refs[li][...] = y.astype(out_refs[li].dtype)
        feat = y                                     # next layer's (Ci*Hi, Wi)


# ---------------------------------------------------------------------------
# GoodEncoder wrapper.
# ---------------------------------------------------------------------------
class GoodEncoderPallas:
    """Pallas port of GoodEncoder (deterministic synthetic weights)."""

    def __init__(self, in_channels=1, in_dim=64, lowest_dim=8, filters=4,
                 key=None):
        assert in_dim > 8
        if key is None:
            key = jax.random.PRNGKey(0)
        resize_factor = int(np.floor(np.log2(in_dim / lowest_dim)))
        low_log2 = int(np.log2(lowest_dim))
        cur_dim = in_dim
        target_dim = 2 ** (resize_factor + low_log2 - 1)
        kernel_size = cur_dim - 2 * (target_dim - 1) + 2

        def make_w(k_, co, ci, ks):
            fan_in = ci * ks * ks
            bound = 1.0 / np.sqrt(fan_in)
            return jax.random.uniform(k_, (co, ci, ks, ks), jnp.float32,
                                      -bound, bound)

        keys = jax.random.split(key, resize_factor + 2)
        ki = 0
        # (weight, normalize, kernel_size) per UNetDown layer
        self.layers = []
        self.layers.append(
            (make_w(keys[ki], filters, in_channels, kernel_size), True,
             kernel_size))
        ki += 1
        cur_dim = target_dim
        f = filters
        for _ in range(resize_factor - 2):
            self.layers.append((make_w(keys[ki], f * 2, f, 4), False, 4))
            ki += 1
            f *= 2
            cur_dim //= 2
        self.layers.append((make_w(keys[ki], f, f, 4), False, 4))
        assert cur_dim // 2 == lowest_dim

        self.in_channels = in_channels
        self.in_dim = in_dim

        # Precompute per-layer conv operands (done once, outside the hot path).
        stride, pad = 2, 1
        self.cfgs = []     # (k, co, ho, wo, normalize)
        self.geoms = []    # (co, ho, wo) for the free output reshape
        self.b_mats = []
        self.l_mats = []
        hi = in_dim
        for (w, normalize, k) in self.layers:
            co = int(w.shape[0])
            ho = (hi + 2 * pad - k) // stride + 1
            wo = ho
            self.b_mats.append(jnp.asarray(_build_col_select(k, stride, pad,
                                                             hi, ho)))
            self.l_mats.append(jnp.asarray(_build_row_weight(w, k, stride,
                                                             pad, hi, ho)))
            self.cfgs.append((k, co, ho, wo, bool(normalize)))
            self.geoms.append((co, ho, wo))
            hi = ho

    def __call__(self, x):
        n, c0, h0, w0 = x.shape
        xflat = x.reshape(n, c0 * h0, w0)            # (N, Ci*H, W) — free
        n_layers = len(self.cfgs)

        kern = functools.partial(_encoder_kernel, cfgs=tuple(self.cfgs),
                                 eps=1e-5, slope=0.2)

        in_specs = [pl.BlockSpec((None, c0 * h0, w0), lambda i: (i, 0, 0))]
        inputs = [xflat]
        for b, l in zip(self.b_mats, self.l_mats):
            in_specs.append(pl.BlockSpec(b.shape, lambda i: (0, 0, 0)))
            in_specs.append(pl.BlockSpec(l.shape, lambda i: (0, 0, 0)))
            inputs.extend([b, l])

        out_shapes = []
        out_specs = []
        for (co, ho, wo) in self.geoms:
            out_shapes.append(jax.ShapeDtypeStruct((n, co * ho, wo),
                                                   jnp.float32))
            out_specs.append(pl.BlockSpec((None, co * ho, wo),
                                          lambda i: (i, 0, 0)))

        outs = pl.pallas_call(
            kern,
            grid=(n,),
            in_specs=in_specs,
            out_specs=out_specs,
            out_shape=tuple(out_shapes),
            compiler_params=pltpu.CompilerParams(
                dimension_semantics=("parallel",)),
        )(*inputs)

        # (N, C*H, W) -> (N, C, H, W): pure reshape, no transpose needed.
        return [o.reshape(n, co, ho, wo)
                for o, (co, ho, wo) in zip(outs, self.geoms)]


# ---------------------------------------------------------------------------
# Pure-JAX reference (for validation only).
# ---------------------------------------------------------------------------
def _ref_down(x, w, normalize):
    y = jax.lax.conv_general_dilated(
        x, w, window_strides=(2, 2), padding=((1, 1), (1, 1)),
        dimension_numbers=("NCHW", "OIHW", "NCHW"))
    if normalize:
        mean = y.mean(axis=(2, 3), keepdims=True)
        var = ((y - mean) ** 2).mean(axis=(2, 3), keepdims=True)
        y = (y - mean) / jnp.sqrt(var + 1e-5)
    return jnp.where(y >= 0, y, 0.2 * y)


if __name__ == "__main__":
    key = jax.random.PRNGKey(0)
    kx, kp = jax.random.split(key)

    # GoodEncoder defaults: in_channels=1, in_dim=64 -> input (N, 1, 64, 64)
    x = jax.random.normal(kx, (2, 1, 64, 64), jnp.float32)

    enc = GoodEncoderPallas(in_channels=1, in_dim=64, lowest_dim=8,
                            filters=4, key=kp)
    outs = enc(x)
    outs = jax.block_until_ready(outs)

    # Validate against a pure-JAX reference of the same forward.
    xr = x
    for (w, normalize, _k), o in zip(enc.layers, outs):
        xr = _ref_down(xr, w, normalize)
        np.testing.assert_allclose(np.asarray(o), np.asarray(xr),
                                   rtol=1e-2, atol=1e-3)

    expected_shapes = [(2, 4, 32, 32), (2, 8, 16, 16), (2, 8, 8, 8)]
    assert [tuple(o.shape) for o in outs] == expected_shapes

    print("KERNEL_OK")
</pallas_src>

<mosaic_0001>
module attributes {stable_mosaic.version = 11 : i64} {
  func.func @_encoder_kernel(%arg0: i32, %arg1: memref<1x64x64xf32, #tpu.memory_space<vmem>>, %arg2: memref<4x64x32xf32, #tpu.memory_space<vmem>>, %arg3: memref<4x128x64xf32, #tpu.memory_space<vmem>>, %arg4: memref<4x32x16xf32, #tpu.memory_space<vmem>>, %arg5: memref<4x128x128xf32, #tpu.memory_space<vmem>>, %arg6: memref<4x16x8xf32, #tpu.memory_space<vmem>>, %arg7: memref<4x64x128xf32, #tpu.memory_space<vmem>>, %arg8: memref<1x128x32xf32, #tpu.memory_space<vmem>>, %arg9: memref<1x128x16xf32, #tpu.memory_space<vmem>>, %arg10: memref<1x64x8xf32, #tpu.memory_space<vmem>>) attributes {dimension_semantics = [#tpu.dimension_semantics<parallel>], iteration_bounds = array<i64: 2>, scalar_prefetch = 0 : i64, scratch_operands = 0 : i64, tpu.core_type = #tpu.core_type<tc>, window_params = [{transform_indices = @transform_0, window_bounds = array<i64: 1, 64, 64>}, {pipeline_mode = #tpu.pipeline_mode<synchronous>, transform_indices = @transform_1, window_bounds = array<i64: 4, 64, 32>}, {pipeline_mode = #tpu.pipeline_mode<synchronous>, transform_indices = @transform_2, window_bounds = array<i64: 4, 128, 64>}, {pipeline_mode = #tpu.pipeline_mode<synchronous>, transform_indices = @transform_3, window_bounds = array<i64: 4, 32, 16>}, {pipeline_mode = #tpu.pipeline_mode<synchronous>, transform_indices = @transform_4, window_bounds = array<i64: 4, 128, 128>}, {pipeline_mode = #tpu.pipeline_mode<synchronous>, transform_indices = @transform_5, window_bounds = array<i64: 4, 16, 8>}, {pipeline_mode = #tpu.pipeline_mode<synchronous>, transform_indices = @transform_6, window_bounds = array<i64: 4, 64, 128>}, {transform_indices = @transform_7, window_bounds = array<i64: 1, 128, 32>}, {transform_indices = @transform_8, window_bounds = array<i64: 1, 128, 16>}, {transform_indices = @transform_9, window_bounds = array<i64: 1, 64, 8>}]} {
    %c0 = arith.constant 0 : index
    %c0_0 = arith.constant 0 : index
    %c0_1 = arith.constant 0 : index
    %0 = vector.load %arg1[%c0, %c0_0, %c0_1] : memref<1x64x64xf32, #tpu.memory_space<vmem>>, vector<1x64x64xf32>
    %1 = vector.shape_cast %0 : vector<1x64x64xf32> to vector<64x64xf32>
    %cst = arith.constant 0.000000e+00 : f32
    %2 = vector.broadcast %cst : f32 to vector<128x32xf32>
    %c0_2 = arith.constant 0 : index
    %c0_3 = arith.constant 0 : index
    %c0_4 = arith.constant 0 : index
    %3 = vector.load %arg2[%c0_2, %c0_3, %c0_4] : memref<4x64x32xf32, #tpu.memory_space<vmem>>, vector<1x64x32xf32>
    %4 = vector.shape_cast %3 : vector<1x64x32xf32> to vector<64x32xf32>
    %cst_5 = arith.constant dense<0.000000e+00> : vector<64x32xf32>
    %5 = tpu.matmul %1, %4, %cst_5 {dimension_numbers = #tpu.dot_dimension_numbers<[1], [0], [0], [1], [0, 0, 1, 1], [], []>} : vector<64x64xf32>, vector<64x32xf32>, vector<64x32xf32> -> vector<64x32xf32>
    %c0_6 = arith.constant 0 : index
    %c0_7 = arith.constant 0 : index
    %c0_8 = arith.constant 0 : index
    %6 = vector.load %arg3[%c0_6, %c0_7, %c0_8] : memref<4x128x64xf32, #tpu.memory_space<vmem>>, vector<1x128x64xf32>
    %7 = vector.shape_cast %6 : vector<1x128x64xf32> to vector<128x64xf32>
    %cst_9 = arith.constant dense<0.000000e+00> : vector<128x32xf32>
    %8 = tpu.matmul %7, %5, %cst_9 {dimension_numbers = #tpu.dot_dimension_numbers<[1], [0], [0], [1], [0, 0, 1, 1], [], []>} : vector<128x64xf32>, vector<64x32xf32>, vector<128x32xf32> -> vector<128x32xf32>
    %9 = arith.addf %2, %8 : vector<128x32xf32>
    %c1 = arith.constant 1 : index
    %c0_10 = arith.constant 0 : index
    %c0_11 = arith.constant 0 : index
    %10 = vector.load %arg2[%c1, %c0_10, %c0_11] : memref<4x64x32xf32, #tpu.memory_space<vmem>>, vector<1x64x32xf32>
    %11 = vector.shape_cast %10 : vector<1x64x32xf32> to vector<64x32xf32>
    %cst_12 = arith.constant dense<0.000000e+00> : vector<64x32xf32>
    %12 = tpu.matmul %1, %11, %cst_12 {dimension_numbers = #tpu.dot_dimension_numbers<[1], [0], [0], [1], [0, 0, 1, 1], [], []>} : vector<64x64xf32>, vector<64x32xf32>, vector<64x32xf32> -> vector<64x32xf32>
    %c1_13 = arith.constant 1 : index
    %c0_14 = arith.constant 0 : index
    %c0_15 = arith.constant 0 : index
    %13 = vector.load %arg3[%c1_13, %c0_14, %c0_15] : memref<4x128x64xf32, #tpu.memory_space<vmem>>, vector<1x128x64xf32>
    %14 = vector.shape_cast %13 : vector<1x128x64xf32> to vector<128x64xf32>
    %cst_16 = arith.constant dense<0.000000e+00> : vector<128x32xf32>
    %15 = tpu.matmul %14, %12, %cst_16 {dimension_numbers = #tpu.dot_dimension_numbers<[1], [0], [0], [1], [0, 0, 1, 1], [], []>} : vector<128x64xf32>, vector<64x32xf32>, vector<128x32xf32> -> vector<128x32xf32>
    %16 = arith.addf %9, %15 : vector<128x32xf32>
    %c2 = arith.constant 2 : index
    %c0_17 = arith.constant 0 : index
    %c0_18 = arith.constant 0 : index
    %17 = vector.load %arg2[%c2, %c0_17, %c0_18] : memref<4x64x32xf32, #tpu.memory_space<vmem>>, vector<1x64x32xf32>
    %18 = vector.shape_cast %17 : vector<1x64x32xf32> to vector<64x32xf32>
    %cst_19 = arith.constant dense<0.000000e+00> : vector<64x32xf32>
    %19 = tpu.matmul %1, %18, %cst_19 {dimension_numbers = #tpu.dot_dimension_numbers<[1], [0], [0], [1], [0, 0, 1, 1], [], []>} : vector<64x64xf32>, vector<64x32xf32>, vector<64x32xf32> -> vector<64x32xf32>
    %c2_20 = arith.constant 2 : index
    %c0_21 = arith.constant 0 : index
    %c0_22 = arith.constant 0 : index
    %20 = vector.load %arg3[%c2_20, %c0_21, %c0_22] : memref<4x128x64xf32, #tpu.memory_space<vmem>>, vector<1x128x64xf32>
    %21 = vector.shape_cast %20 : vector<1x128x64xf32> to vector<128x64xf32>
    %cst_23 = arith.constant dense<0.000000e+00> : vector<128x32xf32>
    %22 = tpu.matmul %21, %19, %cst_23 {dimension_numbers = #tpu.dot_dimension_numbers<[1], [0], [0], [1], [0, 0, 1, 1], [], []>} : vector<128x64xf32>, vector<64x32xf32>, vector<128x32xf32> -> vector<128x32xf32>
    %23 = arith.addf %16, %22 : vector<128x32xf32>
    %c3 = arith.constant 3 : index
    %c0_24 = arith.constant 0 : index
    %c0_25 = arith.constant 0 : index
    %24 = vector.load %arg2[%c3, %c0_24, %c0_25] : memref<4x64x32xf32, #tpu.memory_space<vmem>>, vector<1x64x32xf32>
    %25 = vector.shape_cast %24 : vector<1x64x32xf32> to vector<64x32xf32>
    %cst_26 = arith.constant dense<0.000000e+00> : vector<64x32xf32>
    %26 = tpu.matmul %1, %25, %cst_26 {dimension_numbers = #tpu.dot_dimension_numbers<[1], [0], [0], [1], [0, 0, 1, 1], [], []>} : vector<64x64xf32>, vector<64x32xf32>, vector<64x32xf32> -> vector<64x32xf32>
    %c3_27 = arith.constant 3 : index
    %c0_28 = arith.constant 0 : index
    %c0_29 = arith.constant 0 : index
    %27 = vector.load %arg3[%c3_27, %c0_28, %c0_29] : memref<4x128x64xf32, #tpu.memory_space<vmem>>, vector<1x128x64xf32>
    %28 = vector.shape_cast %27 : vector<1x128x64xf32> to vector<128x64xf32>
    %cst_30 = arith.constant dense<0.000000e+00> : vector<128x32xf32>
    %29 = tpu.matmul %28, %26, %cst_30 {dimension_numbers = #tpu.dot_dimension_numbers<[1], [0], [0], [1], [0, 0, 1, 1], [], []>} : vector<128x64xf32>, vector<64x32xf32>, vector<128x32xf32> -> vector<128x32xf32>
    %30 = arith.addf %23, %29 : vector<128x32xf32>
    %31 = vector.extract_strided_slice %30 {offsets = [0, 0], sizes = [32, 32], strides = [1, 1]} : vector<128x32xf32> to vector<32x32xf32>
    %cst_31 = arith.constant dense<0.000000e+00> : vector<32xf32>
    %32 = vector.multi_reduction <add>, %31, %cst_31 [1] : vector<32x32xf32> to vector<32xf32>
    %33 = vector.shape_cast %32 : vector<32xf32> to vector<32x1xf32>
    %34 = arith.mulf %31, %31 : vector<32x32xf32>
    %cst_32 = arith.constant dense<0.000000e+00> : vector<32xf32>
    %35 = vector.multi_reduction <add>, %34, %cst_32 [1] : vector<32x32xf32> to vector<32xf32>
    %36 = vector.shape_cast %35 : vector<32xf32> to vector<32x1xf32>
    %cst_33 = arith.constant dense<0.000000e+00> : vector<1xf32>
    %37 = vector.multi_reduction <add>, %33, %cst_33 [0] : vector<32x1xf32> to vector<1xf32>
    %38 = vector.shape_cast %37 : vector<1xf32> to vector<1x1xf32>
    %cst_34 = arith.constant 9.765625E-4 : f32
    %39 = vector.broadcast %cst_34 : f32 to vector<1x1xf32>
    %40 = arith.mulf %38, %39 : vector<1x1xf32>
    %cst_35 = arith.constant dense<0.000000e+00> : vector<1xf32>
    %41 = vector.multi_reduction <add>, %36, %cst_35 [0] : vector<32x1xf32> to vector<1xf32>
    %42 = vector.shape_cast %41 : vector<1xf32> to vector<1x1xf32>
    %cst_36 = arith.constant 9.765625E-4 : f32
    %43 = vector.broadcast %cst_36 : f32 to vector<1x1xf32>
    %44 = arith.mulf %42, %43 : vector<1x1xf32>
    %45 = arith.mulf %40, %40 : vector<1x1xf32>
    %46 = arith.subf %44, %45 : vector<1x1xf32>
    %cst_37 = arith.constant 0.000000e+00 : f32
    %47 = vector.broadcast %cst_37 : f32 to vector<1x1xf32>
    %48 = arith.maximumf %46, %47 : vector<1x1xf32>
    %49 = vector.broadcast %40 : vector<1x1xf32> to vector<32x32xf32>
    %50 = arith.subf %31, %49 : vector<32x32xf32>
    %cst_38 = arith.constant 9.99999974E-6 : f32
    %51 = vector.broadcast %cst_38 : f32 to vector<1x1xf32>
    %52 = arith.addf %48, %51 : vector<1x1xf32>
    %53 = math.rsqrt %52 : vector<1x1xf32>
    %54 = vector.broadcast %53 : vector<1x1xf32> to vector<32x32xf32>
    %55 = arith.mulf %50, %54 : vector<32x32xf32>
    %56 = vector.extract_strided_slice %30 {offsets = [32, 0], sizes = [32, 32], strides = [1, 1]} : vector<128x32xf32> to vector<32x32xf32>
    %cst_39 = arith.constant dense<0.000000e+00> : vector<32xf32>
    %57 = vector.multi_reduction <add>, %56, %cst_39 [1] : vector<32x32xf32> to vector<32xf32>
    %58 = vector.shape_cast %57 : vector<32xf32> to vector<32x1xf32>
    %59 = arith.mulf %56, %56 : vector<32x32xf32>
    %cst_40 = arith.constant dense<0.000000e+00> : vector<32xf32>
    %60 = vector.multi_reduction <add>, %59, %cst_40 [1] : vector<32x32xf32> to vector<32xf32>
    %61 = vector.shape_cast %60 : vector<32xf32> to vector<32x1xf32>
    %cst_41 = arith.constant dense<0.000000e+00> : vector<1xf32>
    %62 = vector.multi_reduction <add>, %58, %cst_41 [0] : vector<32x1xf32> to vector<1xf32>
    %63 = vector.shape_cast %62 : vector<1xf32> to vector<1x1xf32>
    %cst_42 = arith.constant 9.765625E-4 : f32
    %64 = vector.broadcast %cst_42 : f32 to vector<1x1xf32>
    %65 = arith.mulf %63, %64 : vector<1x1xf32>
    %cst_43 = arith.constant dense<0.000000e+00> : vector<1xf32>
    %66 = vector.multi_reduction <add>, %61, %cst_43 [0] : vector<32x1xf32> to vector<1xf32>
    %67 = vector.shape_cast %66 : vector<1xf32> to vector<1x1xf32>
    %cst_44 = arith.constant 9.765625E-4 : f32
    %68 = vector.broadcast %cst_44 : f32 to vector<1x1xf32>
    %69 = arith.mulf %67, %68 : vector<1x1xf32>
    %70 = arith.mulf %65, %65 : vector<1x1xf32>
    %71 = arith.subf %69, %70 : vector<1x1xf32>
    %cst_45 = arith.constant 0.000000e+00 : f32
    %72 = vector.broadcast %cst_45 : f32 to vector<1x1xf32>
    %73 = arith.maximumf %71, %72 : vector<1x1xf32>
    %74 = vector.broadcast %65 : vector<1x1xf32> to vector<32x32xf32>
    %75 = arith.subf %56, %74 : vector<32x32xf32>
    %cst_46 = arith.constant 9.99999974E-6 : f32
    %76 = vector.broadcast %cst_46 : f32 to vector<1x1xf32>
    %77 = arith.addf %73, %76 : vector<1x1xf32>
    %78 = math.rsqrt %77 : vector<1x1xf32>
    %79 = vector.broadcast %78 : vector<1x1xf32> to vector<32x32xf32>
    %80 = arith.mulf %75, %79 : vector<32x32xf32>
    %81 = vector.extract_strided_slice %30 {offsets = [64, 0], sizes = [32, 32], strides = [1, 1]} : vector<128x32xf32> to vector<32x32xf32>
    %cst_47 = arith.constant dense<0.000000e+00> : vector<32xf32>
    %82 = vector.multi_reduction <add>, %81, %cst_47 [1] : vector<32x32xf32> to vector<32xf32>
    %83 = vector.shape_cast %82 : vector<32xf32> to vector<32x1xf32>
    %84 = arith.mulf %81, %81 : vector<32x32xf32>
    %cst_48 = arith.constant dense<0.000000e+00> : vector<32xf32>
    %85 = vector.multi_reduction <add>, %84, %cst_48 [1] : vector<32x32xf32> to vector<32xf32>
    %86 = vector.shape_cast %85 : vector<32xf32> to vector<32x1xf32>
    %cst_49 = arith.constant dense<0.000000e+00> : vector<1xf32>
    %87 = vector.multi_reduction <add>, %83, %cst_49 [0] : vector<32x1xf32> to vector<1xf32>
    %88 = vector.shape_cast %87 : vector<1xf32> to vector<1x1xf32>
    %cst_50 = arith.constant 9.765625E-4 : f32
    %89 = vector.broadcast %cst_50 : f32 to vector<1x1xf32>
    %90 = arith.mulf %88, %89 : vector<1x1xf32>
    %cst_51 = arith.constant dense<0.000000e+00> : vector<1xf32>
    %91 = vector.multi_reduction <add>, %86, %cst_51 [0] : vector<32x1xf32> to vector<1xf32>
    %92 = vector.shape_cast %91 : vector<1xf32> to vector<1x1xf32>
    %cst_52 = arith.constant 9.765625E-4 : f32
    %93 = vector.broadcast %cst_52 : f32 to vector<1x1xf32>
    %94 = arith.mulf %92, %93 : vector<1x1xf32>
    %95 = arith.mulf %90, %90 : vector<1x1xf32>
    %96 = arith.subf %94, %95 : vector<1x1xf32>
    %cst_53 = arith.constant 0.000000e+00 : f32
    %97 = vector.broadcast %cst_53 : f32 to vector<1x1xf32>
    %98 = arith.maximumf %96, %97 : vector<1x1xf32>
    %99 = vector.broadcast %90 : vector<1x1xf32> to vector<32x32xf32>
    %100 = arith.subf %81, %99 : vector<32x32xf32>
    %cst_54 = arith.constant 9.99999974E-6 : f32
    %101 = vector.broadcast %cst_54 : f32 to vector<1x1xf32>
    %102 = arith.addf %98, %101 : vector<1x1xf32>
    %103 = math.rsqrt %102 : vector<1x1xf32>
    %104 = vector.broadcast %103 : vector<1x1xf32> to vector<32x32xf32>
    %105 = arith.mulf %100, %104 : vector<32x32xf32>
    %106 = vector.extract_strided_slice %30 {offsets = [96, 0], sizes = [32, 32], strides = [1, 1]} : vector<128x32xf32> to vector<32x32xf32>
    %cst_55 = arith.constant dense<0.000000e+00> : vector<32xf32>
    %107 = vector.multi_reduction <add>, %106, %cst_55 [1] : vector<32x32xf32> to vector<32xf32>
    %108 = vector.shape_cast %107 : vector<32xf32> to vector<32x1xf32>
    %109 = arith.mulf %106, %106 : vector<32x32xf32>
    %cst_56 = arith.constant dense<0.000000e+00> : vector<32xf32>
    %110 = vector.multi_reduction <add>, %109, %cst_56 [1] : vector<32x32xf32> to vector<32xf32>
    %111 = vector.shape_cast %110 : vector<32xf32> to vector<32x1xf32>
    %cst_57 = arith.constant dense<0.000000e+00> : vector<1xf32>
    %112 = vector.multi_reduction <add>, %108, %cst_57 [0] : vector<32x1xf32> to vector<1xf32>
    %113 = vector.shape_cast %112 : vector<1xf32> to vector<1x1xf32>
    %cst_58 = arith.constant 9.765625E-4 : f32
    %114 = vector.broadcast %cst_58 : f32 to vector<1x1xf32>
    %115 = arith.mulf %113, %114 : vector<1x1xf32>
    %cst_59 = arith.constant dense<0.000000e+00> : vector<1xf32>
    %116 = vector.multi_reduction <add>, %111, %cst_59 [0] : vector<32x1xf32> to vector<1xf32>
    %117 = vector.shape_cast %116 : vector<1xf32> to vector<1x1xf32>
    %cst_60 = arith.constant 9.765625E-4 : f32
    %118 = vector.broadcast %cst_60 : f32 to vector<1x1xf32>
    %119 = arith.mulf %117, %118 : vector<1x1xf32>
    %120 = arith.mulf %115, %115 : vector<1x1xf32>
    %121 = arith.subf %119, %120 : vector<1x1xf32>
    %cst_61 = arith.constant 0.000000e+00 : f32
    %122 = vector.broadcast %cst_61 : f32 to vector<1x1xf32>
    %123 = arith.maximumf %121, %122 : vector<1x1xf32>
    %124 = vector.broadcast %115 : vector<1x1xf32> to vector<32x32xf32>
    %125 = arith.subf %106, %124 : vector<32x32xf32>
    %cst_62 = arith.constant 9.99999974E-6 : f32
    %126 = vector.broadcast %cst_62 : f32 to vector<1x1xf32>
    %127 = arith.addf %123, %126 : vector<1x1xf32>
    %128 = math.rsqrt %127 : vector<1x1xf32>
    %129 = vector.broadcast %128 : vector<1x1xf32> to vector<32x32xf32>
    %130 = arith.mulf %125, %129 : vector<32x32xf32>
    %131 = tpu.concatenate %55, %80, %105, %130 in 0 : vector<32x32xf32>, vector<32x32xf32>, vector<32x32xf32>, vector<32x32xf32> -> vector<128x32xf32>
    %cst_63 = arith.constant 0.000000e+00 : f32
    %132 = vector.broadcast %cst_63 : f32 to vector<128x32xf32>
    %133 = arith.cmpf oge, %131, %132 : vector<128x32xf32>
    %cst_64 = arith.constant 2.000000e-01 : f32
    %134 = vector.broadcast %cst_64 : f32 to vector<128x32xf32>
    %135 = arith.mulf %134, %131 : vector<128x32xf32>
    %136 = arith.select %133, %131, %135 : vector<128x32xi1>, vector<128x32xf32>
    %c0_65 = arith.constant 0 : index
    %c0_66 = arith.constant 0 : index
    %c0_67 = arith.constant 0 : index
    %137 = vector.load %arg8[%c0_65, %c0_66, %c0_67] : memref<1x128x32xf32, #tpu.memory_space<vmem>>, vector<1x128x32xf32>
    %138 = vector.shape_cast %137 : vector<1x128x32xf32> to vector<128x32xf32>
    %139 = vector.shape_cast %136 : vector<128x32xf32> to vector<1x128x32xf32>
    tpu.vector_store %arg8[%c0_65, %c0_66, %c0_67], %139 {strides = array<i32>} : memref<1x128x32xf32, #tpu.memory_space<vmem>>, vector<1x128x32xf32>,
    %cst_68 = arith.constant 0.000000e+00 : f32
    %140 = vector.broadcast %cst_68 : f32 to vector<128x16xf32>
    %c0_69 = arith.constant 0 : index
    %c0_70 = arith.constant 0 : index
    %c0_71 = arith.constant 0 : index
    %141 = vector.load %arg4[%c0_69, %c0_70, %c0_71] : memref<4x32x16xf32, #tpu.memory_space<vmem>>, vector<1x32x16xf32>
    %142 = vector.shape_cast %141 : vector<1x32x16xf32> to vector<32x16xf32>
    %cst_72 = arith.constant dense<0.000000e+00> : vector<128x16xf32>
    %143 = tpu.matmul %136, %142, %cst_72 {dimension_numbers = #tpu.dot_dimension_numbers<[1], [0], [0], [1], [0, 0, 1, 1], [], []>} : vector<128x32xf32>, vector<32x16xf32>, vector<128x16xf32> -> vector<128x16xf32>
    %c0_73 = arith.constant 0 : index
    %c0_74 = arith.constant 0 : index
    %c0_75 = arith.constant 0 : index
    %144 = vector.load %arg5[%c0_73, %c0_74, %c0_75] : memref<4x128x128xf32, #tpu.memory_space<vmem>>, vector<1x128x128xf32>
    %145 = vector.shape_cast %144 : vector<1x128x128xf32> to vector<128x128xf32>
    %cst_76 = arith.constant dense<0.000000e+00> : vector<128x16xf32>
    %146 = tpu.matmul %145, %143, %cst_76 {dimension_numbers = #tpu.dot_dimension_numbers<[1], [0], [0], [1], [0, 0, 1, 1], [], []>} : vector<128x128xf32>, vector<128x16xf32>, vector<128x16xf32> -> vector<128x16xf32>
    %147 = arith.addf %140, %146 : vector<128x16xf32>
    %c1_77 = arith.constant 1 : index
    %c0_78 = arith.constant 0 : index
    %c0_79 = arith.constant 0 : index
    %148 = vector.load %arg4[%c1_77, %c0_78, %c0_79] : memref<4x32x16xf32, #tpu.memory_space<vmem>>, vector<1x32x16xf32>
    %149 = vector.shape_cast %148 : vector<1x32x16xf32> to vector<32x16xf32>
    %cst_80 = arith.constant dense<0.000000e+00> : vector<128x16xf32>
    %150 = tpu.matmul %136, %149, %cst_80 {dimension_numbers = #tpu.dot_dimension_numbers<[1], [0], [0], [1], [0, 0, 1, 1], [], []>} : vector<128x32xf32>, vector<32x16xf32>, vector<128x16xf32> -> vector<128x16xf32>
    %c1_81 = arith.constant 1 : index
    %c0_82 = arith.constant 0 : index
    %c0_83 = arith.constant 0 : index
    %151 = vector.load %arg5[%c1_81, %c0_82, %c0_83] : memref<4x128x128xf32, #tpu.memory_space<vmem>>, vector<1x128x128xf32>
    %152 = vector.shape_cast %151 : vector<1x128x128xf32> to vector<128x128xf32>
    %cst_84 = arith.constant dense<0.000000e+00> : vector<128x16xf32>
    %153 = tpu.matmul %152, %150, %cst_84 {dimension_numbers = #tpu.dot_dimension_numbers<[1], [0], [0], [1], [0, 0, 1, 1], [], []>} : vector<128x128xf32>, vector<128x16xf32>, vector<128x16xf32> -> vector<128x16xf32>
    %154 = arith.addf %147, %153 : vector<128x16xf32>
    %c2_85 = arith.constant 2 : index
    %c0_86 = arith.constant 0 : index
    %c0_87 = arith.constant 0 : index
    %155 = vector.load %arg4[%c2_85, %c0_86, %c0_87] : memref<4x32x16xf32, #tpu.memory_space<vmem>>, vector<1x32x16xf32>
    %156 = vector.shape_cast %155 : vector<1x32x16xf32> to vector<32x16xf32>
    %cst_88 = arith.constant dense<0.000000e+00> : vector<128x16xf32>
    %157 = tpu.matmul %136, %156, %cst_88 {dimension_numbers = #tpu.dot_dimension_numbers<[1], [0], [0], [1], [0, 0, 1, 1], [], []>} : vector<128x32xf32>, vector<32x16xf32>, vector<128x16xf32> -> vector<128x16xf32>
    %c2_89 = arith.constant 2 : index
    %c0_90 = arith.constant 0 : index
    %c0_91 = arith.constant 0 : index
    %158 = vector.load %arg5[%c2_89, %c0_90, %c0_91] : memref<4x128x128xf32, #tpu.memory_space<vmem>>, vector<1x128x128xf32>
    %159 = vector.shape_cast %158 : vector<1x128x128xf32> to vector<128x128xf32>
    %cst_92 = arith.constant dense<0.000000e+00> : vector<128x16xf32>
    %160 = tpu.matmul %159, %157, %cst_92 {dimension_numbers = #tpu.dot_dimension_numbers<[1], [0], [0], [1], [0, 0, 1, 1], [], []>} : vector<128x128xf32>, vector<128x16xf32>, vector<128x16xf32> -> vector<128x16xf32>
    %161 = arith.addf %154, %160 : vector<128x16xf32>
    %c3_93 = arith.constant 3 : index
    %c0_94 = arith.constant 0 : index
    %c0_95 = arith.constant 0 : index
    %162 = vector.load %arg4[%c3_93, %c0_94, %c0_95] : memref<4x32x16xf32, #tpu.memory_space<vmem>>, vector<1x32x16xf32>
    %163 = vector.shape_cast %162 : vector<1x32x16xf32> to vector<32x16xf32>
    %cst_96 = arith.constant dense<0.000000e+00> : vector<128x16xf32>
    %164 = tpu.matmul %136, %163, %cst_96 {dimension_numbers = #tpu.dot_dimension_numbers<[1], [0], [0], [1], [0, 0, 1, 1], [], []>} : vector<128x32xf32>, vector<32x16xf32>, vector<128x16xf32> -> vector<128x16xf32>
    %c3_97 = arith.constant 3 : index
    %c0_98 = arith.constant 0 : index
    %c0_99 = arith.constant 0 : index
    %165 = vector.load %arg5[%c3_97, %c0_98, %c0_99] : memref<4x128x128xf32, #tpu.memory_space<vmem>>, vector<1x128x128xf32>
    %166 = vector.shape_cast %165 : vector<1x128x128xf32> to vector<128x128xf32>
    %cst_100 = arith.constant dense<0.000000e+00> : vector<128x16xf32>
    %167 = tpu.matmul %166, %164, %cst_100 {dimension_numbers = #tpu.dot_dimension_numbers<[1], [0], [0], [1], [0, 0, 1, 1], [], []>} : vector<128x128xf32>, vector<128x16xf32>, vector<128x16xf32> -> vector<128x16xf32>
    %168 = arith.addf %161, %167 : vector<128x16xf32>
    %cst_101 = arith.constant 0.000000e+00 : f32
    %169 = vector.broadcast %cst_101 : f32 to vector<128x16xf32>
    %170 = arith.cmpf oge, %168, %169 : vector<128x16xf32>
    %cst_102 = arith.constant 2.000000e-01 : f32
    %171 = vector.broadcast %cst_102 : f32 to vector<128x16xf32>
    %172 = arith.mulf %171, %168 : vector<128x16xf32>
    %173 = arith.select %170, %168, %172 : vector<128x16xi1>, vector<128x16xf32>
    %c0_103 = arith.constant 0 : index
    %c0_104 = arith.constant 0 : index
    %c0_105 = arith.constant 0 : index
    %174 = vector.load %arg9[%c0_103, %c0_104, %c0_105] : memref<1x128x16xf32, #tpu.memory_space<vmem>>, vector<1x128x16xf32>
    %175 = vector.shape_cast %174 : vector<1x128x16xf32> to vector<128x16xf32>
    %176 = vector.shape_cast %173 : vector<128x16xf32> to vector<1x128x16xf32>
    tpu.vector_store %arg9[%c0_103, %c0_104, %c0_105], %176 {strides = array<i32>} : memref<1x128x16xf32, #tpu.memory_space<vmem>>, vector<1x128x16xf32>,
    %cst_106 = arith.constant 0.000000e+00 : f32
    %177 = vector.broadcast %cst_106 : f32 to vector<64x8xf32>
    %c0_107 = arith.constant 0 : index
    %c0_108 = arith.constant 0 : index
    %c0_109 = arith.constant 0 : index
    %178 = vector.load %arg6[%c0_107, %c0_108, %c0_109] : memref<4x16x8xf32, #tpu.memory_space<vmem>>, vector<1x16x8xf32>
    %179 = vector.shape_cast %178 : vector<1x16x8xf32> to vector<16x8xf32>
    %cst_110 = arith.constant dense<0.000000e+00> : vector<128x8xf32>
    %180 = tpu.matmul %173, %179, %cst_110 {dimension_numbers = #tpu.dot_dimension_numbers<[1], [0], [0], [1], [0, 0, 1, 1], [], []>} : vector<128x16xf32>, vector<16x8xf32>, vector<128x8xf32> -> vector<128x8xf32>
    %c0_111 = arith.constant 0 : index
    %c0_112 = arith.constant 0 : index
    %c0_113 = arith.constant 0 : index
    %181 = vector.load %arg7[%c0_111, %c0_112, %c0_113] : memref<4x64x128xf32, #tpu.memory_space<vmem>>, vector<1x64x128xf32>
    %182 = vector.shape_cast %181 : vector<1x64x128xf32> to vector<64x128xf32>
    %cst_114 = arith.constant dense<0.000000e+00> : vector<64x8xf32>
    %183 = tpu.matmul %182, %180, %cst_114 {dimension_numbers = #tpu.dot_dimension_numbers<[1], [0], [0], [1], [0, 0, 1, 1], [], []>} : vector<64x128xf32>, vector<128x8xf32>, vector<64x8xf32> -> vector<64x8xf32>
    %184 = arith.addf %177, %183 : vector<64x8xf32>
    %c1_115 = arith.constant 1 : index
    %c0_116 = arith.constant 0 : index
    %c0_117 = arith.constant 0 : index
    %185 = vector.load %arg6[%c1_115, %c0_116, %c0_117] : memref<4x16x8xf32, #tpu.memory_space<vmem>>, vector<1x16x8xf32>
    %186 = vector.shape_cast %185 : vector<1x16x8xf32> to vector<16x8xf32>
    %cst_118 = arith.constant dense<0.000000e+00> : vector<128x8xf32>
    %187 = tpu.matmul %173, %186, %cst_118 {dimension_numbers = #tpu.dot_dimension_numbers<[1], [0], [0], [1], [0, 0, 1, 1], [], []>} : vector<128x16xf32>, vector<16x8xf32>, vector<128x8xf32> -> vector<128x8xf32>
    %c1_119 = arith.constant 1 : index
    %c0_120 = arith.constant 0 : index
    %c0_121 = arith.constant 0 : index
    %188 = vector.load %arg7[%c1_119, %c0_120, %c0_121] : memref<4x64x128xf32, #tpu.memory_space<vmem>>, vector<1x64x128xf32>
    %189 = vector.shape_cast %188 : vector<1x64x128xf32> to vector<64x128xf32>
    %cst_122 = arith.constant dense<0.000000e+00> : vector<64x8xf32>
    %190 = tpu.matmul %189, %187, %cst_122 {dimension_numbers = #tpu.dot_dimension_numbers<[1], [0], [0], [1], [0, 0, 1, 1], [], []>} : vector<64x128xf32>, vector<128x8xf32>, vector<64x8xf32> -> vector<64x8xf32>
    %191 = arith.addf %184, %190 : vector<64x8xf32>
    %c2_123 = arith.constant 2 : index
    %c0_124 = arith.constant 0 : index
    %c0_125 = arith.constant 0 : index
    %192 = vector.load %arg6[%c2_123, %c0_124, %c0_125] : memref<4x16x8xf32, #tpu.memory_space<vmem>>, vector<1x16x8xf32>
    %193 = vector.shape_cast %192 : vector<1x16x8xf32> to vector<16x8xf32>
    %cst_126 = arith.constant dense<0.000000e+00> : vector<128x8xf32>
    %194 = tpu.matmul %173, %193, %cst_126 {dimension_numbers = #tpu.dot_dimension_numbers<[1], [0], [0], [1], [0, 0, 1, 1], [], []>} : vector<128x16xf32>, vector<16x8xf32>, vector<128x8xf32> -> vector<128x8xf32>
    %c2_127 = arith.constant 2 : index
    %c0_128 = arith.constant 0 : index
    %c0_129 = arith.constant 0 : index
    %195 = vector.load %arg7[%c2_127, %c0_128, %c0_129] : memref<4x64x128xf32, #tpu.memory_space<vmem>>, vector<1x64x128xf32>
    %196 = vector.shape_cast %195 : vector<1x64x128xf32> to vector<64x128xf32>
    %cst_130 = arith.constant dense<0.000000e+00> : vector<64x8xf32>
    %197 = tpu.matmul %196, %194, %cst_130 {dimension_numbers = #tpu.dot_dimension_numbers<[1], [0], [0], [1], [0, 0, 1, 1], [], []>} : vector<64x128xf32>, vector<128x8xf32>, vector<64x8xf32> -> vector<64x8xf32>
    %198 = arith.addf %191, %197 : vector<64x8xf32>
    %c3_131 = arith.constant 3 : index
    %c0_132 = arith.constant 0 : index
    %c0_133 = arith.constant 0 : index
    %199 = vector.load %arg6[%c3_131, %c0_132, %c0_133] : memref<4x16x8xf32, #tpu.memory_space<vmem>>, vector<1x16x8xf32>
    %200 = vector.shape_cast %199 : vector<1x16x8xf32> to vector<16x8xf32>
    %cst_134 = arith.constant dense<0.000000e+00> : vector<128x8xf32>
    %201 = tpu.matmul %173, %200, %cst_134 {dimension_numbers = #tpu.dot_dimension_numbers<[1], [0], [0], [1], [0, 0, 1, 1], [], []>} : vector<128x16xf32>, vector<16x8xf32>, vector<128x8xf32> -> vector<128x8xf32>
    %c3_135 = arith.constant 3 : index
    %c0_136 = arith.constant 0 : index
    %c0_137 = arith.constant 0 : index
    %202 = vector.load %arg7[%c3_135, %c0_136, %c0_137] : memref<4x64x128xf32, #tpu.memory_space<vmem>>, vector<1x64x128xf32>
    %203 = vector.shape_cast %202 : vector<1x64x128xf32> to vector<64x128xf32>
    %cst_138 = arith.constant dense<0.000000e+00> : vector<64x8xf32>
    %204 = tpu.matmul %203, %201, %cst_138 {dimension_numbers = #tpu.dot_dimension_numbers<[1], [0], [0], [1], [0, 0, 1, 1], [], []>} : vector<64x128xf32>, vector<128x8xf32>, vector<64x8xf32> -> vector<64x8xf32>
    %205 = arith.addf %198, %204 : vector<64x8xf32>
    %cst_139 = arith.constant 0.000000e+00 : f32
    %206 = vector.broadcast %cst_139 : f32 to vector<64x8xf32>
    %207 = arith.cmpf oge, %205, %206 : vector<64x8xf32>
    %cst_140 = arith.constant 2.000000e-01 : f32
    %208 = vector.broadcast %cst_140 : f32 to vector<64x8xf32>
    %209 = arith.mulf %208, %205 : vector<64x8xf32>
    %210 = arith.select %207, %205, %209 : vector<64x8xi1>, vector<64x8xf32>
    %c0_141 = arith.constant 0 : index
    %c0_142 = arith.constant 0 : index
    %c0_143 = arith.constant 0 : index
    %211 = vector.load %arg10[%c0_141, %c0_142, %c0_143] : memref<1x64x8xf32, #tpu.memory_space<vmem>>, vector<1x64x8xf32>
    %212 = vector.shape_cast %211 : vector<1x64x8xf32> to vector<64x8xf32>
    %213 = vector.shape_cast %210 : vector<64x8xf32> to vector<1x64x8xf32>
    tpu.vector_store %arg10[%c0_141, %c0_142, %c0_143], %213 {strides = array<i32>} : memref<1x64x8xf32, #tpu.memory_space<vmem>>, vector<1x64x8xf32>,
    return
  }
  func.func @transform_0(%arg0: i32) -> (i32, i32, i32) {
    %c0_i32 = arith.constant 0 : i32
    %c0_i32_0 = arith.constant 0 : i32
    %c0_i32_1 = arith.constant 0 : i32
    return %arg0, %c0_i32, %c0_i32_0 : i32, i32, i32
  }
  func.func @transform_1(%arg0: i32) -> (i32, i32, i32) {
    %c0_i32 = arith.constant 0 : i32
    %c0_i32_0 = arith.constant 0 : i32
    %c0_i32_1 = arith.constant 0 : i32
    %c0_i32_2 = arith.constant 0 : i32
    return %c0_i32, %c0_i32_0, %c0_i32_1 : i32, i32, i32
  }
  func.func @transform_2(%arg0: i32) -> (i32, i32, i32) {
    %c0_i32 = arith.constant 0 : i32
    %c0_i32_0 = arith.constant 0 : i32
    %c0_i32_1 = arith.constant 0 : i32
    %c0_i32_2 = arith.constant 0 : i32
    return %c0_i32, %c0_i32_0, %c0_i32_1 : i32, i32, i32
  }
  func.func @transform_3(%arg0: i32) -> (i32, i32, i32) {
    %c0_i32 = arith.constant 0 : i32
    %c0_i32_0 = arith.constant 0 : i32
    %c0_i32_1 = arith.constant 0 : i32
    %c0_i32_2 = arith.constant 0 : i32
    return %c0_i32, %c0_i32_0, %c0_i32_1 : i32, i32, i32
  }
  func.func @transform_4(%arg0: i32) -> (i32, i32, i32) {
    %c0_i32 = arith.constant 0 : i32
    %c0_i32_0 = arith.constant 0 : i32
    %c0_i32_1 = arith.constant 0 : i32
    %c0_i32_2 = arith.constant 0 : i32
    return %c0_i32, %c0_i32_0, %c0_i32_1 : i32, i32, i32
  }
  func.func @transform_5(%arg0: i32) -> (i32, i32, i32) {
    %c0_i32 = arith.constant 0 : i32
    %c0_i32_0 = arith.constant 0 : i32
    %c0_i32_1 = arith.constant 0 : i32
    %c0_i32_2 = arith.constant 0 : i32
    return %c0_i32, %c0_i32_0, %c0_i32_1 : i32, i32, i32
  }
  func.func @transform_6(%arg0: i32) -> (i32, i32, i32) {
    %c0_i32 = arith.constant 0 : i32
    %c0_i32_0 = arith.constant 0 : i32
    %c0_i32_1 = arith.constant 0 : i32
    %c0_i32_2 = arith.constant 0 : i32
    return %c0_i32, %c0_i32_0, %c0_i32_1 : i32, i32, i32
  }
  func.func @transform_7(%arg0: i32) -> (i32, i32, i32) {
    %c0_i32 = arith.constant 0 : i32
    %c0_i32_0 = arith.constant 0 : i32
    %c0_i32_1 = arith.constant 0 : i32
    return %arg0, %c0_i32, %c0_i32_0 : i32, i32, i32
  }
  func.func @transform_8(%arg0: i32) -> (i32, i32, i32) {
    %c0_i32 = arith.constant 0 : i32
    %c0_i32_0 = arith.constant 0 : i32
    %c0_i32_1 = arith.constant 0 : i32
    return %arg0, %c0_i32, %c0_i32_0 : i32, i32, i32
  }
  func.func @transform_9(%arg0: i32) -> (i32, i32, i32) {
    %c0_i32 = arith.constant 0 : i32
    %c0_i32_0 = arith.constant 0 : i32
    %c0_i32_1 = arith.constant 0 : i32
    return %arg0, %c0_i32, %c0_i32_0 : i32, i32, i32
  }
}

</mosaic_0001>

<bundles_post_ra>
// kernel: tpu_custom_call.1
= control target key start
LH: loop header
LB: loop body
LE: loop exit
PB: predicated region body
PF: predicated region fallthrough
CT: control target
= control target key end

     0   :  { %s3404_s30 = smov 0   ;;  %s5048_s0 = inlined_call_operand.vmem [shape: f32[2,64,64], index: 0, kind: input, shape index: {}]   ;;  %s5049_s1 = inlined_call_operand.vmem [shape: f32[4,64,32], index: 1, kind: input, shape index: {}]   ;;  %s5050_s2 = inlined_call_operand.vmem [shape: f32[4,128,64], index: 2, kind: input, shape index: {}]   ;;  %s5051_s3 = inlined_call_operand.vmem [shape: f32[4,32,16], index: 3, kind: input, shape index: {}]   ;;  %s5052_s4 = inlined_call_operand.vmem [shape: f32[4,128,128], index: 4, kind: input, shape index: {}]   ;;  %s5053_s5 = inlined_call_operand.vmem [shape: f32[4,16,8], index: 5, kind: input, shape index: {}]   ;;  %s5054_s6 = inlined_call_operand.vmem [shape: f32[4,64,128], index: 6, kind: input, shape index: {}]   ;;  %s5055_s7 = inlined_call_operand.vmem [shape: f32[2,128,32], index: 7, kind: output, shape index: {0}]   ;;  %s5056_s8 = inlined_call_operand.vmem [shape: f32[2,128,16], index: 8, kind: output, shape index: {1}]   ;;  %s5057_s9 = inlined_call_operand.vmem [shape: f32[2,64,8], index: 9, kind: output, shape index: {2}]  }
   0x1 LB: > { %s2925_s10 = sadd.s32 4294967295, %s3352_s30   ;;  %p2929_p0 = scmp.ge.s32.totalorder %s3352_s30, 1  ;;  %s3352_s30 = sphi %s3404_s30, %s20_s30  }
   0x2   : > { %p292_p1 = scmp.lt.s32.totalorder %s3352_s30, 3 }
   0x4   : > { %p293_p2 = pnand %p2929_p0, %p292_p1 }
   0x5   : > { %p338_p3 = scmp.lt.s32.totalorder (!%p293_p2), %s2925_s10, 1 }
   0x6   : > { %296 = sbr.rel (%p293_p2) target bundleno = 2088 (0x828), region = 48 }
   0xb   : > { %v373_v0 = vld [vmem:[%s5049_s1 + $0x38] sm:$0xff]  ;;  %v372_v3 = vld [vmem:[%s5049_s1 + $0x30] sm:$0xff]  ;;  %v371_v6 = vld [vmem:[%s5049_s1 + $0x28] sm:$0xff]  ;;  %s5059_s10 = smov (!%p338_p3, %s2925_s10), 1  ;;  %vm374_vm0 = vcmask 523264   ;;  %vm1141_vm1 = vcmask 261120  }
   0xc   : > { %v2953_v1 = vld [vmem:[%s5049_s1 + $0x78] sm:$0xff]  ;;  %407 = vmatpush.msra.mxu3 %v373_v0  ;;  %v2952_v4 = vld [vmem:[%s5049_s1 + $0x70] sm:$0xff]  ;;  %v2951_v7 = vld [vmem:[%s5049_s1 + $0x68] sm:$0xff]  ;;  %s3326_s22 = sshll.u32 %s5059_s10, 6 }
   0xd   : > { %v3017_v2 = vld [vmem:[%s5049_s1 + $0xb8] sm:$0xff]  ;;  %473 = vmatpush.msra.mxu1 %v2953_v1  ;;  %v3016_v5 = vld [vmem:[%s5049_s1 + $0xb0] sm:$0xff]  ;;  %v3015_v8 = vld [vmem:[%s5049_s1 + $0xa8] sm:$0xff]  ;;  %s3480_s16 = scalar_lea.vmem %s5048_s0, %s3326_s22  ;;  %s5025_s13 = scalar_lea.vmem %s5057_s9, %s3326_s22 }
   0xe   : > { %766 = vmatpush.msra.mxu0 %v3017_v2  ;;  %408 = vmatpush.msra.mxu3 %v372_v3  ;;  %v370_v9 = vld [vmem:[%s5049_s1 + $0x20] sm:$0xff]  ;;  %v369_v12 = vld [vmem:[%s5049_s1 + $0x18] sm:$0xff]  ;;  %v368_v15 = vld [vmem:[%s5049_s1 + $0x10] sm:$0xff] }
   0xf   : > { %474 = vmatpush.msra.mxu1 %v2952_v4  ;;  %v2950_v10 = vld [vmem:[%s5049_s1 + $0x60] sm:$0xff]  ;;  %v2949_v13 = vld [vmem:[%s5049_s1 + $0x58] sm:$0xff]  ;;  %v2948_v16 = vld [vmem:[%s5049_s1 + $0x50] sm:$0xff] }
  0x10   : > { %767 = vmatpush.msra.mxu0 %v3016_v5  ;;  %409 = vmatpush.msra.mxu3 %v371_v6  ;;  %v3014_v11 = vld [vmem:[%s5049_s1 + $0xa0] sm:$0xff]  ;;  %v3013_v14 = vld [vmem:[%s5049_s1 + $0x98] sm:$0xff]  ;;  %v3012_v17 = vld [vmem:[%s5049_s1 + $0x90] sm:$0xff] }
  0x11   : > { %475 = vmatpush.msra.mxu1 %v2951_v7  ;;  %v367_v18 = vld [vmem:[%s5049_s1 + $0x8] sm:$0xff]  ;;  %v366_v21 = vld [vmem:[%s5049_s1] sm:$0xff]  ;;  %v360_v26 = vld [vmem:[%s3480_s16 + $0x10] sm:$0xff] }
  0x12   : > { %768 = vmatpush.msra.mxu0 %v3015_v8  ;;  %410 = vmatpush.msra.mxu3 %v370_v9  ;;  %v2947_v19 = vld [vmem:[%s5049_s1 + $0x48] sm:$0xff]  ;;  %v2946_v22 = vld [vmem:[%s5049_s1 + $0x40] sm:$0xff]  ;;  %v3065_v27 = vld [vmem:[%s5049_s1 + $0xf8] sm:$0xff] }
  0x13   : > { %476 = vmatpush.msra.mxu1 %v2950_v10  ;;  %v3011_v20 = vld [vmem:[%s5049_s1 + $0x88] sm:$0xff]  ;;  %v3010_v23 = vld [vmem:[%s5049_s1 + $0x80] sm:$0xff]  ;;  %v3064_v28 = vld [vmem:[%s5049_s1 + $0xf0] sm:$0xff] }
  0x14   : > { %769 = vmatpush.msra.mxu0 %v3014_v11  ;;  %411 = vmatpush.msra.mxu3 %v369_v12  ;;  %v358_v24 = vld [vmem:[%s3480_s16] sm:$0xff]  ;;  %v359_v25 = vld [vmem:[%s3480_s16 + $0x8] sm:$0xff]  ;;  %v361_v30 = vld [vmem:[%s3480_s16 + $0x18] sm:$0xff] }
  0x15   : > { %477 = vmatpush.msra.mxu1 %v2949_v13  ;;  %v3063_v29 = vld [vmem:[%s5049_s1 + $0xe8] sm:$0xff]  ;;  %v3062_v31 = vld [vmem:[%s5049_s1 + $0xe0] sm:$0xff]  ;;  %v3061_v32 = vld [vmem:[%s5049_s1 + $0xd8] sm:$0xff] }
  0x16   : > { %770 = vmatpush.msra.mxu0 %v3013_v14  ;;  %412 = vmatpush.msra.mxu3 %v368_v15  ;;  %v3060_v33 = vld [vmem:[%s5049_s1 + $0xd0] sm:$0xff]  ;;  %v3059_v34 = vld [vmem:[%s5049_s1 + $0xc8] sm:$0xff]  ;;  %v362_v35 = vld [vmem:[%s3480_s16 + $0x20] sm:$0xff] }
  0x17   : > { %478 = vmatpush.msra.mxu1 %v2948_v16  ;;  %v3058_v36 = vld [vmem:[%s5049_s1 + $0xc0] sm:$0xff]  ;;  %v363_v37 = vld [vmem:[%s3480_s16 + $0x28] sm:$0xff]  ;;  %v364_v38 = vld [vmem:[%s3480_s16 + $0x30] sm:$0xff] }
  0x18   : > { %771 = vmatpush.msra.mxu0 %v3012_v17  ;;  %413 = vmatpush.msra.mxu3 %v367_v18  ;;  %v365_v39 = vld [vmem:[%s3480_s16 + $0x38] sm:$0xff]  ;;  %v2962_v1 = vld [vmem:[%s5050_s2 + $0x80] sm:$0xff]  ;;  %v2963_v5 = vld [vmem:[%s5050_s2 + $0x88] sm:$0xff]  ;;  %s3327_s16 = sshll.u32 %s5059_s10, 7 }
  0x19   : > { %479 = vmatpush.msra.mxu1 %v2947_v19  ;;  %v3026_v2 = vld [vmem:[%s5050_s2 + $0x100] sm:$0xff]  ;;  %v3027_v6 = vld [vmem:[%s5050_s2 + $0x108] sm:$0xff]  ;;  %v2964_v9 = vld [vmem:[%s5050_s2 + $0x90] sm:$0xff]  ;;  %s4005_s27 = scalar_lea.vmem %s5055_s7, %s3327_s16  ;;  %s4593_s14 = scalar_lea.vmem %s5056_s8, %s3327_s16 }
  0x1a   : > { %772 = vmatpush.msra.mxu0 %v3011_v20  ;;  %414 = vmatpush.msra.mxu3 %v366_v21  ;;  %v440_v4 = vld [vmem:[%s5050_s2] sm:$0xff]  ;;  %v441_v8 = vld [vmem:[%s5050_s2 + $0x8] sm:$0xff]  ;;  %v3028_v10 = vld [vmem:[%s5050_s2 + $0x110] sm:$0xff] }
  0x1b   : > { %480 = vmatpush.msra.mxu1 %v2946_v22  ;;  %2938 = vmatmul.msk.f32.vlgmr.msra.gmra.mxu3 %vm374_vm0, %v358_v24  ;;  %v442_v12 = vld [vmem:[%s5050_s2 + $0x10] sm:$0xff]  ;;  %v2965_v13 = vld [vmem:[%s5050_s2 + $0x98] sm:$0xff]  ;;  %v2966_v17 = vld [vmem:[%s5050_s2 + $0xa0] sm:$0xff] }
  0x1c   : > { %773 = vmatpush.msra.mxu0 %v3010_v23  ;;  %2954 = vmatmul.msk.f32.vlgmr.msra.gmra.mxu1 %vm374_vm0, %v358_v24  ;;  %v3029_v14 = vld [vmem:[%s5050_s2 + $0x118] sm:$0xff]  ;;  %v3030_v18 = vld [vmem:[%s5050_s2 + $0x120] sm:$0xff]  ;;  %v2967_v21 = vld [vmem:[%s5050_s2 + $0xa8] sm:$0xff] }
  0x1d   : > { %3018 = vmatmul.msk.f32.vlgmr.msra.gmra.mxu0 %vm374_vm0, %v358_v24  ;;  %v443_v16 = vld [vmem:[%s5050_s2 + $0x18] sm:$0xff]  ;;  %v444_v20 = vld [vmem:[%s5050_s2 + $0x20] sm:$0xff]  ;;  %v3031_v22 = vld [vmem:[%s5050_s2 + $0x128] sm:$0xff] }
  0x1e   : > { %962 = vmatpush.msrb.mxu0 %v3065_v27 }
  0x20   : > { %963 = vmatpush.msrb.mxu0 %v3064_v28  ;;  %v446_v28 = vld [vmem:[%s5050_s2 + $0x30] sm:$0xff] }
  0x22   : > { %964 = vmatpush.msrb.mxu0 %v3063_v29  ;;  %v2969_v29 = vld [vmem:[%s5050_s2 + $0xb8] sm:$0xff] }
  0x23   : > { %2939 = vmatmul.msk.f32.gmra.mxu3 %vm374_vm0, %v359_v25 }
  0x24   : > { %2955 = vmatmul.msk.f32.gmra.mxu1 %vm374_vm0, %v359_v25  ;;  %965 = vmatpush.msrb.mxu0 %v3062_v31  ;;  %v447_v31 = vld [vmem:[%s5050_s2 + $0x38] sm:$0xff] }
  0x25   : > { %3019 = vmatmul.msk.f32.gmra.mxu0 %vm374_vm0, %v359_v25 }
  0x26   : > { %966 = vmatpush.msrb.mxu0 %v3061_v32  ;;  %v2970_v32 = vld [vmem:[%s5050_s2 + $0xc0] sm:$0xff] }
  0x28   : > { %967 = vmatpush.msrb.mxu0 %v3060_v33  ;;  %v3034_v33 = vld [vmem:[%s5050_s2 + $0x140] sm:$0xff] }
  0x2a   : > { %968 = vmatpush.msrb.mxu0 %v3059_v34  ;;  %v448_v34 = vld [vmem:[%s5050_s2 + $0x40] sm:$0xff] }
  0x2b   : > { %2940 = vmatmul.msk.f32.gmra.mxu3 %vm374_vm0, %v360_v26 }
  0x2c   : > { %2956 = vmatmul.msk.f32.gmra.mxu1 %vm374_vm0, %v360_v26  ;;  %969 = vmatpush.msrb.mxu0 %v3058_v36  ;;  %v3035_v36 = vld [vmem:[%s5050_s2 + $0x148] sm:$0xff] }
  0x2d   : > { %3020 = vmatmul.msk.f32.gmra.mxu0 %vm374_vm0, %v360_v26 }
  0x33   : > { %2941 = vmatmul.msk.f32.gmra.mxu3 %vm374_vm0, %v361_v30 }
  0x34   : > { %2957 = vmatmul.msk.f32.gmra.mxu1 %vm374_vm0, %v361_v30 }
  0x35   : > { %3021 = vmatmul.msk.f32.gmra.mxu0 %vm374_vm0, %v361_v30 }
  0x3b   : > { %2942 = vmatmul.msk.f32.gmra.mxu3 %vm374_vm0, %v362_v35 }
  0x3c   : > { %2958 = vmatmul.msk.f32.gmra.mxu1 %vm374_vm0, %v362_v35 }
  0x3d   : > { %3022 = vmatmul.msk.f32.gmra.mxu0 %vm374_vm0, %v362_v35 }
  0x43   : > { %2943 = vmatmul.msk.f32.gmra.mxu3 %vm374_vm0, %v363_v37 }
  0x44   : > { %2959 = vmatmul.msk.f32.gmra.mxu1 %vm374_vm0, %v363_v37 }
  0x45   : > { %3023 = vmatmul.msk.f32.gmra.mxu0 %vm374_vm0, %v363_v37 }
  0x4b   : > { %2944 = vmatmul.msk.f32.gmra.mxu3 %vm374_vm0, %v364_v38 }
  0x4c   : > { %2960 = vmatmul.msk.f32.gmra.mxu1 %vm374_vm0, %v364_v38 }
  0x4d   : > { %3024 = vmatmul.msk.f32.gmra.mxu0 %vm374_vm0, %v364_v38 }
  0x53   : > { %2945 = vmatmul.msk.f32.gmra.mxu3 %vm374_vm0, %v365_v39 }
  0x54   : > { %2961 = vmatmul.msk.f32.gmra.mxu1 %vm374_vm0, %v365_v39 }
  0x55   : > { %3025 = vmatmul.msk.f32.gmra.mxu0 %vm374_vm0, %v365_v39 }
  0x5d   : > { %3066 = vmatmul.msk.f32.vlgmr.msrb.gmra.mxu0 %vm374_vm0, %v358_v24  ;;  %v445_v24 = vld [vmem:[%s5050_s2 + $0x28] sm:$0xff] }
  0x65   : > { %3067 = vmatmul.msk.f32.gmra.mxu0 %vm374_vm0, %v359_v25  ;;  %v2968_v25 = vld [vmem:[%s5050_s2 + $0xb0] sm:$0xff] }
  0x6d   : > { %3068 = vmatmul.msk.f32.gmra.mxu0 %vm374_vm0, %v360_v26  ;;  %v3032_v26 = vld [vmem:[%s5050_s2 + $0x130] sm:$0xff] }
  0x75   : > { %3069 = vmatmul.msk.f32.gmra.mxu0 %vm374_vm0, %v361_v30  ;;  %v3033_v30 = vld [vmem:[%s5050_s2 + $0x138] sm:$0xff] }
  0x7d   : > { %3070 = vmatmul.msk.f32.gmra.mxu0 %vm374_vm0, %v362_v35  ;;  %v2971_v35 = vld [vmem:[%s5050_s2 + $0xc8] sm:$0xff] }
  0x85   : > { %3071 = vmatmul.msk.f32.gmra.mxu0 %vm374_vm0, %v363_v37  ;;  %v449_v37 = vld [vmem:[%s5050_s2 + $0x48] sm:$0xff] }
  0x8d   : > { %3072 = vmatmul.msk.f32.gmra.mxu0 %vm374_vm0, %v364_v38  ;;  %v2972_v38 = vld [vmem:[%s5050_s2 + $0xd0] sm:$0xff] }
  0x95   : > { %3073 = vmatmul.msk.f32.gmra.mxu0 %vm374_vm0, %v365_v39  ;;  %v3036_v39 = vld [vmem:[%s5050_s2 + $0x150] sm:$0xff] }
  0x99   : > { %v482_v40 = vpop.f32.mrf.mxu1 }
  0x9a   : > { %v775_v41 = vpop.f32.mrf.mxu0 }
  0x9e   : > { %v416_v42 = vpop.f32.mrf.mxu3 }
  0xa1   : > { %v485_v43 = vpop.f32.mrf.mxu1 }
  0xa2   : > { %v778_v44 = vpop.f32.mrf.mxu0 }
  0xa6   : > { %v419_v45 = vpop.f32.mrf.mxu3 }
  0xa9   : > { %v488_v46 = vpop.f32.mrf.mxu1 }
  0xaa   : > { %v781_v47 = vpop.f32.mrf.mxu0 }
  0xae   : > { %v422_v48 = vpop.f32.mrf.mxu3 }
  0xb1   : > { %v491_v49 = vpop.f32.mrf.mxu1 }
  0xb2   : > { %v784_v50 = vpop.f32.mrf.mxu0 }
  0xb6   : > { %v425_v51 = vpop.f32.mrf.mxu3 }
  0xb9   : > { %v494_v52 = vpop.f32.mrf.mxu1 }
  0xba   : > { %v787_v53 = vpop.f32.mrf.mxu0 }
  0xbe   : > { %v428_v54 = vpop.f32.mrf.mxu3 }
  0xc1   : > { %v497_v55 = vpop.f32.mrf.mxu1 }
  0xc2   : > { %v790_v56 = vpop.f32.mrf.mxu0 }
  0xc6   : > { %v431_v57 = vpop.f32.mrf.mxu3 }
  0xc9   : > { %v500_v58 = vpop.f32.mrf.mxu1 }
  0xca   : > { %v793_v59 = vpop.f32.mrf.mxu0 }
  0xce   : > { %v434_v60 = vpop.f32.mrf.mxu3 }
  0xd1   : > { %v503_v61 = vpop.f32.mrf.mxu1 }
  0xd2   : > { %v796_v62 = vpop.f32.mrf.mxu0  ;;  %579 = vmatpush.msra.mxu2 %v503_v61 }
  0xd3   : > { %872 = vmatpush.msrb.mxu1 %v796_v62  ;;  %v3077_v62 = vld [vmem:[%s5050_s2 + $0x198] sm:$0xff] }
  0xd4   : > { %580 = vmatpush.msra.mxu2 %v500_v58  ;;  %v3075_v58 = vld [vmem:[%s5050_s2 + $0x188] sm:$0xff] }
  0xd5   : > { %873 = vmatpush.msrb.mxu1 %v793_v59 }
  0xd6   : > { %581 = vmatpush.msra.mxu2 %v497_v55  ;;  %v437_v63 = vpop.f32.mrf.mxu3  ;;  %v455_v55 = vld [vmem:[%s5050_s2 + $0x78] sm:$0xff] }
  0xd7   : > { %874 = vmatpush.msrb.mxu1 %v790_v56  ;;  %692 = vmatpush.msrb.mxu3 %v437_v63  ;;  %v3074_v56 = vld [vmem:[%s5050_s2 + $0x180] sm:$0xff] }
  0xd8   : > { %582 = vmatpush.msra.mxu2 %v494_v52  ;;  %v454_v52 = vld [vmem:[%s5050_s2 + $0x70] sm:$0xff] }
  0xd9   : > { %875 = vmatpush.msrb.mxu1 %v787_v53  ;;  %693 = vmatpush.msrb.mxu3 %v434_v60  ;;  %v2977_v53 = vld [vmem:[%s5050_s2 + $0xf8] sm:$0xff]  ;;  %v3076_v60 = vld [vmem:[%s5050_s2 + $0x190] sm:$0xff] }
  0xda   : > { %v3558_v0 = vpop.f32.mrf.mxu0  ;;  %583 = vmatpush.msra.mxu2 %v491_v49  ;;  %v453_v49 = vld [vmem:[%s5050_s2 + $0x68] sm:$0xff] }
  0xdb   : > { %876 = vmatpush.msrb.mxu1 %v784_v50  ;;  %694 = vmatpush.msrb.mxu3 %v431_v57  ;;  %v2976_v50 = vld [vmem:[%s5050_s2 + $0xf0] sm:$0xff] }
  0xdc   : > { %584 = vmatpush.msra.mxu2 %v488_v46  ;;  %v452_v46 = vld [vmem:[%s5050_s2 + $0x60] sm:$0xff] }
  0xdd   : > { %877 = vmatpush.msrb.mxu1 %v781_v47  ;;  %695 = vmatpush.msrb.mxu3 %v428_v54  ;;  %v2975_v47 = vld [vmem:[%s5050_s2 + $0xe8] sm:$0xff]  ;;  %v3041_v54 = vld [vmem:[%s5050_s2 + $0x178] sm:$0xff] }
  0xde   : > { %585 = vmatpush.msra.mxu2 %v485_v43  ;;  %v451_v43 = vld [vmem:[%s5050_s2 + $0x58] sm:$0xff] }
  0xdf   : > { %878 = vmatpush.msrb.mxu1 %v778_v44  ;;  %696 = vmatpush.msrb.mxu3 %v425_v51  ;;  %v2974_v44 = vld [vmem:[%s5050_s2 + $0xe0] sm:$0xff]  ;;  %v3040_v51 = vld [vmem:[%s5050_s2 + $0x170] sm:$0xff] }
  0xe0   : > { %586 = vmatpush.msra.mxu2 %v482_v40  ;;  %v450_v40 = vld [vmem:[%s5050_s2 + $0x50] sm:$0xff] }
  0xe1   : > { %879 = vmatpush.msrb.mxu1 %v775_v41  ;;  %2978 = vmatmul.msk.f32.vlgmr.msra.gmra.mxu2 %vm374_vm0, %v2962_v1  ;;  %v2973_v41 = vld [vmem:[%s5050_s2 + $0xd8] sm:$0xff] }
  0xe2   : > { %v974_v3 = vpop.f32.mrf.mxu0  ;;  %697 = vmatpush.msrb.mxu3 %v422_v48  ;;  %3042 = vmatmul.msk.f32.vlgmr.msrb.gmra.mxu1 %vm374_vm0, %v3026_v2  ;;  %v3039_v48 = vld [vmem:[%s5050_s2 + $0x168] sm:$0xff] }
  0xe3   : > { %v3079_v2 = vld [vmem:[%s5050_s2 + $0x1a8] sm:$0xff] }
  0xe4   : > { %698 = vmatpush.msrb.mxu3 %v419_v45  ;;  %v3038_v45 = vld [vmem:[%s5050_s2 + $0x160] sm:$0xff] }
  0xe6   : > { %699 = vmatpush.msrb.mxu3 %v416_v42  ;;  %v3037_v42 = vld [vmem:[%s5050_s2 + $0x158] sm:$0xff] }
  0xe7   : > { %2994 = vmatmul.msk.f32.vlgmr.msrb.gmra.mxu3 %vm374_vm0, %v440_v4  ;;  %v3080_v4 = vld [vmem:[%s5050_s2 + $0x1b0] sm:$0xff] }
  0xe9   : > { %2979 = vmatmul.msk.f32.gmra.mxu2 %vm374_vm0, %v2963_v5 }
  0xea   : > { %v977_v7 = vpop.f32.mrf.mxu0  ;;  %3043 = vmatmul.msk.f32.gmra.mxu1 %vm374_vm0, %v3027_v6  ;;  %v3081_v6 = vld [vmem:[%s5050_s2 + $0x1b8] sm:$0xff] }
  0xef   : > { %2995 = vmatmul.msk.f32.gmra.mxu3 %vm374_vm0, %v441_v8  ;;  %v3082_v8 = vld [vmem:[%s5050_s2 + $0x1c0] sm:$0xff] }
  0xf1   : > { %2980 = vmatmul.msk.f32.gmra.mxu2 %vm374_vm0, %v2964_v9 }
  0xf2   : > { %v980_v11 = vpop.f32.mrf.mxu0  ;;  %3044 = vmatmul.msk.f32.gmra.mxu1 %vm374_vm0, %v3028_v10  ;;  %v3083_v10 = vld [vmem:[%s5050_s2 + $0x1c8] sm:$0xff] }
  0xf7   : > { %2996 = vmatmul.msk.f32.gmra.mxu3 %vm374_vm0, %v442_v12  ;;  %v3084_v12 = vld [vmem:[%s5050_s2 + $0x1d0] sm:$0xff] }
  0xf9   : > { %2981 = vmatmul.msk.f32.gmra.mxu2 %vm374_vm0, %v2965_v13 }
  0xfa   : > { %v983_v15 = vpop.f32.mrf.mxu0  ;;  %3045 = vmatmul.msk.f32.gmra.mxu1 %vm374_vm0, %v3029_v14  ;;  %v3085_v14 = vld [vmem:[%s5050_s2 + $0x1d8] sm:$0xff] }
  0xff   : > { %2997 = vmatmul.msk.f32.gmra.mxu3 %vm374_vm0, %v443_v16 }
 0x101   : > { %2982 = vmatmul.msk.f32.gmra.mxu2 %vm374_vm0, %v2966_v17  ;;  %v3086_v17 = vld [vmem:[%s5050_s2 + $0x1e0] sm:$0xff] }
 0x102   : > { %v986_v19 = vpop.f32.mrf.mxu0  ;;  %3046 = vmatmul.msk.f32.gmra.mxu1 %vm374_vm0, %v3030_v18 }
 0x107   : > { %2998 = vmatmul.msk.f32.gmra.mxu3 %vm374_vm0, %v444_v20  ;;  %v3087_v20 = vld [vmem:[%s5050_s2 + $0x1e8] sm:$0xff] }
 0x109   : > { %2983 = vmatmul.msk.f32.gmra.mxu2 %vm374_vm0, %v2967_v21 }
 0x10a   : > { %v989_v23 = vpop.f32.mrf.mxu0  ;;  %3047 = vmatmul.msk.f32.gmra.mxu1 %vm374_vm0, %v3031_v22 }
 0x10f   : > { %2999 = vmatmul.msk.f32.gmra.mxu3 %vm374_vm0, %v445_v24  ;;  %v3088_v24 = vld [vmem:[%s5050_s2 + $0x1f0] sm:$0xff] }
 0x111   : > { %2984 = vmatmul.msk.f32.gmra.mxu2 %vm374_vm0, %v2968_v25 }
 0x112   : > { %v992_v27 = vpop.f32.mrf.mxu0  ;;  %3048 = vmatmul.msk.f32.gmra.mxu1 %vm374_vm0, %v3032_v26 }
 0x113   : > { %1068 = vmatpush.msrb.mxu2 %v992_v27 }
 0x115   : > { %1069 = vmatpush.msrb.mxu2 %v989_v23 }
 0x117   : > { %1070 = vmatpush.msrb.mxu2 %v986_v19  ;;  %3000 = vmatmul.msk.f32.gmra.mxu3 %vm374_vm0, %v446_v28  ;;  %v3089_v28 = vld [vmem:[%s5050_s2 + $0x1f8] sm:$0xff] }
 0x119   : > { %1071 = vmatpush.msrb.mxu2 %v983_v15 }
 0x11a   : > { %2985 = vmatmul.msk.f32.gmra.mxu2 %vm374_vm0, %v2969_v29  ;;  %3049 = vmatmul.msk.f32.gmra.mxu1 %vm374_vm0, %v3033_v30 }
 0x11b   : > { %1072 = vmatpush.msrb.mxu2 %v980_v11 }
 0x11d   : > { %1073 = vmatpush.msrb.mxu2 %v977_v7 }
 0x11f   : > { %1074 = vmatpush.msrb.mxu2 %v974_v3  ;;  %3001 = vmatmul.msk.f32.gmra.mxu3 %vm374_vm0, %v447_v31 }
 0x121   : > { %1075 = vmatpush.msrb.mxu2 %v3558_v0  ;;  %v3078_v0 = vld [vmem:[%s5050_s2 + $0x1a0] sm:$0xff] }
 0x122   : > { %2986 = vmatmul.msk.f32.gmra.mxu2 %vm374_vm0, %v2970_v32  ;;  %3050 = vmatmul.msk.f32.gmra.mxu1 %vm374_vm0, %v3034_v33 }
 0x127   : > { %3002 = vmatmul.msk.f32.gmra.mxu3 %vm374_vm0, %v448_v34 }
 0x12a   : > { %2987 = vmatmul.msk.f32.gmra.mxu2 %vm374_vm0, %v2971_v35  ;;  %3051 = vmatmul.msk.f32.gmra.mxu1 %vm374_vm0, %v3035_v36 }
 0x12f   : > { %3003 = vmatmul.msk.f32.gmra.mxu3 %vm374_vm0, %v449_v37 }
 0x132   : > { %2988 = vmatmul.msk.f32.gmra.mxu2 %vm374_vm0, %v2972_v38  ;;  %3052 = vmatmul.msk.f32.gmra.mxu1 %vm374_vm0, %v3036_v39 }
 0x137   : > { %3004 = vmatmul.msk.f32.gmra.mxu3 %vm374_vm0, %v450_v40 }
 0x13a   : > { %2989 = vmatmul.msk.f32.gmra.mxu2 %vm374_vm0, %v2973_v41  ;;  %3053 = vmatmul.msk.f32.gmra.mxu1 %vm374_vm0, %v3037_v42 }
 0x13f   : > { %3005 = vmatmul.msk.f32.gmra.mxu3 %vm374_vm0, %v451_v43 }
 0x142   : > { %2990 = vmatmul.msk.f32.gmra.mxu2 %vm374_vm0, %v2974_v44  ;;  %3054 = vmatmul.msk.f32.gmra.mxu1 %vm374_vm0, %v3038_v45 }
 0x147   : > { %3006 = vmatmul.msk.f32.gmra.mxu3 %vm374_vm0, %v452_v46 }
 0x14a   : > { %2991 = vmatmul.msk.f32.gmra.mxu2 %vm374_vm0, %v2975_v47  ;;  %3055 = vmatmul.msk.f32.gmra.mxu1 %vm374_vm0, %v3039_v48 }
 0x14f   : > { %3007 = vmatmul.msk.f32.gmra.mxu3 %vm374_vm0, %v453_v49 }
 0x152   : > { %2992 = vmatmul.msk.f32.gmra.mxu2 %vm374_vm0, %v2976_v50  ;;  %3056 = vmatmul.msk.f32.gmra.mxu1 %vm374_vm0, %v3040_v51 }
 0x157   : > { %3008 = vmatmul.msk.f32.gmra.mxu3 %vm374_vm0, %v454_v52 }
 0x15a   : > { %2993 = vmatmul.msk.f32.gmra.mxu2 %vm374_vm0, %v2977_v53  ;;  %3057 = vmatmul.msk.f32.gmra.mxu1 %vm374_vm0, %v3041_v54 }
 0x15f   : > { %3009 = vmatmul.msk.f32.gmra.mxu3 %vm374_vm0, %v455_v55  ;;  %v881_v18 = vpop.f32.mrf.mxu1 }
 0x162   : > { %3090 = vmatmul.msk.f32.vlgmr.msrb.gmra.mxu2 %vm374_vm0, %v3074_v56 }
 0x164   : > { %v588_v57 = vpop.f32.mrf.mxu2 }
 0x167   : > { %v884_v22 = vpop.f32.mrf.mxu1 }
 0x16a   : > { %3091 = vmatmul.msk.f32.gmra.mxu2 %vm374_vm0, %v3075_v58  ;;  %v701_v16 = vpop.f32.mrf.mxu3 }
 0x16b   : > { %v702_v31 = vadd.f32 %v701_v16, %v588_v57 }
 0x16c   : > { %v591_v59 = vpop.f32.mrf.mxu2 }
 0x16d   : > { %v929_v33 = vadd.f32 %v881_v18, %v702_v31 }
 0x16f   : > { %v887_v27 = vpop.f32.mrf.mxu1 }
 0x172   : > { %3092 = vmatmul.msk.f32.gmra.mxu2 %vm374_vm0, %v3076_v60  ;;  %v704_v21 = vpop.f32.mrf.mxu3 }
 0x173   : > { %v705_v37 = vadd.f32 %v704_v21, %v591_v59 }
 0x174   : > { %v3765_v61 = vpop.f32.mrf.mxu2 }
 0x175   : > { %v930_v42 = vadd.f32 %v884_v22, %v705_v37 }
 0x177   : > { %v890_v32 = vpop.f32.mrf.mxu1 }
 0x17a   : > { %3093 = vmatmul.msk.f32.gmra.mxu2 %vm374_vm0, %v3077_v62  ;;  %v707_v25 = vpop.f32.mrf.mxu3 }
 0x17b   : > { %v708_v45 = vadd.f32 %v707_v25, %v3765_v61 }
 0x17c   : > { %v3771_v63 = vpop.f32.mrf.mxu2 }
 0x17d   : > { %v931_v50 = vadd.f32 %v887_v27, %v708_v45 }
 0x17f   : > { %v893_v41 = vpop.f32.mrf.mxu1 }
 0x182   : > { %3094 = vmatmul.msk.f32.gmra.mxu2 %vm374_vm0, %v3078_v0  ;;  %v710_v29 = vpop.f32.mrf.mxu3 }
 0x183   : > { %v711_v54 = vadd.f32 %v710_v29, %v3771_v63 }
 0x184   : > { %v3777_v1 = vpop.f32.mrf.mxu2 }
 0x185   : > { %v932_v59 = vadd.f32 %v890_v32, %v711_v54 }
 0x187   : > { %v896_v51 = vpop.f32.mrf.mxu1 }
 0x18a   : > { %3095 = vmatmul.msk.f32.gmra.mxu2 %vm374_vm0, %v3079_v2  ;;  %v713_v36 = vpop.f32.mrf.mxu3 }
 0x18b   : > { %v714_v0 = vadd.f32 %v713_v36, %v3777_v1 }
 0x18c   : > { %v3783_v3 = vpop.f32.mrf.mxu2 }
 0x18f   : > { %v899_v62 = vpop.f32.mrf.mxu1 }
 0x192   : > { %3096 = vmatmul.msk.f32.gmra.mxu2 %vm374_vm0, %v3080_v4  ;;  %v716_v48 = vpop.f32.mrf.mxu3 }
 0x194   : > { %v3789_v5 = vpop.f32.mrf.mxu2 }
 0x197   : > { %v902_v16 = vpop.f32.mrf.mxu1 }
 0x19a   : > { %3097 = vmatmul.msk.f32.gmra.mxu2 %vm374_vm0, %v3081_v6  ;;  %v719_v58 = vpop.f32.mrf.mxu3  ;;  %v933_v6 = vadd.f32 %v893_v41, %v714_v0 }
 0x19d   : > { %v3795_v7 = vpop.f32.mrf.mxu2 }
 0x19f   : > { %v905_v27 = vpop.f32.mrf.mxu1 }
 0x1a2   : > { %3098 = vmatmul.msk.f32.gmra.mxu2 %vm374_vm0, %v3082_v8  ;;  %v722_v8 = vpop.f32.mrf.mxu3 }
 0x1a5   : > { %v3801_v9 = vpop.f32.mrf.mxu2 }
 0x1aa   : > { %3099 = vmatmul.msk.f32.gmra.mxu2 %vm374_vm0, %v3083_v10  ;;  %v725_v22 = vpop.f32.mrf.mxu3 }
 0x1ad   : > { %v3807_v11 = vpop.f32.mrf.mxu2 }
 0x1b2   : > { %3100 = vmatmul.msk.f32.gmra.mxu2 %vm374_vm0, %v3084_v12  ;;  %v728_v37 = vpop.f32.mrf.mxu3 }
 0x1b5   : > { %v3813_v13 = vpop.f32.mrf.mxu2 }
 0x1ba   : > { %3101 = vmatmul.msk.f32.gmra.mxu2 %vm374_vm0, %v3085_v14  ;;  %v717_v14 = vadd.f32 %v716_v48, %v3783_v3 }
 0x1bd   : > { %v3819_v15 = vpop.f32.mrf.mxu2 }
 0x1c2   : > { %3102 = vmatmul.msk.f32.gmra.mxu2 %vm374_vm0, %v3086_v17  ;;  %v934_v17 = vadd.f32 %v896_v51, %v717_v14 }
 0x1c5   : > { %v3825_v19 = vpop.f32.mrf.mxu2 }
 0x1ca   : > { %3103 = vmatmul.msk.f32.gmra.mxu2 %vm374_vm0, %v3087_v20 }
 0x1cd   : > { %v3831_v23 = vpop.f32.mrf.mxu2 }
 0x1d2   : > { %3104 = vmatmul.msk.f32.gmra.mxu2 %vm374_vm0, %v3088_v24  ;;  %v720_v24 = vadd.f32 %v719_v58, %v3789_v5 }
 0x1d5   : > { %v3837_v26 = vpop.f32.mrf.mxu2 }
 0x1da   : > { %3105 = vmatmul.msk.f32.gmra.mxu2 %vm374_vm0, %v3089_v28  ;;  %v935_v28 = vadd.f32 %v899_v62, %v720_v24 }
 0x1dd   : > { %v3843_v30 = vpop.f32.mrf.mxu2 }
 0x1e5   : > { %v1077_v34 = vpop.f32.mrf.mxu2 }
 0x1e6   : > { %v3845_v35 = vadd.f32 %v1077_v34, %v929_v33  ;;  %v723_v33 = vadd.f32 %v722_v8, %v3795_v7  ;;  %v726_v7 = vadd.f32 %v725_v22, %v3801_v9 }
 0x1e8   : > { %v1142_v38 = vsel %vm1141_vm1, %v3845_v35, 0.0  ;;  %v1154_v39 = vmul.f32 %v3845_v35, %v3845_v35  ;;  %v937_v48 = vadd.f32 %v905_v27, %v726_v7 }
 0x1e9   : > { %1143 = vadd.xlane.f32.xlu0 %v1142_v38 }
 0x1ea   : > { %v1158_v40 = vsel %vm1141_vm1, %v1154_v39, 0.0  ;;  %v936_v39 = vadd.f32 %v902_v16, %v723_v33 }
 0x1eb   : > { %1159 = vadd.xlane.f32.xlu1 %v1158_v40  ;;  %v908_v40 = vpop.f32.mrf.mxu1 }
 0x1ed   : > { %v1080_v43 = vpop.f32.mrf.mxu2 }
 0x1ee   : > { %v3852_v44 = vadd.f32 %v1080_v43, %v930_v42 }
 0x1f0   : > { %v1145_v46 = vsel %vm1141_vm1, %v3852_v44, 0.0  ;;  %v1155_v47 = vmul.f32 %v3852_v44, %v3852_v44 }
 0x1f1   : > { %1146 = vadd.xlane.f32.xlu0 %v1145_v46 }
 0x1f2   : > { %v1161_v49 = vsel %vm1141_vm1, %v1155_v47, 0.0  ;;  %v731_v47 = vpop.f32.mrf.mxu3 }
 0x1f3   : > { %1162 = vadd.xlane.f32.xlu2 %v1161_v49  ;;  %v911_v51 = vpop.f32.mrf.mxu1 }
 0x1f5   : > { %v1083_v52 = vpop.f32.mrf.mxu2 }
 0x1f6   : > { %v3860_v53 = vadd.f32 %v1083_v52, %v931_v50  ;;  %v729_v52 = vadd.f32 %v728_v37, %v3807_v11 }
 0x1f8   : > { %v1148_v55 = vsel %vm1141_vm1, %v3860_v53, 0.0  ;;  %v1156_v56 = vmul.f32 %v3860_v53, %v3860_v53  ;;  %v938_v54 = vadd.f32 %v908_v40, %v729_v52 }
 0x1f9   : > { %1149 = vadd.xlane.f32.xlu1 %v1148_v55 }
 0x1fa   : > { %v1164_v57 = vsel %vm1141_vm1, %v1156_v56, 0.0  ;;  %v734_v56 = vpop.f32.mrf.mxu3 }
 0x1fb   : > { %1165 = vadd.xlane.f32.xlu0 %v1164_v57  ;;  %v914_v11 = vpop.f32.mrf.mxu1  ;;  %v735_v8 = vadd.f32 %v734_v56, %v3819_v15 }
 0x1fd   : > { %v1086_v60 = vpop.f32.mrf.mxu2 }
 0x1fe   : > { %v3868_v61 = vadd.f32 %v1086_v60, %v932_v59  ;;  %v732_v59 = vadd.f32 %v731_v47, %v3813_v13 }
 0x200   : > { %v1151_v63 = vsel %vm1141_vm1, %v3868_v61, 0.0  ;;  %v1157_v2 = vmul.f32 %v3868_v61, %v3868_v61  ;;  %v939_v0 = vadd.f32 %v911_v51, %v732_v59 }
 0x201   : > { %1152 = vadd.xlane.f32.xlu2 %v1151_v63 }
 0x202   : > { %v1167_v4 = vsel %vm1141_vm1, %v1157_v2, 0.0 }
 0x203   : > { %1168 = vadd.xlane.f32.xlu1 %v1167_v4  ;;  %v917_v16 = vpop.f32.mrf.mxu1 }
 0x205   : > { %v1089_v10 = vpop.f32.mrf.mxu2 }
 0x206   : > { %v3876_v12 = vadd.f32 %v1089_v10, %v933_v6  ;;  %v737_v6 = vpop.f32.mrf.mxu3 }
 0x207   : > { %v738_v15 = vadd.f32 %v737_v6, %v3825_v19 }
 0x208   : > { %v1212_v1 = vsel %vm1141_vm1, %v3876_v12, 0.0  ;;  %v1224_v18 = vmul.f32 %v3876_v12, %v3876_v12 }
 0x209   : > { %1213 = vadd.xlane.f32.xlu2 %v1212_v1  ;;  %v941_v27 = vadd.f32 %v917_v16, %v738_v15 }
 0x20a   : > { %v1228_v25 = vsel %vm1141_vm1, %v1224_v18, 0.0 }
 0x20d   : > { %v1092_v20 = vpop.f32.mrf.mxu2 }
 0x20e   : > { %v3883_v21 = vadd.f32 %v1092_v20, %v934_v17  ;;  %v940_v17 = vadd.f32 %v914_v11, %v735_v8 }
 0x210   : > { %v1215_v3 = vsel %vm1141_vm1, %v3883_v21, 0.0  ;;  %v1225_v29 = vmul.f32 %v3883_v21, %v3883_v21 }
 0x211   : > { %1229 = vadd.xlane.f32.xlu2 %v1228_v25  ;;  %1216 = vadd.xlane.f32.xlu0 %v1215_v3  ;;  %v740_v25 = vpop.f32.mrf.mxu3 }
 0x212   : > { %v1231_v34 = vsel %vm1141_vm1, %v1225_v29, 0.0  ;;  %v741_v33 = vadd.f32 %v740_v25, %v3831_v23 }
 0x215   : > { %v1095_v31 = vpop.f32.mrf.mxu2 }
 0x216   : > { %v3891_v32 = vadd.f32 %v1095_v31, %v935_v28  ;;  %v920_v28 = vpop.f32.mrf.mxu1 }
 0x218   : > { %v1218_v5 = vsel %vm1141_vm1, %v3891_v32, 0.0  ;;  %v1226_v36 = vmul.f32 %v3891_v32, %v3891_v32 }
 0x219   : > { %1219 = vadd.xlane.f32.xlu1 %v1218_v5  ;;  %1232 = vadd.xlane.f32.xlu0 %v1231_v34  ;;  %v743_v5 = vpop.f32.mrf.mxu3  ;;  %v942_v34 = vadd.f32 %v920_v28, %v741_v33  ;;  %v1488_v33 = vld [vmem:[%s5051_s3 + $0x10] sm:$0xff] }
 0x21a   : > { %v1234_v38 = vsel %vm1141_vm1, %v1226_v36, 0.0  ;;  %v744_v40 = vadd.f32 %v743_v5, %v3837_v26 }
 0x21b   : > { %1235 = vadd.xlane.f32.xlu2 %v1234_v38 }
 0x21d   : > { %v1098_v41 = vpop.f32.mrf.mxu2 }
 0x21e   : > { %v3900_v42 = vadd.f32 %v1098_v41, %v936_v39  ;;  %v923_v39 = vpop.f32.mrf.mxu1 }
 0x21f   : > { %v943_v7 = vadd.f32 %v923_v39, %v744_v40  ;;  %v3123_v39 = vld [vmem:[%s5051_s3 + $0x28] sm:$0xff] }
 0x220   : > { %v1221_v43 = vsel %vm1141_vm1, %v3900_v42, 0.0  ;;  %v1227_v45 = vmul.f32 %v3900_v42, %v3900_v42 }
 0x221   : > { %1222 = vadd.xlane.f32.xlu1 %v1221_v43 }
 0x222   : > { %v1237_v46 = vsel %vm1141_vm1, %v1227_v45, 0.0  ;;  %v746_v45 = vpop.f32.mrf.mxu3 }
 0x223   : > { %1238 = vadd.xlane.f32.xlu0 %v1237_v46 }
 0x225   : > { %v1101_v49 = vpop.f32.mrf.mxu2 }
 0x226   : > { %v3908_v50 = vadd.f32 %v1101_v49, %v937_v48  ;;  %v747_v48 = vadd.f32 %v746_v45, %v3843_v30  ;;  %v926_v52 = vpop.f32.mrf.mxu1 }
 0x228   : > { %v1282_v9 = vsel %vm1141_vm1, %v3908_v50, 0.0  ;;  %v1294_v55 = vmul.f32 %v3908_v50, %v3908_v50 }
 0x229   : > { %1283 = vadd.xlane.f32.xlu1 %v1282_v9 }
 0x22a   : > { %v1298_v62 = vsel %vm1141_vm1, %v1294_v55, 0.0 }
 0x22d   : > { %v1104_v57 = vpop.f32.mrf.mxu2 }
 0x22e   : > { %v3915_v58 = vadd.f32 %v1104_v57, %v938_v54  ;;  %v944_v54 = vadd.f32 %v926_v52, %v747_v48 }
 0x230   : > { %v1285_v60 = vsel %vm1141_vm1, %v3915_v58, 0.0  ;;  %v1295_v63 = vmul.f32 %v3915_v58, %v3915_v58 }
 0x231   : > { %1286 = vadd.xlane.f32.xlu2 %v1285_v60  ;;  %1299 = vadd.xlane.f32.xlu1 %v1298_v62 }
 0x232   : > { %v1301_v13 = vsel %vm1141_vm1, %v1295_v63, 0.0 }
 0x235   : > { %v1107_v2 = vpop.f32.mrf.mxu2 }
 0x236   : > { %v3923_v4 = vadd.f32 %v1107_v2, %v939_v0 }
 0x238   : > { %v1288_v10 = vsel %vm1141_vm1, %v3923_v4, 0.0  ;;  %v1296_v14 = vmul.f32 %v3923_v4, %v3923_v4 }
 0x239   : > { %1302 = vadd.xlane.f32.xlu2 %v1301_v13  ;;  %1289 = vadd.xlane.f32.xlu0 %v1288_v10 }
 0x23a   : > { %v1304_v1 = vsel %vm1141_vm1, %v1296_v14, 0.0 }
 0x23b   : > { %1305 = vadd.xlane.f32.xlu1 %v1304_v1 }
 0x23d   : > { %v1110_v18 = vpop.f32.mrf.mxu2 }
 0x23e   : > { %v3932_v20 = vadd.f32 %v1110_v18, %v940_v17 }
 0x240   : > { %v1291_v22 = vsel %vm1141_vm1, %v3932_v20, 0.0  ;;  %v1297_v24 = vmul.f32 %v3932_v20, %v3932_v20 }
 0x241   : > { %1292 = vadd.xlane.f32.xlu0 %v1291_v22 }
 0x242   : > { %v1307_v3 = vsel %vm1141_vm1, %v1297_v24, 0.0 }
 0x243   : > { %1308 = vadd.xlane.f32.xlu2 %v1307_v3  ;;  %v1489_v3 = vld [vmem:[%s5051_s3 + $0x18] sm:$0xff] }
 0x244   : > { %1550 = vmatpush.msra.mxu3 %v1489_v3 }
 0x245   : > { %v1113_v29 = vpop.f32.mrf.mxu2 }
 0x246   : > { %v3940_v31 = vadd.f32 %v1113_v29, %v941_v27  ;;  %v3125_v27 = vld [vmem:[%s5051_s3 + $0x38] sm:$0xff]  ;;  %1551 = vmatpush.msra.mxu3 %v1488_v33 }
 0x247   : > { %1636 = vmatpush.msra.mxu0 %v3125_v27 }
 0x248   : > { %v1352_v19 = vsel %vm1141_vm1, %v3940_v31, 0.0  ;;  %v1364_v36 = vmul.f32 %v3940_v31, %v3940_v31 }
 0x249   : > { %1353 = vadd.xlane.f32.xlu0 %v1352_v19  ;;  %v3124_v19 = vld [vmem:[%s5051_s3 + $0x30] sm:$0xff] }
 0x24a   : > { %v1368_v23 = vsel %vm1141_vm1, %v1364_v36, 0.0  ;;  %1637 = vmatpush.msra.mxu0 %v3124_v19 }
 0x24c   : > { %1638 = vmatpush.msra.mxu0 %v3123_v39 }
 0x24d   : > { %v1116_v37 = vpop.f32.mrf.mxu2 }
 0x24e   : > { %v3947_v38 = vadd.f32 %v1116_v37, %v942_v34  ;;  %v1487_v37 = vld [vmem:[%s5051_s3 + $0x8] sm:$0xff] }
 0x24f   : > { %1552 = vmatpush.msra.mxu3 %v1487_v37 }
 0x250   : > { %v1355_v41 = vsel %vm1141_vm1, %v3947_v38, 0.0  ;;  %v1365_v43 = vmul.f32 %v3947_v38, %v3947_v38 }
 0x251   : > { %1356 = vadd.xlane.f32.xlu1 %v1355_v41  ;;  %1369 = vadd.xlane.f32.xlu0 %v1368_v23  ;;  %v1486_v23 = vld [vmem:[%s5051_s3] sm:$0xff] }
 0x252   : > { %v1371_v49 = vsel %vm1141_vm1, %v1365_v43, 0.0  ;;  %1553 = vmatpush.msra.mxu3 %v1486_v23 }
 0x255   : > { %v1119_v46 = vpop.f32.mrf.mxu2 }
 0x256   : > { %v3955_v47 = vadd.f32 %v1119_v46, %v943_v7  ;;  %v3122_v7 = vld [vmem:[%s5051_s3 + $0x20] sm:$0xff] }
 0x257   : > { %1639 = vmatpush.msra.mxu0 %v3122_v7 }
 0x258   : > { %v1358_v26 = vsel %vm1141_vm1, %v3955_v47, 0.0  ;;  %v1366_v51 = vmul.f32 %v3955_v47, %v3955_v47 }
 0x259   : > { %1359 = vadd.xlane.f32.xlu2 %v1358_v26  ;;  %1372 = vadd.xlane.f32.xlu1 %v1371_v49 }
 0x25a   : > { %v1374_v9 = vsel %vm1141_vm1, %v1366_v51, 0.0 }
 0x25b   : > { %1375 = vadd.xlane.f32.xlu0 %v1374_v9 }
 0x25c   : > { %v1144_v57 = vpop.xlane.xlu0 %1143 }
 0x25d   : > { %v1122_v55 = vpop.f32.mrf.mxu2 }
 0x25e   : > { %v3964_v56 = vadd.f32 %v1122_v55, %v944_v54  ;;  %v1160_v62 = vpop.xlane.xlu1 %1159 }
 0x260   : > { %v1361_v30 = vsel %vm1141_vm1, %v3964_v56, 0.0  ;;  %v1367_v59 = vmul.f32 %v3964_v56, %v3964_v56 }
 0x261   : > { %1362 = vadd.xlane.f32.xlu2 %v1361_v30 }
 0x262   : > { %v1377_v60 = vsel %vm1141_vm1, %v1367_v59, 0.0 }
 0x263   : > { %1378 = vadd.xlane.f32.xlu1 %v1377_v60 }
 0x264   : > { %v1147_v11 = vpop.xlane.xlu0 %1146 }
 0x265   : > { %v1170_v2 = vadd.f32 %v1147_v11, %v1144_v57 }
 0x266   : > { %v1163_v0 = vpop.xlane.xlu2 %1162 }
 0x267   : > { %v1180_v8 = vadd.f32 %v1163_v0, %v1160_v62 }
 0x26c   : > { %v1150_v63 = vpop.xlane.xlu1 %1149 }
 0x26d   : > { %v1171_v13 = vadd.f32 %v1170_v2, %v1150_v63 }
 0x26e   : > { %v1166_v6 = vpop.xlane.xlu0 %1165 }
 0x26f   : > { %v1181_v14 = vadd.f32 %v1180_v8, %v1166_v6 }
 0x274   : > { %v1153_v10 = vpop.xlane.xlu2 %1152 }
 0x275   : > { %v1172_v1 = vadd.f32 %v1171_v13, %v1153_v10 }
 0x276   : > { %v1169_v16 = vpop.xlane.xlu1 %1168 }
 0x277   : > { %v1173_v17 = vrot.slane %v1172_v1, 4  ;;  %v1182_v18 = vadd.f32 %v1181_v14, %v1169_v16 }
 0x279   : > { %v1174_v15 = vadd.f32 %v1173_v17, %v1172_v1  ;;  %v1183_v22 = vrot.slane %v1182_v18, 4 }
 0x27b   : > { %v1175_v24 = vrot.slane %v1174_v15, 2  ;;  %v1184_v25 = vadd.f32 %v1183_v22, %v1182_v18 }
 0x27c   : > { %v1214_v36 = vpop.xlane.xlu2 %1213 }
 0x27d   : > { %v1176_v28 = vadd.f32 %v1175_v24, %v1174_v15  ;;  %v1185_v29 = vrot.slane %v1184_v25, 2 }
 0x27f   : > { %v1177_v5 = vrot.slane %v1176_v28, 1  ;;  %v1186_v34 = vadd.f32 %v1185_v29, %v1184_v25 }
 0x281   : > { %v1178_v40 = vadd.f32 %v1177_v5, %v1176_v28  ;;  %v1187_v41 = vrot.slane %v1186_v34, 1 }
 0x283   : > { %v1179_v43 = vmul.f32 0.0009765625, %v1178_v40  ;;  %v1188_v45 = vadd.f32 %v1187_v41, %v1186_v34 }
 0x284   : > { %v1217_v46 = vpop.xlane.xlu0 %1216  ;;  %v1230_v52 = vpop.xlane.xlu2 %1229 }
 0x285   : > { %v1189_v48 = vmul.f32 0.0009765625, %v1188_v45  ;;  %v1190_v26 = vmul.f32 %v1179_v43, %v1179_v43  ;;  %v1240_v57 = vadd.f32 %v1217_v46, %v1214_v36  ;;  %v1193_v3 = vsub.f32 %v3845_v35, %v1179_v43 }
 0x286   : > { %v1194_v27 = vsub.f32 %v3852_v44, %v1179_v43  ;;  %v1195_v29 = vsub.f32 %v3860_v53, %v1179_v43  ;;  %v1196_v33 = vsub.f32 %v3868_v61, %v1179_v43 }
 0x287   : > { %v1191_v49 = vsub.f32 %v1189_v48, %v1190_v26 }
 0x289   : > { %v1192_v51 = vmax.f32 %v1191_v49, 0.0 }
 0x28b   : > { %v1197_v9 = vadd.f32 1e-05, %v1192_v51 }
 0x28c   : > { %v1220_v54 = vpop.xlane.xlu1 %1219  ;;  %v1233_v55 = vpop.xlane.xlu0 %1232 }
 0x28d   : > { %3338 = vrsqrt.f32 %v1197_v9  ;;  %v1250_v30 = vadd.f32 %v1233_v55, %v1230_v52  ;;  %v1241_v62 = vadd.f32 %v1240_v57, %v1220_v54  ;;  %vm1204_vm3 = vweird.f32 %v1197_v9 }
 0x28e   : > { %v1236_v59 = vpop.xlane.xlu2 %1235 }
 0x28f   : > { %v1251_v63 = vadd.f32 %v1250_v30, %v1236_v59 }
 0x293   : > { %v3339_v60 = vpop.eup %3338 }
 0x294   : > { %v1199_v11 = vmul.f32 %v3339_v60, %v1197_v9  ;;  %v1223_v0 = vpop.xlane.xlu1 %1222  ;;  %vm1205_vm2 = vweird.f32 %v3339_v60 }
 0x295   : > { %v1242_v2 = vadd.f32 %v1241_v62, %v1223_v0  ;;  %vm1206_vm4 = vmor %vm1204_vm3, %vm1205_vm2 }
 0x296   : > { %v1200_v6 = vmul.f32 %v3339_v60, %v1199_v11  ;;  %v1239_v8 = vpop.xlane.xlu0 %1238 }
 0x297   : > { %v1243_v13 = vrot.slane %v1242_v2, 4  ;;  %v1252_v10 = vadd.f32 %v1251_v63, %v1239_v8 }
 0x298   : > { %v1201_v14 = vmul.f32 0.5, %v1200_v6 }
 0x299   : > { %v1244_v1 = vadd.f32 %v1243_v13, %v1242_v2  ;;  %v1253_v16 = vrot.slane %v1252_v10, 4 }
 0x29a   : > { %v1202_v17 = vsub.f32 1.5, %v1201_v14 }
 0x29b   : > { %v1245_v18 = vrot.slane %v1244_v1, 2  ;;  %v1254_v15 = vadd.f32 %v1253_v16, %v1252_v10 }
 0x29c   : > { %v1203_v22 = vmul.f32 %v3339_v60, %v1202_v17  ;;  %v1284_v37 = vpop.xlane.xlu1 %1283 }
 0x29d   : > { %v1246_v24 = vadd.f32 %v1245_v18, %v1244_v1  ;;  %v1255_v25 = vrot.slane %v1254_v15, 2 }
 0x29e   : > { %v1207_v28 = vsel %vm1206_vm4, %v3339_v60, %v1203_v22 }
 0x29f   : > { %v1247_v19 = vrot.slane %v1246_v24, 1  ;;  %v1256_v5 = vadd.f32 %v1255_v25, %v1254_v15  ;;  %v1208_v34 = vmul.f32 %v1207_v28, %v1193_v3  ;;  %v1209_v36 = vmul.f32 %v1207_v28, %v1194_v27 }
 0x2a0   : > { %v1210_v39 = vmul.f32 %v1207_v28, %v1195_v29  ;;  %v1211_v40 = vmul.f32 %v1207_v28, %v1196_v33 }
 0x2a1   : > { %v1248_v41 = vadd.f32 %v1247_v19, %v1246_v24  ;;  %v1257_v23 = vrot.slane %v1256_v5, 1  ;;  %vm1422_vm5 = vcmp.ge.f32.partialorder %v1208_v34, 0.0  ;;  %v1438_v35 = vmul.f32 0.2, %v1208_v34 }
 0x2a2   : > { %vm1423_vm6 = vcmp.ge.f32.partialorder %v1209_v36, 0.0  ;;  %v1439_v44 = vmul.f32 0.2, %v1209_v36  ;;  %vm1424_vm7 = vcmp.ge.f32.partialorder %v1210_v39, 0.0  ;;  %v1440_v53 = vmul.f32 0.2, %v1210_v39 }
 0x2a3   : > { %v4007_v61 = vmul.f32 0.0009765625, %v1248_v41  ;;  %v1258_v7 = vadd.f32 %v1257_v23, %v1256_v5  ;;  %v4009_v43 = vsel %vm1422_vm5, %v1208_v34, %v1438_v35  ;;  %vm1425_vm8 = vcmp.ge.f32.partialorder %v1211_v40, 0.0 }
 0x2a4   : > { %v1287_v45 = vpop.xlane.xlu2 %1286  ;;  %1470 = vst.msk [vmem:[%s4005_s27] sm:$0xff] %vm1141_vm1, %v4009_v43  ;;  %3106 = vmatmul.msk.f32.vlgmr.msra.gmra.mxu3 %vm1141_vm1, %v4009_v43  ;;  %3126 = vmatmul.msk.f32.vlgmr.msra.gmra.mxu0 %vm1141_vm1, %v4009_v43  ;;  %v4018_v46 = vsel %vm1423_vm6, %v1209_v36, %v1439_v44  ;;  %v4020_v48 = vsel %vm1424_vm7, %v1210_v39, %v1440_v53  ;;  %v1441_v26 = vmul.f32 0.2, %v1211_v40  ;;  %v1300_v55 = vpop.xlane.xlu1 %1299 }
 0x2a5   : > { %v1260_v49 = vmul.f32 %v4007_v61, %v4007_v61  ;;  %v1259_v51 = vmul.f32 0.0009765625, %v1258_v7  ;;  %1471 = vst.msk [vmem:[%s4005_s27 + $0x8] sm:$0xff] %vm1141_vm1, %v4018_v46  ;;  %v1310_v60 = vadd.f32 %v1287_v45, %v1284_v37  ;;  %v1263_v29 = vsub.f32 %v3876_v12, %v4007_v61 }
 0x2a6   : > { %1472 = vst.msk [vmem:[%s4005_s27 + $0x10] sm:$0xff] %vm1141_vm1, %v4020_v48  ;;  %v4030_v52 = vsel %vm1425_vm8, %v1211_v40, %v1441_v26  ;;  %v1264_v33 = vsub.f32 %v3883_v21, %v4007_v61  ;;  %v1265_v5 = vsub.f32 %v3891_v32, %v4007_v61  ;;  %v1266_v34 = vsub.f32 %v3900_v42, %v4007_v61 }
 0x2a7   : > { %v1261_v9 = vsub.f32 %v1259_v51, %v1260_v49  ;;  %1473 = vst.msk [vmem:[%s4005_s27 + $0x18] sm:$0xff] %vm1141_vm1, %v4030_v52 }
 0x2a9   : > { %v1262_v54 = vmax.f32 %v1261_v9, 0.0 }
 0x2ab   : > { %v1267_v57 = vadd.f32 1e-05, %v1262_v54 }
 0x2ac   : > { %3107 = vmatmul.msk.f32.gmra.mxu3 %vm1141_vm1, %v4018_v46  ;;  %3127 = vmatmul.msk.f32.gmra.mxu0 %vm1141_vm1, %v4018_v46  ;;  %v1290_v30 = vpop.xlane.xlu0 %1289  ;;  %v1303_v59 = vpop.xlane.xlu2 %1302 }
 0x2ad   : > { %3340 = vrsqrt.f32 %v1267_v57  ;;  %v1320_v62 = vadd.f32 %v1303_v59, %v1300_v55  ;;  %v1311_v63 = vadd.f32 %v1310_v60, %v1290_v30  ;;  %vm1274_vm10 = vweird.f32 %v1267_v57 }
 0x2ae   : > { %v1306_v11 = vpop.xlane.xlu1 %1305 }
 0x2af   : > { %v1321_v8 = vadd.f32 %v1320_v62, %v1306_v11 }
 0x2b3   : > { %v3341_v0 = vpop.eup %3340 }
 0x2b4   : > { %v1269_v2 = vmul.f32 %v3341_v0, %v1267_v57  ;;  %3108 = vmatmul.msk.f32.gmra.mxu3 %vm1141_vm1, %v4020_v48  ;;  %3128 = vmatmul.msk.f32.gmra.mxu0 %vm1141_vm1, %v4020_v48  ;;  %v1293_v6 = vpop.xlane.xlu0 %1292  ;;  %vm1275_vm9 = vweird.f32 %v3341_v0 }
 0x2b5   : > { %v1312_v13 = vadd.f32 %v1311_v63, %v1293_v6  ;;  %vm1276_vm11 = vmor %vm1274_vm10, %vm1275_vm9 }
 0x2b6   : > { %v1270_v10 = vmul.f32 %v3341_v0, %v1269_v2  ;;  %v1309_v14 = vpop.xlane.xlu2 %1308 }
 0x2b7   : > { %v1313_v1 = vrot.slane %v1312_v13, 4  ;;  %v1322_v16 = vadd.f32 %v1321_v8, %v1309_v14 }
 0x2b8   : > { %v1271_v17 = vmul.f32 0.5, %v1270_v10 }
 0x2b9   : > { %v1314_v18 = vadd.f32 %v1313_v1, %v1312_v13  ;;  %v1323_v15 = vrot.slane %v1322_v16, 4 }
 0x2ba   : > { %v1272_v22 = vsub.f32 1.5, %v1271_v17 }
 0x2bb   : > { %v1315_v24 = vrot.slane %v1314_v18, 2  ;;  %v1324_v25 = vadd.f32 %v1323_v15, %v1322_v16 }
 0x2bc   : > { %3109 = vmatmul.msk.f32.gmra.mxu3 %vm1141_vm1, %v4030_v52  ;;  %3129 = vmatmul.msk.f32.gmra.mxu0 %vm1141_vm1, %v4030_v52  ;;  %v1273_v3 = vmul.f32 %v3341_v0, %v1272_v22  ;;  %v1354_v41 = vpop.xlane.xlu0 %1353 }
 0x2bd   : > { %v1316_v27 = vadd.f32 %v1315_v24, %v1314_v18  ;;  %v1325_v28 = vrot.slane %v1324_v25, 2 }
 0x2be   : > { %v1277_v19 = vsel %vm1276_vm11, %v3341_v0, %v1273_v3 }
 0x2bf   : > { %v1317_v36 = vrot.slane %v1316_v27, 1  ;;  %v1326_v37 = vadd.f32 %v1325_v28, %v1324_v25  ;;  %v1278_v39 = vmul.f32 %v1277_v19, %v1263_v29  ;;  %v1279_v40 = vmul.f32 %v1277_v19, %v1264_v33 }
 0x2c0   : > { %v1280_v23 = vmul.f32 %v1277_v19, %v1265_v5  ;;  %v1281_v35 = vmul.f32 %v1277_v19, %v1266_v34 }
 0x2c1   : > { %v1318_v44 = vadd.f32 %v1317_v36, %v1316_v27  ;;  %v1327_v12 = vrot.slane %v1326_v37, 1  ;;  %vm1426_vm12 = vcmp.ge.f32.partialorder %v1278_v39, 0.0  ;;  %v1442_v53 = vmul.f32 0.2, %v1278_v39 }
 0x2c2   : > { %vm1427_vm13 = vcmp.ge.f32.partialorder %v1279_v40, 0.0  ;;  %v1443_v21 = vmul.f32 0.2, %v1279_v40  ;;  %vm1428_vm14 = vcmp.ge.f32.partialorder %v1280_v23, 0.0  ;;  %v1444_v32 = vmul.f32 0.2, %v1280_v23 }
 0x2c3   : > { %v4055_v7 = vmul.f32 0.0009765625, %v1318_v44  ;;  %v1328_v42 = vadd.f32 %v1327_v12, %v1326_v37  ;;  %v4057_v61 = vsel %vm1426_vm12, %v1278_v39, %v1442_v53  ;;  %vm1429_vm15 = vcmp.ge.f32.partialorder %v1281_v35, 0.0 }
 0x2c4   : > { %v1357_v45 = vpop.xlane.xlu1 %1356  ;;  %1474 = vst.msk [vmem:[%s4005_s27 + $0x20] sm:$0xff] %vm1141_vm1, %v4057_v61  ;;  %3110 = vmatmul.msk.f32.gmra.mxu3 %vm1141_vm1, %v4057_v61  ;;  %3130 = vmatmul.msk.f32.gmra.mxu0 %vm1141_vm1, %v4057_v61  ;;  %v4066_v26 = vsel %vm1427_vm13, %v1279_v40, %v1443_v21  ;;  %v4068_v49 = vsel %vm1428_vm14, %v1280_v23, %v1444_v32  ;;  %v1445_v51 = vmul.f32 0.2, %v1281_v35  ;;  %v1370_v59 = vpop.xlane.xlu0 %1369 }
 0x2c5   : > { %v1329_v9 = vmul.f32 0.0009765625, %v1328_v42  ;;  %v1330_v54 = vmul.f32 %v4055_v7, %v4055_v7  ;;  %1475 = vst.msk [vmem:[%s4005_s27 + $0x28] sm:$0xff] %vm1141_vm1, %v4066_v26  ;;  %v1380_v0 = vadd.f32 %v1357_v45, %v1354_v41  ;;  %v1333_v5 = vsub.f32 %v3908_v50, %v4055_v7 }
 0x2c6   : > { %1476 = vst.msk [vmem:[%s4005_s27 + $0x30] sm:$0xff] %vm1141_vm1, %v4068_v49  ;;  %v4078_v55 = vsel %vm1429_vm15, %v1281_v35, %v1445_v51  ;;  %v1334_v34 = vsub.f32 %v3915_v58, %v4055_v7  ;;  %v1335_v37 = vsub.f32 %v3923_v4, %v4055_v7  ;;  %v1336_v39 = vsub.f32 %v3932_v20, %v4055_v7 }
 0x2c7   : > { %v1331_v57 = vsub.f32 %v1329_v9, %v1330_v54  ;;  %1477 = vst.msk [vmem:[%s4005_s27 + $0x38] sm:$0xff] %vm1141_vm1, %v4078_v55  ;;  %vm2220_vm15 = vcmask 130048  }
 0x2c9   : > { %v1332_v30 = vmax.f32 %v1331_v57, 0.0 }
 0x2cb   : > { %v1337_v60 = vadd.f32 1e-05, %v1332_v30 }
 0x2cc   : > { %v1360_v62 = vpop.xlane.xlu2 %1359  ;;  %3111 = vmatmul.msk.f32.gmra.mxu3 %vm1141_vm1, %v4066_v26  ;;  %3131 = vmatmul.msk.f32.gmra.mxu0 %vm1141_vm1, %v4066_v26  ;;  %v1373_v11 = vpop.xlane.xlu1 %1372 }
 0x2cd   : > { %3342 = vrsqrt.f32 %v1337_v60  ;;  %v1390_v63 = vadd.f32 %v1373_v11, %v1370_v59  ;;  %v1381_v8 = vadd.f32 %v1380_v0, %v1360_v62  ;;  %vm1344_vm2 = vweird.f32 %v1337_v60 }
 0x2ce   : > { %v1376_v2 = vpop.xlane.xlu0 %1375 }
 0x2cf   : > { %v1391_v14 = vadd.f32 %v1390_v63, %v1376_v2 }
 0x2d3   : > { %v3343_v6 = vpop.eup %3342 }
 0x2d4   : > { %v1339_v13 = vmul.f32 %v3343_v6, %v1337_v60  ;;  %v1363_v10 = vpop.xlane.xlu2 %1362  ;;  %3112 = vmatmul.msk.f32.gmra.mxu3 %vm1141_vm1, %v4068_v49  ;;  %3132 = vmatmul.msk.f32.gmra.mxu0 %vm1141_vm1, %v4068_v49  ;;  %vm1345_vm0 = vweird.f32 %v3343_v6 }
 0x2d5   : > { %v1382_v1 = vadd.f32 %v1381_v8, %v1363_v10  ;;  %vm1346_vm3 = vmor %vm1344_vm2, %vm1345_vm0  ;;  %v3161_v8 = vld [vmem:[%s5051_s3 + $0x58] sm:$0xff] }
 0x2d6   : > { %v1340_v16 = vmul.f32 %v3343_v6, %v1339_v13  ;;  %v1379_v17 = vpop.xlane.xlu1 %1378  ;;  %v3160_v13 = vld [vmem:[%s5051_s3 + $0x50] sm:$0xff]  ;;  %1853 = vmatpush.msrb.mxu3 %v3161_v8 }
 0x2d7   : > { %v1383_v18 = vrot.slane %v1382_v1, 4  ;;  %v1392_v15 = vadd.f32 %v1391_v14, %v1379_v17 }
 0x2d8   : > { %v1341_v22 = vmul.f32 0.5, %v1340_v16  ;;  %1854 = vmatpush.msrb.mxu3 %v3160_v13 }
 0x2d9   : > { %v1384_v24 = vadd.f32 %v1383_v18, %v1382_v1  ;;  %v1393_v25 = vrot.slane %v1392_v15, 4 }
 0x2da   : > { %v1342_v3 = vsub.f32 1.5, %v1341_v22 }
 0x2db   : > { %v1385_v27 = vrot.slane %v1384_v24, 2  ;;  %v1394_v28 = vadd.f32 %v1393_v25, %v1392_v15 }
 0x2dc   : > { %3113 = vmatmul.msk.f32.gmra.mxu3 %vm1141_vm1, %v4078_v55  ;;  %3133 = vmatmul.msk.f32.gmra.mxu0 %vm1141_vm1, %v4078_v55  ;;  %v1343_v29 = vmul.f32 %v3343_v6, %v1342_v3 }
 0x2dd   : > { %v1386_v33 = vadd.f32 %v1385_v27, %v1384_v24  ;;  %v1395_v19 = vrot.slane %v1394_v28, 2  ;;  %v3159_v27 = vld [vmem:[%s5051_s3 + $0x48] sm:$0xff] }
 0x2de   : > { %v1347_v36 = vsel %vm1346_vm3, %v3343_v6, %v1343_v29  ;;  %1855 = vmatpush.msrb.mxu3 %v3159_v27  ;;  %v3146_v27 = vld [vmem:[%s5052_s4 + $0xa0] sm:$0xff] }
 0x2df   : > { %v1387_v40 = vrot.slane %v1386_v33, 1  ;;  %v1396_v41 = vadd.f32 %v1395_v19, %v1394_v28  ;;  %v1348_v23 = vmul.f32 %v1347_v36, %v1333_v5  ;;  %v1349_v35 = vmul.f32 %v1347_v36, %v1334_v34 }
 0x2e0   : > { %v1350_v44 = vmul.f32 %v1347_v36, %v1335_v37  ;;  %v1351_v12 = vmul.f32 %v1347_v36, %v1336_v39 }
 0x2e1   : > { %v1388_v53 = vadd.f32 %v1387_v40, %v1386_v33  ;;  %v1397_v21 = vrot.slane %v1396_v41, 1  ;;  %vm1430_vm4 = vcmp.ge.f32.partialorder %v1348_v23, 0.0  ;;  %v1446_v50 = vmul.f32 0.2, %v1348_v23  ;;  %v3158_v33 = vld [vmem:[%s5051_s3 + $0x40] sm:$0xff] }
 0x2e2   : > { %vm1431_vm5 = vcmp.ge.f32.partialorder %v1349_v35, 0.0  ;;  %v1447_v58 = vmul.f32 0.2, %v1349_v35  ;;  %vm1432_vm6 = vcmp.ge.f32.partialorder %v1350_v44, 0.0  ;;  %v1448_v4 = vmul.f32 0.2, %v1350_v44  ;;  %1856 = vmatpush.msrb.mxu3 %v3158_v33 }
 0x2e3   : > { %v1389_v32 = vmul.f32 0.0009765625, %v1388_v53  ;;  %v1398_v20 = vadd.f32 %v1397_v21, %v1396_v41  ;;  %v4103_v7 = vsel %vm1430_vm4, %v1348_v23, %v1446_v50  ;;  %vm1433_vm7 = vcmp.ge.f32.partialorder %v1351_v12, 0.0 }
 0x2e4   : > { %1478 = vst.msk [vmem:[%s4005_s27 + $0x40] sm:$0xff] %vm1141_vm1, %v4103_v7  ;;  %3114 = vmatmul.msk.f32.gmra.mxu3 %vm1141_vm1, %v4103_v7  ;;  %3134 = vmatmul.msk.f32.gmra.mxu0 %vm1141_vm1, %v4103_v7  ;;  %v4112_v42 = vsel %vm1431_vm5, %v1349_v35, %v1447_v58  ;;  %v4114_v45 = vsel %vm1432_vm6, %v1350_v44, %v1448_v4  ;;  %v1449_v51 = vmul.f32 0.2, %v1351_v12 }
 0x2e5   : > { %v1399_v9 = vmul.f32 0.0009765625, %v1398_v20  ;;  %v1400_v54 = vmul.f32 %v1389_v32, %v1389_v32  ;;  %1479 = vst.msk [vmem:[%s4005_s27 + $0x48] sm:$0xff] %vm1141_vm1, %v4112_v42  ;;  %v1403_v10 = vsub.f32 %v3940_v31, %v1389_v32  ;;  %v1404_v14 = vsub.f32 %v3947_v38, %v1389_v32 }
 0x2e6   : > { %1480 = vst.msk [vmem:[%s4005_s27 + $0x50] sm:$0xff] %vm1141_vm1, %v4114_v45  ;;  %v4122_v57 = vsel %vm1433_vm7, %v1351_v12, %v1449_v51  ;;  %v1405_v1 = vsub.f32 %v3955_v47, %v1389_v32  ;;  %v1406_v16 = vsub.f32 %v3964_v56, %v1389_v32 }
 0x2e7   : > { %v1401_v30 = vsub.f32 %v1399_v9, %v1400_v54  ;;  %1481 = vst.msk [vmem:[%s4005_s27 + $0x58] sm:$0xff] %vm1141_vm1, %v4122_v57 }
 0x2e9   : > { %v1402_v59 = vmax.f32 %v1401_v30, 0.0 }
 0x2eb   : > { %v1407_v60 = vadd.f32 1e-05, %v1402_v59 }
 0x2ec   : > { %3115 = vmatmul.msk.f32.gmra.mxu3 %vm1141_vm1, %v4112_v42  ;;  %3135 = vmatmul.msk.f32.gmra.mxu0 %vm1141_vm1, %v4112_v42 }
 0x2ed   : > { %3344 = vrsqrt.f32 %v1407_v60  ;;  %vm1414_vm9 = vweird.f32 %v1407_v60 }
 0x2f3   : > { %v3345_v62 = vpop.eup %3344 }
 0x2f4   : > { %v1409_v11 = vmul.f32 %v3345_v62, %v1407_v60  ;;  %3116 = vmatmul.msk.f32.gmra.mxu3 %vm1141_vm1, %v4114_v45  ;;  %3136 = vmatmul.msk.f32.gmra.mxu0 %vm1141_vm1, %v4114_v45  ;;  %vm1415_vm8 = vweird.f32 %v3345_v62 }
 0x2f5   : > { %vm1416_vm10 = vmor %vm1414_vm9, %vm1415_vm8 }
 0x2f6   : > { %v1410_v0 = vmul.f32 %v3345_v62, %v1409_v11 }
 0x2f8   : > { %v1411_v63 = vmul.f32 0.5, %v1410_v0 }
 0x2fa   : > { %v1412_v2 = vsub.f32 1.5, %v1411_v63 }
 0x2fc   : > { %3117 = vmatmul.msk.f32.gmra.mxu3 %vm1141_vm1, %v4122_v57  ;;  %3137 = vmatmul.msk.f32.gmra.mxu0 %vm1141_vm1, %v4122_v57  ;;  %v1413_v6 = vmul.f32 %v3345_v62, %v1412_v2 }
 0x2fe   : > { %v1417_v17 = vsel %vm1416_vm10, %v3345_v62, %v1413_v6 }
 0x2ff   : > { %v1418_v18 = vmul.f32 %v1417_v17, %v1403_v10  ;;  %v1419_v15 = vmul.f32 %v1417_v17, %v1404_v14  ;;  %v1420_v22 = vmul.f32 %v1417_v17, %v1405_v1  ;;  %v1421_v24 = vmul.f32 %v1417_v17, %v1406_v16  ;;  %v3142_v14 = vld [vmem:[%s5052_s4 + $0x80] sm:$0xff]  ;;  %v3143_v17 = vld [vmem:[%s5052_s4 + $0x88] sm:$0xff] }
 0x300   : > { %v1603_v16 = vld [vmem:[%s5052_s4] sm:$0xff] }
 0x301   : > { %vm1434_vm11 = vcmp.ge.f32.partialorder %v1418_v18, 0.0  ;;  %v1450_v25 = vmul.f32 0.2, %v1418_v18  ;;  %vm1435_vm12 = vcmp.ge.f32.partialorder %v1419_v15, 0.0  ;;  %v1451_v3 = vmul.f32 0.2, %v1419_v15 }
 0x302   : > { %vm1436_vm13 = vcmp.ge.f32.partialorder %v1420_v22, 0.0  ;;  %v1452_v31 = vmul.f32 0.2, %v1420_v22  ;;  %vm1437_vm14 = vcmp.ge.f32.partialorder %v1421_v24, 0.0  ;;  %v1453_v38 = vmul.f32 0.2, %v1421_v24 }
 0x303   : > { %v4149_v47 = vsel %vm1434_vm11, %v1418_v18, %v1450_v25  ;;  %v4151_v56 = vsel %vm1435_vm12, %v1419_v15, %v1451_v3  ;;  %v1604_v15 = vld [vmem:[%s5052_s4 + $0x8] sm:$0xff]  ;;  %v1605_v25 = vld [vmem:[%s5052_s4 + $0x10] sm:$0xff]  ;;  %v3145_v3 = vld [vmem:[%s5052_s4 + $0x98] sm:$0xff] }
 0x304   : > { %1482 = vst.msk [vmem:[%s4005_s27 + $0x60] sm:$0xff] %vm1141_vm1, %v4149_v47  ;;  %3118 = vmatmul.msk.f32.gmra.mxu3 %vm1141_vm1, %v4149_v47  ;;  %3138 = vmatmul.msk.f32.gmra.mxu0 %vm1141_vm1, %v4149_v47  ;;  %v4163_v28 = vsel %vm1436_vm13, %v1420_v22, %v1452_v31  ;;  %v4165_v29 = vsel %vm1437_vm14, %v1421_v24, %v1453_v38  ;;  %v3144_v22 = vld [vmem:[%s5052_s4 + $0x90] sm:$0xff]  ;;  %v1606_v38 = vld [vmem:[%s5052_s4 + $0x18] sm:$0xff] }
 0x305   : > { %1483 = vst.msk [vmem:[%s4005_s27 + $0x68] sm:$0xff] %vm1141_vm1, %v4151_v56 }
 0x306   : > { %1484 = vst.msk [vmem:[%s4005_s27 + $0x70] sm:$0xff] %vm1141_vm1, %v4163_v28 }
 0x307   : > { %1485 = vst.msk [vmem:[%s4005_s27 + $0x78] sm:$0xff] %vm1141_vm1, %v4165_v29 }
 0x30c   : > { %3119 = vmatmul.msk.f32.gmra.mxu3 %vm1141_vm1, %v4151_v56  ;;  %3139 = vmatmul.msk.f32.gmra.mxu0 %vm1141_vm1, %v4151_v56 }
 0x314   : > { %3120 = vmatmul.msk.f32.gmra.mxu3 %vm1141_vm1, %v4163_v28  ;;  %3140 = vmatmul.msk.f32.gmra.mxu0 %vm1141_vm1, %v4163_v28 }
 0x31c   : > { %3121 = vmatmul.msk.f32.gmra.mxu3 %vm1141_vm1, %v4165_v29  ;;  %3141 = vmatmul.msk.f32.gmra.mxu0 %vm1141_vm1, %v4165_v29 }
 0x321   : > { %v4191_v19 = vpop.f32.mrf.mxu0 }
 0x324   : > { %3162 = vmatmul.msk.f32.vlgmr.msrb.gmra.mxu3 %vm1141_vm1, %v4009_v43 }
 0x327   : > { %v4195_v5 = vpop.f32.mrf.mxu3 }
 0x329   : > { %v4197_v34 = vpop.f32.mrf.mxu0 }
 0x32c   : > { %3163 = vmatmul.msk.f32.gmra.mxu3 %vm1141_vm1, %v4018_v46 }
 0x32f   : > { %v4201_v36 = vpop.f32.mrf.mxu3 }
 0x331   : > { %v4203_v37 = vpop.f32.mrf.mxu0 }
 0x334   : > { %3164 = vmatmul.msk.f32.gmra.mxu3 %vm1141_vm1, %v4020_v48 }
 0x337   : > { %v4207_v39 = vpop.f32.mrf.mxu3 }
 0x339   : > { %v1650_v40 = vpop.f32.mrf.mxu0 }
 0x33c   : > { %3165 = vmatmul.msk.f32.gmra.mxu3 %vm1141_vm1, %v4030_v52 }
 0x33f   : > { %v4211_v41 = vpop.f32.mrf.mxu3 }
 0x341   : > { %v1653_v23 = vpop.f32.mrf.mxu0 }
 0x344   : > { %3166 = vmatmul.msk.f32.gmra.mxu3 %vm1141_vm1, %v4057_v61 }
 0x347   : > { %v1567_v35 = vpop.f32.mrf.mxu3 }
 0x349   : > { %v1656_v44 = vpop.f32.mrf.mxu0 }
 0x34c   : > { %3167 = vmatmul.msk.f32.gmra.mxu3 %vm1141_vm1, %v4066_v26 }
 0x34f   : > { %v1570_v12 = vpop.f32.mrf.mxu3 }
 0x351   : > { %v1659_v53 = vpop.f32.mrf.mxu0 }
 0x354   : > { %3168 = vmatmul.msk.f32.gmra.mxu3 %vm1141_vm1, %v4068_v49 }
 0x357   : > { %v1573_v21 = vpop.f32.mrf.mxu3 }
 0x359   : > { %v1662_v50 = vpop.f32.mrf.mxu0 }
 0x35c   : > { %3169 = vmatmul.msk.f32.gmra.mxu3 %vm1141_vm1, %v4078_v55 }
 0x35f   : > { %v1576_v58 = vpop.f32.mrf.mxu3 }
 0x361   : > { %v1665_v4 = vpop.f32.mrf.mxu0 }
 0x364   : > { %3170 = vmatmul.msk.f32.gmra.mxu3 %vm1141_vm1, %v4103_v7 }
 0x367   : > { %v1579_v32 = vpop.f32.mrf.mxu3 }
 0x369   : > { %v1668_v20 = vpop.f32.mrf.mxu0 }
 0x36c   : > { %3171 = vmatmul.msk.f32.gmra.mxu3 %vm1141_vm1, %v4112_v42 }
 0x36f   : > { %v1582_v51 = vpop.f32.mrf.mxu3 }
 0x371   : > { %v1671_v9 = vpop.f32.mrf.mxu0 }
 0x374   : > { %3172 = vmatmul.msk.f32.gmra.mxu3 %vm1141_vm1, %v4114_v45 }
 0x377   : > { %v1585_v54 = vpop.f32.mrf.mxu3 }
 0x379   : > { %v1674_v30 = vpop.f32.mrf.mxu0 }
 0x37c   : > { %3173 = vmatmul.msk.f32.gmra.mxu3 %vm1141_vm1, %v4122_v57 }
 0x37f   : > { %v1588_v59 = vpop.f32.mrf.mxu3 }
 0x381   : > { %v1677_v60 = vpop.f32.mrf.mxu0 }
 0x384   : > { %3174 = vmatmul.msk.f32.gmra.mxu3 %vm1141_vm1, %v4149_v47 }
 0x387   : > { %v1591_v62 = vpop.f32.mrf.mxu3 }
 0x389   : > { %v1680_v11 = vpop.f32.mrf.mxu0 }
 0x38c   : > { %3175 = vmatmul.msk.f32.gmra.mxu3 %vm1141_vm1, %v4151_v56 }
 0x38f   : > { %v1594_v0 = vpop.f32.mrf.mxu3 }
 0x391   : > { %v1683_v63 = vpop.f32.mrf.mxu0 }
 0x394   : > { %3176 = vmatmul.msk.f32.gmra.mxu3 %vm1141_vm1, %v4163_v28 }
 0x397   : > { %v1597_v2 = vpop.f32.mrf.mxu3 }
 0x399   : > { %v1686_v6 = vpop.f32.mrf.mxu0 }
 0x39a   : > { %1706 = vmatpush.msra.mxu1 %v1686_v6 }
 0x39c   : > { %1707 = vmatpush.msra.mxu1 %v1683_v63  ;;  %3177 = vmatmul.msk.f32.gmra.mxu3 %vm1141_vm1, %v4165_v29  ;;  %v1615_v63 = vld [vmem:[%s5052_s4 + $0x60] sm:$0xff] }
 0x39e   : > { %1708 = vmatpush.msra.mxu1 %v1680_v11 }
 0x39f   : > { %v1600_v8 = vpop.f32.mrf.mxu3 }
 0x3a0   : > { %1709 = vmatpush.msra.mxu1 %v1677_v60  ;;  %1771 = vmatpush.msra.mxu2 %v1600_v8  ;;  %v3154_v60 = vld [vmem:[%s5052_s4 + $0xe0] sm:$0xff]  ;;  %v1616_v8 = vld [vmem:[%s5052_s4 + $0x68] sm:$0xff] }
 0x3a2   : > { %1710 = vmatpush.msra.mxu1 %v1674_v30  ;;  %1772 = vmatpush.msra.mxu2 %v1597_v2  ;;  %v1614_v30 = vld [vmem:[%s5052_s4 + $0x58] sm:$0xff]  ;;  %v3155_v2 = vld [vmem:[%s5052_s4 + $0xe8] sm:$0xff] }
 0x3a4   : > { %1711 = vmatpush.msra.mxu1 %v1671_v9  ;;  %1773 = vmatpush.msra.mxu2 %v1594_v0  ;;  %v3153_v9 = vld [vmem:[%s5052_s4 + $0xd8] sm:$0xff]  ;;  %v3194_v0 = vld [vmem:[%s5051_s3 + $0x60] sm:$0xff] }
 0x3a6   : > { %1712 = vmatpush.msra.mxu1 %v1668_v20  ;;  %1774 = vmatpush.msra.mxu2 %v1591_v62  ;;  %v3195_v62 = vld [vmem:[%s5051_s3 + $0x68] sm:$0xff] }
 0x3a7   : > { %v4237_v13 = vpop.f32.mrf.mxu3 }
 0x3a8   : > { %1713 = vmatpush.msra.mxu1 %v1665_v4  ;;  %1775 = vmatpush.msra.mxu2 %v1588_v59  ;;  %v1612_v4 = vld [vmem:[%s5052_s4 + $0x48] sm:$0xff]  ;;  %v3196_v59 = vld [vmem:[%s5051_s3 + $0x70] sm:$0xff] }
 0x3aa   : > { %1714 = vmatpush.msra.mxu1 %v1662_v50  ;;  %1776 = vmatpush.msra.mxu2 %v1585_v54  ;;  %v3151_v50 = vld [vmem:[%s5052_s4 + $0xc8] sm:$0xff] }
 0x3ac   : > { %1715 = vmatpush.msra.mxu1 %v1659_v53  ;;  %1777 = vmatpush.msra.mxu2 %v1582_v51  ;;  %v3197_v53 = vld [vmem:[%s5051_s3 + $0x78] sm:$0xff]  ;;  %v1613_v51 = vld [vmem:[%s5052_s4 + $0x50] sm:$0xff] }
 0x3ae   : > { %1716 = vmatpush.msra.mxu1 %v1656_v44  ;;  %1778 = vmatpush.msra.mxu2 %v1579_v32  ;;  %v3150_v44 = vld [vmem:[%s5052_s4 + $0xc0] sm:$0xff]  ;;  %v3152_v32 = vld [vmem:[%s5052_s4 + $0xd0] sm:$0xff] }
 0x3af   : > { %v4239_v10 = vpop.f32.mrf.mxu3 }
 0x3b0   : > { %1717 = vmatpush.msra.mxu1 %v1653_v23  ;;  %1779 = vmatpush.msra.mxu2 %v1576_v58 }
 0x3b2   : > { %1718 = vmatpush.msra.mxu1 %v1650_v40  ;;  %1780 = vmatpush.msra.mxu2 %v1573_v21  ;;  %v1609_v40 = vld [vmem:[%s5052_s4 + $0x30] sm:$0xff]  ;;  %v1611_v21 = vld [vmem:[%s5052_s4 + $0x40] sm:$0xff] }
 0x3b4   : > { %1719 = vmatpush.msra.mxu1 %v4203_v37  ;;  %1781 = vmatpush.msra.mxu2 %v1570_v12  ;;  %v3148_v37 = vld [vmem:[%s5052_s4 + $0xb0] sm:$0xff] }
 0x3b6   : > { %1720 = vmatpush.msra.mxu1 %v4197_v34  ;;  %1782 = vmatpush.msra.mxu2 %v1567_v35  ;;  %v1610_v35 = vld [vmem:[%s5052_s4 + $0x38] sm:$0xff] }
 0x3b7   : > { %v4246_v1 = vpop.f32.mrf.mxu3 }
 0x3b8   : > { %1721 = vmatpush.msra.mxu1 %v4191_v19  ;;  %1783 = vmatpush.msra.mxu2 %v4211_v41  ;;  %v1607_v19 = vld [vmem:[%s5052_s4 + $0x20] sm:$0xff]  ;;  %v3149_v41 = vld [vmem:[%s5052_s4 + $0xb8] sm:$0xff] }
 0x3b9   : > { %1722 = vmatmul.f32.vlgmr.msra.gmra.mxu1 %v3142_v14  ;;  %v3156_v14 = vld [vmem:[%s5052_s4 + $0xf0] sm:$0xff] }
 0x3ba   : > { %1784 = vmatpush.msra.mxu2 %v4207_v39  ;;  %2021 = vmatpush.msrb.mxu1 %v3197_v53 }
 0x3bc   : > { %1785 = vmatpush.msra.mxu2 %v4201_v36  ;;  %v1608_v36 = vld [vmem:[%s5052_s4 + $0x28] sm:$0xff]  ;;  %2022 = vmatpush.msrb.mxu1 %v3196_v59  ;;  %v3214_v59 = vld [vmem:[%s5052_s4 + $0x180] sm:$0xff] }
 0x3be   : > { %1786 = vmatpush.msra.mxu2 %v4195_v5  ;;  %v3147_v5 = vld [vmem:[%s5052_s4 + $0xa8] sm:$0xff]  ;;  %2023 = vmatpush.msrb.mxu1 %v3195_v62 }
 0x3bf   : > { %1787 = vmatmul.f32.vlgmr.msra.gmra.mxu2 %v1603_v16  ;;  %v4259_v18 = vpop.f32.mrf.mxu3  ;;  %v1617_v16 = vld [vmem:[%s5052_s4 + $0x70] sm:$0xff]  ;;  %v3215_v62 = vld [vmem:[%s5052_s4 + $0x188] sm:$0xff] }
 0x3c0   : > { %2024 = vmatpush.msrb.mxu1 %v3194_v0  ;;  %v3216_v0 = vld [vmem:[%s5052_s4 + $0x190] sm:$0xff] }
 0x3c1   : > { %1725 = vmatmul.f32.gmra.mxu1 %v3143_v17  ;;  %v3157_v17 = vld [vmem:[%s5052_s4 + $0xf8] sm:$0xff] }
 0x3c7   : > { %1790 = vmatmul.f32.gmra.mxu2 %v1604_v15  ;;  %v4267_v24 = vpop.f32.mrf.mxu3  ;;  %v1618_v15 = vld [vmem:[%s5052_s4 + $0x78] sm:$0xff] }
 0x3c9   : > { %1728 = vmatmul.f32.gmra.mxu1 %v3144_v22 }
 0x3cf   : > { %1793 = vmatmul.f32.gmra.mxu2 %v1605_v25  ;;  %v4275_v31 = vpop.f32.mrf.mxu3  ;;  %v3178_v25 = vld [vmem:[%s5052_s4 + $0x100] sm:$0xff] }
 0x3d1   : > { %1731 = vmatmul.f32.gmra.mxu1 %v3145_v3 }
 0x3d7   : > { %1796 = vmatmul.f32.gmra.mxu2 %v1606_v38  ;;  %v4283_v33 = vpop.f32.mrf.mxu3 }
 0x3d9   : > { %1734 = vmatmul.f32.gmra.mxu1 %v3146_v27 }
 0x3df   : > { %1799 = vmatmul.f32.gmra.mxu2 %v1607_v19  ;;  %v4291_v34 = vpop.f32.mrf.mxu3 }
 0x3e1   : > { %1737 = vmatmul.f32.gmra.mxu1 %v3147_v5 }
 0x3e7   : > { %1802 = vmatmul.f32.gmra.mxu2 %v1608_v36  ;;  %v1882_v39 = vpop.f32.mrf.mxu3 }
 0x3e9   : > { %1740 = vmatmul.f32.gmra.mxu1 %v3148_v37 }
 0x3ef   : > { %1805 = vmatmul.f32.gmra.mxu2 %v1609_v40  ;;  %v1885_v23 = vpop.f32.mrf.mxu3 }
 0x3f1   : > { %1743 = vmatmul.f32.gmra.mxu1 %v3149_v41 }
 0x3f7   : > { %1808 = vmatmul.f32.gmra.mxu2 %v1610_v35  ;;  %v1888_v12 = vpop.f32.mrf.mxu3 }
 0x3f9   : > { %1746 = vmatmul.f32.gmra.mxu1 %v3150_v44 }
 0x3ff   : > { %1811 = vmatmul.f32.gmra.mxu2 %v1611_v21  ;;  %v1891_v58 = vpop.f32.mrf.mxu3 }
 0x401   : > { %1749 = vmatmul.f32.gmra.mxu1 %v3151_v50 }
 0x407   : > { %1814 = vmatmul.f32.gmra.mxu2 %v1612_v4  ;;  %v1894_v20 = vpop.f32.mrf.mxu3 }
 0x409   : > { %1752 = vmatmul.f32.gmra.mxu1 %v3152_v32 }
 0x40f   : > { %1817 = vmatmul.f32.gmra.mxu2 %v1613_v51  ;;  %v1897_v54 = vpop.f32.mrf.mxu3 }
 0x411   : > { %1755 = vmatmul.f32.gmra.mxu1 %v3153_v9 }
 0x417   : > { %1820 = vmatmul.f32.gmra.mxu2 %v1614_v30  ;;  %v1900_v11 = vpop.f32.mrf.mxu3 }
 0x419   : > { %1758 = vmatmul.f32.gmra.mxu1 %v3154_v60 }
 0x41f   : > { %1823 = vmatmul.f32.gmra.mxu2 %v1615_v63  ;;  %v1903_v6 = vpop.f32.mrf.mxu3  ;;  %v3217_v63 = vld [vmem:[%s5052_s4 + $0x198] sm:$0xff] }
 0x420   : > { %1923 = vmatpush.msrb.mxu0 %v1903_v6  ;;  %v3218_v6 = vld [vmem:[%s5052_s4 + $0x1a0] sm:$0xff] }
 0x421   : > { %1761 = vmatmul.f32.gmra.mxu1 %v3155_v2 }
 0x422   : > { %1924 = vmatpush.msrb.mxu0 %v1900_v11 }
 0x424   : > { %1925 = vmatpush.msrb.mxu0 %v1897_v54 }
 0x426   : > { %1926 = vmatpush.msrb.mxu0 %v1894_v20 }
 0x427   : > { %1826 = vmatmul.f32.gmra.mxu2 %v1616_v8 }
 0x428   : > { %1927 = vmatpush.msrb.mxu0 %v1891_v58 }
 0x429   : > { %1764 = vmatmul.f32.gmra.mxu1 %v3156_v14  ;;  %v3219_v14 = vld [vmem:[%s5052_s4 + $0x1a8] sm:$0xff] }
 0x42a   : > { %1928 = vmatpush.msrb.mxu0 %v1888_v12 }
 0x42c   : > { %1929 = vmatpush.msrb.mxu0 %v1885_v23 }
 0x42e   : > { %1930 = vmatpush.msrb.mxu0 %v1882_v39 }
 0x42f   : > { %1829 = vmatmul.f32.gmra.mxu2 %v1617_v16 }
 0x430   : > { %1931 = vmatpush.msrb.mxu0 %v4291_v34 }
 0x431   : > { %1767 = vmatmul.f32.gmra.mxu1 %v3157_v17  ;;  %v3220_v17 = vld [vmem:[%s5052_s4 + $0x1b0] sm:$0xff] }
 0x432   : > { %1932 = vmatpush.msrb.mxu0 %v4283_v33 }
 0x434   : > { %1933 = vmatpush.msrb.mxu0 %v4275_v31 }
 0x436   : > { %v4371_v22 = vpop.f32.mrf.mxu1  ;;  %1934 = vmatpush.msrb.mxu0 %v4267_v24 }
 0x437   : > { %1832 = vmatmul.f32.gmra.mxu2 %v1618_v15 }
 0x438   : > { %1935 = vmatpush.msrb.mxu0 %v4259_v18 }
 0x439   : > { %3198 = vmatmul.msk.f32.vlgmr.msrb.gmra.mxu1 %vm1141_vm1, %v4009_v43  ;;  %v3179_v43 = vld [vmem:[%s5052_s4 + $0x108] sm:$0xff] }
 0x43a   : > { %1936 = vmatpush.msrb.mxu0 %v4246_v1 }
 0x43c   : > { %1937 = vmatpush.msrb.mxu0 %v4239_v10  ;;  %v3180_v10 = vld [vmem:[%s5052_s4 + $0x110] sm:$0xff] }
 0x43e   : > { %v4382_v3 = vpop.f32.mrf.mxu1  ;;  %1938 = vmatpush.msrb.mxu0 %v4237_v13 }
 0x43f   : > { %1939 = vmatmul.f32.vlgmr.msrb.gmra.mxu0 %v3178_v25  ;;  %v3221_v25 = vld [vmem:[%s5052_s4 + $0x1b8] sm:$0xff] }
 0x441   : > { %3199 = vmatmul.msk.f32.gmra.mxu1 %vm1141_vm1, %v4018_v46  ;;  %v3181_v46 = vld [vmem:[%s5052_s4 + $0x118] sm:$0xff] }
 0x442   : > { %v4488_v9 = vpop.f32.mrf.mxu2 }
 0x446   : > { %v4390_v18 = vpop.f32.mrf.mxu1 }
 0x447   : > { %1942 = vmatmul.f32.gmra.mxu0 %v3179_v43  ;;  %v3222_v43 = vld [vmem:[%s5052_s4 + $0x1c0] sm:$0xff] }
 0x449   : > { %3200 = vmatmul.msk.f32.gmra.mxu1 %vm1141_vm1, %v4020_v48  ;;  %v3182_v48 = vld [vmem:[%s5052_s4 + $0x120] sm:$0xff] }
 0x44a   : > { %v4490_v54 = vpop.f32.mrf.mxu2 }
 0x44e   : > { %v4397_v1 = vpop.f32.mrf.mxu1 }
 0x44f   : > { %1945 = vmatmul.f32.gmra.mxu0 %v3180_v10 }
 0x451   : > { %3201 = vmatmul.msk.f32.gmra.mxu1 %vm1141_vm1, %v4030_v52  ;;  %v3183_v52 = vld [vmem:[%s5052_s4 + $0x128] sm:$0xff] }
 0x452   : > { %v4492_v30 = vpop.f32.mrf.mxu2 }
 0x456   : > { %v4404_v13 = vpop.f32.mrf.mxu1 }
 0x457   : > { %1948 = vmatmul.f32.gmra.mxu0 %v3181_v46  ;;  %v3223_v46 = vld [vmem:[%s5052_s4 + $0x1c8] sm:$0xff] }
 0x459   : > { %3202 = vmatmul.msk.f32.gmra.mxu1 %vm1141_vm1, %v4057_v61  ;;  %v3184_v61 = vld [vmem:[%s5052_s4 + $0x130] sm:$0xff] }
 0x45a   : > { %v4497_v60 = vpop.f32.mrf.mxu2 }
 0x45e   : > { %v4411_v24 = vpop.f32.mrf.mxu1 }
 0x45f   : > { %1951 = vmatmul.f32.gmra.mxu0 %v3182_v48  ;;  %v3247_v48 = vld [vmem:[%s5053_s5 + $0x18] sm:$0xff] }
 0x460   : > { %2377 = vmatpush.msra.mxu0 %v3247_v48 }
 0x461   : > { %3203 = vmatmul.msk.f32.gmra.mxu1 %vm1141_vm1, %v4066_v26  ;;  %v3185_v26 = vld [vmem:[%s5052_s4 + $0x138] sm:$0xff] }
 0x462   : > { %v4502_v11 = vpop.f32.mrf.mxu2 }
 0x466   : > { %v4418_v31 = vpop.f32.mrf.mxu1 }
 0x467   : > { %1954 = vmatmul.f32.gmra.mxu0 %v3183_v52 }
 0x469   : > { %3204 = vmatmul.msk.f32.gmra.mxu1 %vm1141_vm1, %v4068_v49  ;;  %v3186_v49 = vld [vmem:[%s5052_s4 + $0x140] sm:$0xff] }
 0x46a   : > { %v4510_v2 = vpop.f32.mrf.mxu2 }
 0x46e   : > { %v4425_v38 = vpop.f32.mrf.mxu1 }
 0x46f   : > { %1957 = vmatmul.f32.gmra.mxu0 %v3184_v61  ;;  %v3224_v61 = vld [vmem:[%s5052_s4 + $0x1d0] sm:$0xff] }
 0x471   : > { %3205 = vmatmul.msk.f32.gmra.mxu1 %vm1141_vm1, %v4078_v55  ;;  %v3187_v55 = vld [vmem:[%s5052_s4 + $0x148] sm:$0xff] }
 0x472   : > { %v4515_v8 = vpop.f32.mrf.mxu2 }
 0x476   : > { %v4432_v27 = vpop.f32.mrf.mxu1 }
 0x477   : > { %1960 = vmatmul.f32.gmra.mxu0 %v3185_v26 }
 0x479   : > { %3206 = vmatmul.msk.f32.gmra.mxu1 %vm1141_vm1, %v4103_v7  ;;  %v3188_v7 = vld [vmem:[%s5052_s4 + $0x150] sm:$0xff] }
 0x47a   : > { %v4520_v16 = vpop.f32.mrf.mxu2 }
 0x47e   : > { %v4439_v33 = vpop.f32.mrf.mxu1 }
 0x47f   : > { %1963 = vmatmul.f32.gmra.mxu0 %v3186_v49  ;;  %v3225_v49 = vld [vmem:[%s5052_s4 + $0x1d8] sm:$0xff] }
 0x481   : > { %3207 = vmatmul.msk.f32.gmra.mxu1 %vm1141_vm1, %v4112_v42  ;;  %v3189_v42 = vld [vmem:[%s5052_s4 + $0x158] sm:$0xff] }
 0x482   : > { %v4525_v15 = vpop.f32.mrf.mxu2 }
 0x486   : > { %v4446_v19 = vpop.f32.mrf.mxu1 }
 0x487   : > { %1966 = vmatmul.f32.gmra.mxu0 %v3187_v55 }
 0x489   : > { %3208 = vmatmul.msk.f32.gmra.mxu1 %vm1141_vm1, %v4114_v45  ;;  %v3190_v45 = vld [vmem:[%s5052_s4 + $0x160] sm:$0xff] }
 0x48a   : > { %v4533_v10 = vpop.f32.mrf.mxu2 }
 0x48e   : > { %v4453_v5 = vpop.f32.mrf.mxu1 }
 0x48f   : > { %1969 = vmatmul.f32.gmra.mxu0 %v3188_v7  ;;  %v3226_v7 = vld [vmem:[%s5052_s4 + $0x1e0] sm:$0xff] }
 0x491   : > { %3209 = vmatmul.msk.f32.gmra.mxu1 %vm1141_vm1, %v4122_v57  ;;  %v3191_v57 = vld [vmem:[%s5052_s4 + $0x168] sm:$0xff] }
 0x492   : > { %v4541_v52 = vpop.f32.mrf.mxu2 }
 0x496   : > { %v4460_v34 = vpop.f32.mrf.mxu1 }
 0x497   : > { %1972 = vmatmul.f32.gmra.mxu0 %v3189_v42 }
 0x499   : > { %3210 = vmatmul.msk.f32.gmra.mxu1 %vm1141_vm1, %v4149_v47  ;;  %v3192_v47 = vld [vmem:[%s5052_s4 + $0x170] sm:$0xff] }
 0x49a   : > { %v4546_v26 = vpop.f32.mrf.mxu2 }
 0x49e   : > { %v4467_v36 = vpop.f32.mrf.mxu1 }
 0x49f   : > { %1975 = vmatmul.f32.gmra.mxu0 %v3190_v45  ;;  %v3227_v45 = vld [vmem:[%s5052_s4 + $0x1e8] sm:$0xff] }
 0x4a1   : > { %3211 = vmatmul.msk.f32.gmra.mxu1 %vm1141_vm1, %v4151_v56  ;;  %v3193_v56 = vld [vmem:[%s5052_s4 + $0x178] sm:$0xff] }
 0x4a2   : > { %v4551_v55 = vpop.f32.mrf.mxu2 }
 0x4a6   : > { %v4474_v37 = vpop.f32.mrf.mxu1 }
 0x4a7   : > { %1978 = vmatmul.f32.gmra.mxu0 %v3191_v57 }
 0x4a9   : > { %3212 = vmatmul.msk.f32.gmra.mxu1 %vm1141_vm1, %v4163_v28 }
 0x4aa   : > { %v4559_v57 = vpop.f32.mrf.mxu2 }
 0x4ae   : > { %v4481_v39 = vpop.f32.mrf.mxu1 }
 0x4af   : > { %1981 = vmatmul.f32.gmra.mxu0 %v3192_v47  ;;  %v2238_v47 = vld [vmem:[%s5053_s5 + $0x8] sm:$0xff] }
 0x4b0   : > { %2301 = vmatpush.msra.mxu3 %v2238_v47 }
 0x4b1   : > { %3213 = vmatmul.msk.f32.gmra.mxu1 %vm1141_vm1, %v4165_v29 }
 0x4b6   : > { %v2026_v40 = vpop.f32.mrf.mxu1 }
 0x4b7   : > { %1984 = vmatmul.f32.gmra.mxu0 %v3193_v56  ;;  %v3273_v56 = vld [vmem:[%s5053_s5 + $0x28] sm:$0xff] }
 0x4bc   : > { %v1940_v42 = vpop.f32.mrf.mxu0 }
 0x4be   : > { %v2029_v41 = vpop.f32.mrf.mxu1 }
 0x4c6   : > { %v2032_v23 = vpop.f32.mrf.mxu1 }
 0x4ce   : > { %v2035_v35 = vpop.f32.mrf.mxu1 }
 0x4d6   : > { %v2038_v28 = vpop.f32.mrf.mxu1 }
 0x4de   : > { %v2041_v44 = vpop.f32.mrf.mxu1 }
 0x4e6   : > { %v2044_v12 = vpop.f32.mrf.mxu1 }
 0x4ee   : > { %v2047_v53 = vpop.f32.mrf.mxu1 }
 0x4f6   : > { %v2050_v21 = vpop.f32.mrf.mxu1 }
 0x4fe   : > { %v2053_v50 = vpop.f32.mrf.mxu1 }
 0x506   : > { %v2056_v58 = vpop.f32.mrf.mxu1 }
 0x50e   : > { %v2059_v4 = vpop.f32.mrf.mxu1 }
 0x516   : > { %v2062_v32 = vpop.f32.mrf.mxu1 }
 0x51e   : > { %v2065_v20 = vpop.f32.mrf.mxu1 }
 0x526   : > { %v2068_v29 = vpop.f32.mrf.mxu1 }
 0x52e   : > { %v2071_v51 = vpop.f32.mrf.mxu1 }
 0x52f   : > { %2091 = vmatpush.msrb.mxu2 %v2071_v51  ;;  %v1792_v51 = vadd.f32 %v4490_v54, %v4382_v3  ;;  %v1795_v54 = vadd.f32 %v4492_v30, %v4390_v18  ;;  %v1798_v30 = vadd.f32 %v4497_v60, %v4397_v1  ;;  %v1801_v60 = vadd.f32 %v4502_v11, %v4404_v13 }
 0x530   : > { %v1804_v11 = vadd.f32 %v4510_v2, %v4411_v24  ;;  %v1807_v2 = vadd.f32 %v4515_v8, %v4418_v31  ;;  %v1810_v8 = vadd.f32 %v4520_v16, %v4425_v38  ;;  %v1813_v16 = vadd.f32 %v4525_v15, %v4432_v27 }
 0x531   : > { %2092 = vmatpush.msrb.mxu2 %v2068_v29  ;;  %v1816_v15 = vadd.f32 %v4533_v10, %v4439_v33  ;;  %v3299_v33 = vld [vmem:[%s5053_s5 + $0x38] sm:$0xff] }
 0x533   : > { %2093 = vmatpush.msrb.mxu2 %v2065_v20 }
 0x535   : > { %2094 = vmatpush.msrb.mxu2 %v2062_v32 }
 0x537   : > { %2095 = vmatpush.msrb.mxu2 %v2059_v4 }
 0x539   : > { %2096 = vmatpush.msrb.mxu2 %v2056_v58  ;;  %v1789_v58 = vadd.f32 %v4488_v9, %v4371_v22 }
 0x53b   : > { %2097 = vmatpush.msrb.mxu2 %v2053_v50  ;;  %v1988_v4 = vadd.f32 %v1940_v42, %v1789_v58 }
 0x53d   : > { %2098 = vmatpush.msrb.mxu2 %v2050_v21 }
 0x53f   : > { %2099 = vmatpush.msrb.mxu2 %v2047_v53  ;;  %v3229_v53 = vld [vmem:[%s5052_s4 + $0x1f8] sm:$0xff] }
 0x541   : > { %2100 = vmatpush.msrb.mxu2 %v2044_v12 }
 0x543   : > { %2101 = vmatpush.msrb.mxu2 %v2041_v44  ;;  %v4579_v44 = vpop.f32.mrf.mxu2 }
 0x545   : > { %2102 = vmatpush.msrb.mxu2 %v2038_v28  ;;  %v3228_v28 = vld [vmem:[%s5052_s4 + $0x1f0] sm:$0xff] }
 0x547   : > { %2103 = vmatpush.msrb.mxu2 %v2035_v35  ;;  %v1943_v35 = vpop.f32.mrf.mxu0 }
 0x548   : > { %v1989_v9 = vadd.f32 %v1943_v35, %v1792_v51 }
 0x549   : > { %2104 = vmatpush.msrb.mxu2 %v2032_v23  ;;  %v3272_v23 = vld [vmem:[%s5053_s5 + $0x20] sm:$0xff] }
 0x54b   : > { %2105 = vmatpush.msrb.mxu2 %v2029_v41  ;;  %v3246_v41 = vld [vmem:[%s5053_s5 + $0x10] sm:$0xff]  ;;  %v4584_v21 = vpop.f32.mrf.mxu2 }
 0x54c   : > { %2378 = vmatpush.msra.mxu0 %v3246_v41 }
 0x54d   : > { %2106 = vmatpush.msrb.mxu2 %v2026_v40  ;;  %v2237_v40 = vld [vmem:[%s5053_s5] sm:$0xff] }
 0x54e   : > { %2107 = vmatmul.f32.vlgmr.msrb.gmra.mxu2 %v3214_v59  ;;  %2302 = vmatpush.msra.mxu3 %v2237_v40 }
 0x54f   : > { %2536 = vmatpush.msra.mxu2 %v3273_v56  ;;  %v1946_v12 = vpop.f32.mrf.mxu0  ;;  %2662 = vmatpush.msrb.mxu0 %v3299_v33 }
 0x551   : > { %2537 = vmatpush.msra.mxu2 %v3272_v23 }
 0x556   : > { %2110 = vmatmul.f32.gmra.mxu2 %v3215_v62 }
 0x557   : > { %v1949_v50 = vpop.f32.mrf.mxu0 }
 0x55e   : > { %2113 = vmatmul.f32.gmra.mxu2 %v3216_v0 }
 0x55f   : > { %v1952_v22 = vpop.f32.mrf.mxu0 }
 0x560   : > { %v1992_v42 = vadd.f32 %v1952_v22, %v1801_v60 }
 0x566   : > { %2116 = vmatmul.f32.gmra.mxu2 %v3217_v63 }
 0x56e   : > { %2119 = vmatmul.f32.gmra.mxu2 %v3218_v6  ;;  %v1990_v6 = vadd.f32 %v1946_v12, %v1795_v54 }
 0x576   : > { %2122 = vmatmul.f32.gmra.mxu2 %v3219_v14  ;;  %v1955_v14 = vpop.f32.mrf.mxu0 }
 0x577   : > { %v1993_v41 = vadd.f32 %v1955_v14, %v1804_v11 }
 0x57e   : > { %2125 = vmatmul.f32.gmra.mxu2 %v3220_v17 }
 0x586   : > { %2128 = vmatmul.f32.gmra.mxu2 %v3221_v25 }
 0x58e   : > { %2131 = vmatmul.f32.gmra.mxu2 %v3222_v43 }
 0x596   : > { %2134 = vmatmul.f32.gmra.mxu2 %v3223_v46  ;;  %v1991_v46 = vadd.f32 %v1949_v50, %v1798_v30 }
 0x59e   : > { %2137 = vmatmul.f32.gmra.mxu2 %v3224_v61 }
 0x5a6   : > { %2140 = vmatmul.f32.gmra.mxu2 %v3225_v49  ;;  %v1958_v49 = vpop.f32.mrf.mxu0 }
 0x5ae   : > { %2143 = vmatmul.f32.gmra.mxu2 %v3226_v7  ;;  %v1961_v13 = vpop.f32.mrf.mxu0 }
 0x5b6   : > { %2146 = vmatmul.f32.gmra.mxu2 %v3227_v45  ;;  %v1964_v12 = vpop.f32.mrf.mxu0 }
 0x5be   : > { %2149 = vmatmul.f32.gmra.mxu2 %v3228_v28 }
 0x5c6   : > { %2152 = vmatmul.f32.gmra.mxu2 %v3229_v53  ;;  %v1994_v53 = vadd.f32 %v1958_v49, %v1807_v2 }
 0x5d1   : > { %v2108_v32 = vpop.f32.mrf.mxu2 }
 0x5d2   : > { %v2156_v20 = vadd.f32 %v2108_v32, %v1988_v4  ;;  %v1995_v32 = vadd.f32 %v1961_v13, %v1810_v8 }
 0x5d4   : > { %vm2172_vm1 = vcmp.ge.f32.partialorder %v2156_v20, 0.0  ;;  %v2188_v29 = vmul.f32 0.2, %v2156_v20 }
 0x5d6   : > { %v4597_v59 = vsel %vm2172_vm1, %v2156_v20, %v2188_v29  ;;  %v1967_v20 = vpop.f32.mrf.mxu0 }
 0x5d7   : > { %2221 = vst.msk [vmem:[%s4593_s14] sm:$0xff] %vm2220_vm15, %v4597_v59  ;;  %3230 = vmatmul.msk.f32.vlgmr.msra.gmra.mxu3 %vm2220_vm15, %v4597_v59  ;;  %3248 = vmatmul.msk.f32.vlgmr.msra.gmra.mxu0 %vm2220_vm15, %v4597_v59 }
 0x5d8   : > { %3274 = vmatmul.msk.f32.vlgmr.msra.gmra.mxu2 %vm2220_vm15, %v4597_v59 }
 0x5d9   : > { %v2111_v62 = vpop.f32.mrf.mxu2 }
 0x5da   : > { %v2157_v0 = vadd.f32 %v2111_v62, %v1989_v9  ;;  %v1996_v9 = vadd.f32 %v1964_v12, %v1813_v16 }
 0x5dc   : > { %vm2173_vm0 = vcmp.ge.f32.partialorder %v2157_v0, 0.0  ;;  %v2189_v3 = vmul.f32 0.2, %v2157_v0 }
 0x5de   : > { %v4610_v63 = vsel %vm2173_vm0, %v2157_v0, %v2189_v3  ;;  %v1970_v3 = vpop.f32.mrf.mxu0  ;;  %vm2795_vm0 = vcmask 64512  }
 0x5df   : > { %2222 = vst.msk [vmem:[%s4593_s14 + $0x8] sm:$0xff] %vm2220_vm15, %v4610_v63  ;;  %3231 = vmatmul.msk.f32.gmra.mxu3 %vm2220_vm15, %v4610_v63  ;;  %3249 = vmatmul.msk.f32.gmra.mxu0 %vm2220_vm15, %v4610_v63 }
 0x5e0   : > { %3275 = vmatmul.msk.f32.gmra.mxu2 %vm2220_vm15, %v4610_v63 }
 0x5e1   : > { %v2114_v17 = vpop.f32.mrf.mxu2 }
 0x5e2   : > { %v2158_v25 = vadd.f32 %v2114_v17, %v1990_v6  ;;  %v1997_v6 = vadd.f32 %v1967_v20, %v1816_v15 }
 0x5e4   : > { %vm2174_vm2 = vcmp.ge.f32.partialorder %v2158_v25, 0.0  ;;  %v2190_v18 = vmul.f32 0.2, %v2158_v25 }
 0x5e6   : > { %v4623_v43 = vsel %vm2174_vm2, %v2158_v25, %v2190_v18  ;;  %v1973_v25 = vpop.f32.mrf.mxu0  ;;  %v1819_v18 = vadd.f32 %v4541_v52, %v4446_v19  ;;  %v1822_v52 = vadd.f32 %v4546_v26, %v4453_v5  ;;  %v1825_v26 = vadd.f32 %v4551_v55, %v4460_v34  ;;  %v3298_v55 = vld [vmem:[%s5053_s5 + $0x30] sm:$0xff] }
 0x5e7   : > { %2223 = vst.msk [vmem:[%s4593_s14 + $0x10] sm:$0xff] %vm2220_vm15, %v4623_v43  ;;  %3232 = vmatmul.msk.f32.gmra.mxu3 %vm2220_vm15, %v4623_v43  ;;  %3250 = vmatmul.msk.f32.gmra.mxu0 %vm2220_vm15, %v4623_v43 }
 0x5e8   : > { %3276 = vmatmul.msk.f32.gmra.mxu2 %vm2220_vm15, %v4623_v43  ;;  %v1999_v60 = vadd.f32 %v1973_v25, %v1822_v52  ;;  %2663 = vmatpush.msrb.mxu0 %v3298_v55 }
 0x5e9   : > { %v2117_v48 = vpop.f32.mrf.mxu2 }
 0x5ea   : > { %v2159_v61 = vadd.f32 %v2117_v48, %v1991_v46  ;;  %v1998_v46 = vadd.f32 %v1970_v3, %v1819_v18 }
 0x5ec   : > { %vm2175_vm3 = vcmp.ge.f32.partialorder %v2159_v61, 0.0  ;;  %v2191_v1 = vmul.f32 0.2, %v2159_v61 }
 0x5ee   : > { %v4636_v7 = vsel %vm2175_vm3, %v2159_v61, %v2191_v1  ;;  %v1976_v1 = vpop.f32.mrf.mxu0 }
 0x5ef   : > { %2224 = vst.msk [vmem:[%s4593_s14 + $0x18] sm:$0xff] %vm2220_vm15, %v4636_v7  ;;  %3233 = vmatmul.msk.f32.gmra.mxu3 %vm2220_vm15, %v4636_v7  ;;  %3251 = vmatmul.msk.f32.gmra.mxu0 %vm2220_vm15, %v4636_v7 }
 0x5f0   : > { %3277 = vmatmul.msk.f32.gmra.mxu2 %vm2220_vm15, %v4636_v7 }
 0x5f1   : > { %v2120_v45 = vpop.f32.mrf.mxu2 }
 0x5f2   : > { %v2160_v47 = vadd.f32 %v2120_v45, %v1992_v42 }
 0x5f4   : > { %vm2176_vm4 = vcmp.ge.f32.partialorder %v2160_v47, 0.0  ;;  %v2192_v56 = vmul.f32 0.2, %v2160_v47 }
 0x5f6   : > { %v4649_v40 = vsel %vm2176_vm4, %v2160_v47, %v2192_v56  ;;  %v2000_v56 = vadd.f32 %v1976_v1, %v1825_v26  ;;  %v1979_v13 = vpop.f32.mrf.mxu0 }
 0x5f7   : > { %2225 = vst.msk [vmem:[%s4593_s14 + $0x20] sm:$0xff] %vm2220_vm15, %v4649_v40  ;;  %3234 = vmatmul.msk.f32.gmra.mxu3 %vm2220_vm15, %v4649_v40  ;;  %3252 = vmatmul.msk.f32.gmra.mxu0 %vm2220_vm15, %v4649_v40 }
 0x5f8   : > { %3278 = vmatmul.msk.f32.gmra.mxu2 %vm2220_vm15, %v4649_v40 }
 0x5f9   : > { %v2123_v23 = vpop.f32.mrf.mxu2 }
 0x5fa   : > { %v2161_v35 = vadd.f32 %v2123_v23, %v1993_v41  ;;  %v1828_v23 = vadd.f32 %v4559_v57, %v4467_v36  ;;  %v1831_v57 = vadd.f32 %v4579_v44, %v4474_v37 }
 0x5fc   : > { %vm2177_vm5 = vcmp.ge.f32.partialorder %v2161_v35, 0.0  ;;  %v2193_v24 = vmul.f32 0.2, %v2161_v35 }
 0x5fe   : > { %v4662_v28 = vsel %vm2177_vm5, %v2161_v35, %v2193_v24  ;;  %v2001_v24 = vadd.f32 %v1979_v13, %v1828_v23 }
 0x5ff   : > { %2226 = vst.msk [vmem:[%s4593_s14 + $0x28] sm:$0xff] %vm2220_vm15, %v4662_v28  ;;  %3235 = vmatmul.msk.f32.gmra.mxu3 %vm2220_vm15, %v4662_v28  ;;  %3253 = vmatmul.msk.f32.gmra.mxu0 %vm2220_vm15, %v4662_v28 }
 0x600   : > { %3279 = vmatmul.msk.f32.gmra.mxu2 %vm2220_vm15, %v4662_v28 }
 0x601   : > { %v2126_v50 = vpop.f32.mrf.mxu2 }
 0x602   : > { %v2162_v58 = vadd.f32 %v2126_v50, %v1994_v53  ;;  %v1982_v53 = vpop.f32.mrf.mxu0 }
 0x604   : > { %vm2178_vm6 = vcmp.ge.f32.partialorder %v2162_v58, 0.0  ;;  %v2194_v31 = vmul.f32 0.2, %v2162_v58 }
 0x606   : > { %v4675_v4 = vsel %vm2178_vm6, %v2162_v58, %v2194_v31  ;;  %v2002_v58 = vadd.f32 %v1982_v53, %v1831_v57  ;;  %v3264_v57 = vld [vmem:[%s5054_s6 + $0x40] sm:$0xff] }
 0x607   : > { %2227 = vst.msk [vmem:[%s4593_s14 + $0x30] sm:$0xff] %vm2220_vm15, %v4675_v4  ;;  %3236 = vmatmul.msk.f32.gmra.mxu3 %vm2220_vm15, %v4675_v4  ;;  %3254 = vmatmul.msk.f32.gmra.mxu0 %vm2220_vm15, %v4675_v4 }
 0x608   : > { %3280 = vmatmul.msk.f32.gmra.mxu2 %vm2220_vm15, %v4675_v4 }
 0x609   : > { %v2129_v29 = vpop.f32.mrf.mxu2 }
 0x60a   : > { %v2163_v51 = vadd.f32 %v2129_v29, %v1995_v32  ;;  %v1985_v44 = vpop.f32.mrf.mxu0  ;;  %v1834_v32 = vadd.f32 %v4584_v21, %v4481_v39 }
 0x60c   : > { %vm2179_vm7 = vcmp.ge.f32.partialorder %v2163_v51, 0.0  ;;  %v2195_v38 = vmul.f32 0.2, %v2163_v51  ;;  %v2003_v29 = vadd.f32 %v1985_v44, %v1834_v32  ;;  %v3267_v32 = vld [vmem:[%s5054_s6 + $0x58] sm:$0xff] }
 0x60e   : > { %v4688_v22 = vsel %vm2179_vm7, %v2163_v51, %v2195_v38 }
 0x60f   : > { %2228 = vst.msk [vmem:[%s4593_s14 + $0x38] sm:$0xff] %vm2220_vm15, %v4688_v22  ;;  %3237 = vmatmul.msk.f32.gmra.mxu3 %vm2220_vm15, %v4688_v22  ;;  %3255 = vmatmul.msk.f32.gmra.mxu0 %vm2220_vm15, %v4688_v22 }
 0x610   : > { %3281 = vmatmul.msk.f32.gmra.mxu2 %vm2220_vm15, %v4688_v22 }
 0x611   : > { %v2132_v62 = vpop.f32.mrf.mxu2 }
 0x612   : > { %v2164_v0 = vadd.f32 %v2132_v62, %v1996_v9 }
 0x614   : > { %vm2180_vm8 = vcmp.ge.f32.partialorder %v2164_v0, 0.0  ;;  %v2196_v27 = vmul.f32 0.2, %v2164_v0 }
 0x616   : > { %v4701_v54 = vsel %vm2180_vm8, %v2164_v0, %v2196_v27 }
 0x617   : > { %2229 = vst.msk [vmem:[%s4593_s14 + $0x40] sm:$0xff] %vm2220_vm15, %v4701_v54  ;;  %3238 = vmatmul.msk.f32.gmra.mxu3 %vm2220_vm15, %v4701_v54  ;;  %3256 = vmatmul.msk.f32.gmra.mxu0 %vm2220_vm15, %v4701_v54 }
 0x618   : > { %3282 = vmatmul.msk.f32.gmra.mxu2 %vm2220_vm15, %v4701_v54 }
 0x619   : > { %v2135_v10 = vpop.f32.mrf.mxu2 }
 0x61a   : > { %v2165_v14 = vadd.f32 %v2135_v10, %v1997_v6 }
 0x61c   : > { %vm2181_vm9 = vcmp.ge.f32.partialorder %v2165_v14, 0.0  ;;  %v2197_v17 = vmul.f32 0.2, %v2165_v14 }
 0x61e   : > { %v4717_v30 = vsel %vm2181_vm9, %v2165_v14, %v2197_v17 }
 0x61f   : > { %2230 = vst.msk [vmem:[%s4593_s14 + $0x48] sm:$0xff] %vm2220_vm15, %v4717_v30  ;;  %3239 = vmatmul.msk.f32.gmra.mxu3 %vm2220_vm15, %v4717_v30  ;;  %3257 = vmatmul.msk.f32.gmra.mxu0 %vm2220_vm15, %v4717_v30 }
 0x620   : > { %3283 = vmatmul.msk.f32.gmra.mxu2 %vm2220_vm15, %v4717_v30 }
 0x621   : > { %v2138_v48 = vpop.f32.mrf.mxu2 }
 0x622   : > { %v2166_v61 = vadd.f32 %v2138_v48, %v1998_v46 }
 0x624   : > { %vm2182_vm10 = vcmp.ge.f32.partialorder %v2166_v61, 0.0  ;;  %v2198_v19 = vmul.f32 0.2, %v2166_v61 }
 0x626   : > { %v4730_v49 = vsel %vm2182_vm10, %v2166_v61, %v2198_v19 }
 0x627   : > { %2231 = vst.msk [vmem:[%s4593_s14 + $0x50] sm:$0xff] %vm2220_vm15, %v4730_v49  ;;  %3240 = vmatmul.msk.f32.gmra.mxu3 %vm2220_vm15, %v4730_v49  ;;  %3258 = vmatmul.msk.f32.gmra.mxu0 %vm2220_vm15, %v4730_v49 }
 0x628   : > { %3284 = vmatmul.msk.f32.gmra.mxu2 %vm2220_vm15, %v4730_v49 }
 0x629   : > { %v2141_v42 = vpop.f32.mrf.mxu2 }
 0x62a   : > { %v2167_v45 = vadd.f32 %v2141_v42, %v1999_v60 }
 0x62c   : > { %vm2183_vm11 = vcmp.ge.f32.partialorder %v2167_v45, 0.0  ;;  %v2199_v5 = vmul.f32 0.2, %v2167_v45 }
 0x62e   : > { %v4743_v47 = vsel %vm2183_vm11, %v2167_v45, %v2199_v5 }
 0x62f   : > { %2232 = vst.msk [vmem:[%s4593_s14 + $0x58] sm:$0xff] %vm2220_vm15, %v4743_v47  ;;  %3241 = vmatmul.msk.f32.gmra.mxu3 %vm2220_vm15, %v4743_v47  ;;  %3259 = vmatmul.msk.f32.gmra.mxu0 %vm2220_vm15, %v4743_v47 }
 0x630   : > { %3285 = vmatmul.msk.f32.gmra.mxu2 %vm2220_vm15, %v4743_v47 }
 0x631   : > { %v2144_v11 = vpop.f32.mrf.mxu2 }
 0x632   : > { %v2168_v41 = vadd.f32 %v2144_v11, %v2000_v56 }
 0x634   : > { %vm2184_vm12 = vcmp.ge.f32.partialorder %v2168_v41, 0.0  ;;  %v2200_v34 = vmul.f32 0.2, %v2168_v41 }
 0x636   : > { %v4759_v35 = vsel %vm2184_vm12, %v2168_v41, %v2200_v34 }
 0x637   : > { %2233 = vst.msk [vmem:[%s4593_s14 + $0x60] sm:$0xff] %vm2220_vm15, %v4759_v35  ;;  %3242 = vmatmul.msk.f32.gmra.mxu3 %vm2220_vm15, %v4759_v35  ;;  %3260 = vmatmul.msk.f32.gmra.mxu0 %vm2220_vm15, %v4759_v35 }
 0x638   : > { %3286 = vmatmul.msk.f32.gmra.mxu2 %vm2220_vm15, %v4759_v35 }
 0x639   : > { %v2147_v2 = vpop.f32.mrf.mxu2 }
 0x63a   : > { %v2169_v12 = vadd.f32 %v2147_v2, %v2001_v24 }
 0x63c   : > { %vm2185_vm13 = vcmp.ge.f32.partialorder %v2169_v12, 0.0  ;;  %v2201_v36 = vmul.f32 0.2, %v2169_v12 }
 0x63e   : > { %v4772_v50 = vsel %vm2185_vm13, %v2169_v12, %v2201_v36 }
 0x63f   : > { %2234 = vst.msk [vmem:[%s4593_s14 + $0x68] sm:$0xff] %vm2220_vm15, %v4772_v50  ;;  %3243 = vmatmul.msk.f32.gmra.mxu3 %vm2220_vm15, %v4772_v50  ;;  %3261 = vmatmul.msk.f32.gmra.mxu0 %vm2220_vm15, %v4772_v50 }
 0x640   : > { %3287 = vmatmul.msk.f32.gmra.mxu2 %vm2220_vm15, %v4772_v50 }
 0x641   : > { %v2150_v31 = vpop.f32.mrf.mxu2 }
 0x642   : > { %v2170_v8 = vadd.f32 %v2150_v31, %v2002_v58  ;;  %v3265_v31 = vld [vmem:[%s5054_s6 + $0x48] sm:$0xff] }
 0x644   : > { %vm2186_vm14 = vcmp.ge.f32.partialorder %v2170_v8, 0.0  ;;  %v2202_v37 = vmul.f32 0.2, %v2170_v8 }
 0x646   : > { %v4785_v20 = vsel %vm2186_vm14, %v2170_v8, %v2202_v37  ;;  %v3266_v37 = vld [vmem:[%s5054_s6 + $0x50] sm:$0xff] }
 0x647   : > { %2235 = vst.msk [vmem:[%s4593_s14 + $0x70] sm:$0xff] %vm2220_vm15, %v4785_v20  ;;  %3244 = vmatmul.msk.f32.gmra.mxu3 %vm2220_vm15, %v4785_v20  ;;  %3262 = vmatmul.msk.f32.gmra.mxu0 %vm2220_vm15, %v4785_v20 }
 0x648   : > { %3288 = vmatmul.msk.f32.gmra.mxu2 %vm2220_vm15, %v4785_v20 }
 0x649   : > { %v2153_v51 = vpop.f32.mrf.mxu2 }
 0x64a   : > { %v2171_v38 = vadd.f32 %v2153_v51, %v2003_v29  ;;  %v3268_v29 = vld [vmem:[%s5054_s6 + $0x60] sm:$0xff] }
 0x64b   : > { %v3290_v51 = vld [vmem:[%s5054_s6 + $0x80] sm:$0xff] }
 0x64c   : > { %vm2187_vm1 = vcmp.ge.f32.partialorder %v2171_v38, 0.0  ;;  %v2203_v16 = vmul.f32 0.2, %v2171_v38 }
 0x64e   : > { %v4796_v39 = vsel %vm2187_vm1, %v2171_v38, %v2203_v16  ;;  %v3269_v16 = vld [vmem:[%s5054_s6 + $0x68] sm:$0xff] }
 0x64f   : > { %2236 = vst.msk [vmem:[%s4593_s14 + $0x78] sm:$0xff] %vm2220_vm15, %v4796_v39  ;;  %3245 = vmatmul.msk.f32.gmra.mxu3 %vm2220_vm15, %v4796_v39  ;;  %3263 = vmatmul.msk.f32.gmra.mxu0 %vm2220_vm15, %v4796_v39 }
 0x650   : > { %3289 = vmatmul.msk.f32.gmra.mxu2 %vm2220_vm15, %v4796_v39 }
 0x654   : > { %v4807_v21 = vpop.f32.mrf.mxu0 }
 0x657   : > { %3300 = vmatmul.msk.f32.vlgmr.msrb.gmra.mxu0 %vm2220_vm15, %v4597_v59 }
 0x65a   : > { %v4811_v9 = vpop.f32.mrf.mxu3 }
 0x65b   : > { %v4813_v62 = vpop.f32.mrf.mxu2 }
 0x65c   : > { %v4815_v0 = vpop.f32.mrf.mxu0 }
 0x65f   : > { %3301 = vmatmul.msk.f32.gmra.mxu0 %vm2220_vm15, %v4610_v63 }
 0x662   : > { %v4819_v3 = vpop.f32.mrf.mxu3 }
 0x663   : > { %v4821_v27 = vpop.f32.mrf.mxu2 }
 0x664   : > { %v4823_v15 = vpop.f32.mrf.mxu0 }
 0x667   : > { %3302 = vmatmul.msk.f32.gmra.mxu0 %vm2220_vm15, %v4623_v43 }
 0x66a   : > { %v4827_v6 = vpop.f32.mrf.mxu3 }
 0x66b   : > { %v4829_v59 = vpop.f32.mrf.mxu2 }
 0x66c   : > { %v4831_v33 = vpop.f32.mrf.mxu0 }
 0x66f   : > { %3303 = vmatmul.msk.f32.gmra.mxu0 %vm2220_vm15, %v4636_v7 }
 0x672   : > { %v4837_v63 = vpop.f32.mrf.mxu3 }
 0x673   : > { %v4835_v10 = vpop.f32.mrf.mxu2 }
 0x674   : > { %v4839_v14 = vpop.f32.mrf.mxu0 }
 0x677   : > { %3304 = vmatmul.msk.f32.gmra.mxu0 %vm2220_vm15, %v4649_v40 }
 0x67a   : > { %v4845_v25 = vpop.f32.mrf.mxu3 }
 0x67b   : > { %v4843_v17 = vpop.f32.mrf.mxu2 }
 0x67c   : > { %v2395_v43 = vpop.f32.mrf.mxu0 }
 0x67f   : > { %3305 = vmatmul.msk.f32.gmra.mxu0 %vm2220_vm15, %v4662_v28 }
 0x682   : > { %v4853_v46 = vpop.f32.mrf.mxu3 }
 0x683   : > { %v4849_v18 = vpop.f32.mrf.mxu2 }
 0x684   : > { %v2398_v7 = vpop.f32.mrf.mxu0 }
 0x687   : > { %3306 = vmatmul.msk.f32.gmra.mxu0 %vm2220_vm15, %v4675_v4 }
 0x68a   : > { %v4857_v40 = vpop.f32.mrf.mxu3 }
 0x68b   : > { %v2557_v48 = vpop.f32.mrf.mxu2 }
 0x68c   : > { %v2401_v61 = vpop.f32.mrf.mxu0 }
 0x68f   : > { %3307 = vmatmul.msk.f32.gmra.mxu0 %vm2220_vm15, %v4688_v22 }
 0x692   : > { %v4861_v1 = vpop.f32.mrf.mxu3 }
 0x693   : > { %v2560_v19 = vpop.f32.mrf.mxu2 }
 0x694   : > { %v2404_v52 = vpop.f32.mrf.mxu0 }
 0x697   : > { %3308 = vmatmul.msk.f32.gmra.mxu0 %vm2220_vm15, %v4701_v54 }
 0x69a   : > { %v4865_v45 = vpop.f32.mrf.mxu3 }
 0x69b   : > { %v2563_v28 = vpop.f32.mrf.mxu2 }
 0x69c   : > { %v2407_v60 = vpop.f32.mrf.mxu0 }
 0x69f   : > { %3309 = vmatmul.msk.f32.gmra.mxu0 %vm2220_vm15, %v4717_v30 }
 0x6a2   : > { %v4871_v54 = vpop.f32.mrf.mxu3 }
 0x6a3   : > { %v2566_v4 = vpop.f32.mrf.mxu2 }
 0x6a4   : > { %v2410_v42 = vpop.f32.mrf.mxu0 }
 0x6a7   : > { %3310 = vmatmul.msk.f32.gmra.mxu0 %vm2220_vm15, %v4730_v49 }
 0x6aa   : > { %v2334_v30 = vpop.f32.mrf.mxu3 }
 0x6ab   : > { %v2569_v22 = vpop.f32.mrf.mxu2 }
 0x6ac   : > { %v2413_v5 = vpop.f32.mrf.mxu0 }
 0x6af   : > { %3311 = vmatmul.msk.f32.gmra.mxu0 %vm2220_vm15, %v4743_v47 }
 0x6b2   : > { %v2337_v49 = vpop.f32.mrf.mxu3 }
 0x6b3   : > { %v2572_v26 = vpop.f32.mrf.mxu2 }
 0x6b4   : > { %v2416_v56 = vpop.f32.mrf.mxu0 }
 0x6b7   : > { %3312 = vmatmul.msk.f32.gmra.mxu0 %vm2220_vm15, %v4759_v35 }
 0x6ba   : > { %v2340_v23 = vpop.f32.mrf.mxu3 }
 0x6bb   : > { %v2575_v13 = vpop.f32.mrf.mxu2 }
 0x6bc   : > { %v2419_v11 = vpop.f32.mrf.mxu0 }
 0x6bf   : > { %3313 = vmatmul.msk.f32.gmra.mxu0 %vm2220_vm15, %v4772_v50 }
 0x6c2   : > { %v2343_v2 = vpop.f32.mrf.mxu3 }
 0x6c3   : > { %v2578_v41 = vpop.f32.mrf.mxu2 }
 0x6c4   : > { %v2422_v34 = vpop.f32.mrf.mxu0 }
 0x6c7   : > { %3314 = vmatmul.msk.f32.gmra.mxu0 %vm2220_vm15, %v4785_v20 }
 0x6ca   : > { %v2346_v53 = vpop.f32.mrf.mxu3 }
 0x6cb   : > { %v2581_v47 = vpop.f32.mrf.mxu2 }
 0x6cc   : > { %v2425_v55 = vpop.f32.mrf.mxu0 }
 0x6cd   : > { %2437 = vmatpush.msra.mxu1 %v2425_v55 }
 0x6cf   : > { %2438 = vmatpush.msra.mxu1 %v2422_v34  ;;  %3315 = vmatmul.msk.f32.gmra.mxu0 %vm2220_vm15, %v4796_v39  ;;  %v3291_v39 = vld [vmem:[%s5054_s6 + $0x88] sm:$0xff] }
 0x6d1   : > { %2439 = vmatpush.msra.mxu1 %v2419_v11  ;;  %v3322_v11 = vld [vmem:[%s5054_s6 + $0xf0] sm:$0xff] }
 0x6d2   : > { %v2349_v50 = vpop.f32.mrf.mxu3 }
 0x6d3   : > { %v2584_v35 = vpop.f32.mrf.mxu2  ;;  %2440 = vmatpush.msra.mxu1 %v2416_v56 }
 0x6d4   : > { %2596 = vmatpush.msrb.mxu3 %v2584_v35  ;;  %v4881_v24 = vpop.f32.mrf.mxu0 }
 0x6d5   : > { %2441 = vmatpush.msra.mxu1 %v2413_v5  ;;  %v3319_v5 = vld [vmem:[%s5054_s6 + $0xd8] sm:$0xff] }
 0x6d6   : > { %2597 = vmatpush.msrb.mxu3 %v2581_v47 }
 0x6d7   : > { %2442 = vmatpush.msra.mxu1 %v2410_v42 }
 0x6d8   : > { %2598 = vmatpush.msrb.mxu3 %v2578_v41 }
 0x6d9   : > { %2443 = vmatpush.msra.mxu1 %v2407_v60 }
 0x6da   : > { %2599 = vmatpush.msrb.mxu3 %v2575_v13 }
 0x6db   : > { %2444 = vmatpush.msra.mxu1 %v2404_v52  ;;  %v2359_v52 = vld [vmem:[%s5054_s6 + $0x38] sm:$0xff] }
 0x6dc   : > { %2600 = vmatpush.msrb.mxu3 %v2572_v26  ;;  %v4883_v12 = vpop.f32.mrf.mxu0  ;;  %v3320_v26 = vld [vmem:[%s5054_s6 + $0xe0] sm:$0xff] }
 0x6dd   : > { %2445 = vmatpush.msra.mxu1 %v2401_v61 }
 0x6de   : > { %2601 = vmatpush.msrb.mxu3 %v2569_v22 }
 0x6df   : > { %2446 = vmatpush.msra.mxu1 %v2398_v7  ;;  %v3297_v7 = vld [vmem:[%s5054_s6 + $0xb8] sm:$0xff] }
 0x6e0   : > { %2602 = vmatpush.msrb.mxu3 %v2566_v4  ;;  %v3317_v4 = vld [vmem:[%s5054_s6 + $0xc8] sm:$0xff] }
 0x6e1   : > { %2447 = vmatpush.msra.mxu1 %v2395_v43  ;;  %v3296_v43 = vld [vmem:[%s5054_s6 + $0xb0] sm:$0xff] }
 0x6e2   : > { %2603 = vmatpush.msrb.mxu3 %v2563_v28 }
 0x6e3   : > { %2448 = vmatpush.msra.mxu1 %v4839_v14 }
 0x6e4   : > { %2604 = vmatpush.msrb.mxu3 %v2560_v19  ;;  %v4886_v36 = vpop.f32.mrf.mxu0  ;;  %v2358_v19 = vld [vmem:[%s5054_s6 + $0x30] sm:$0xff] }
 0x6e5   : > { %2449 = vmatpush.msra.mxu1 %v4831_v33 }
 0x6e6   : > { %2605 = vmatpush.msrb.mxu3 %v2557_v48  ;;  %v2356_v48 = vld [vmem:[%s5054_s6 + $0x20] sm:$0xff] }
 0x6e7   : > { %2450 = vmatpush.msra.mxu1 %v4823_v15 }
 0x6e8   : > { %2606 = vmatpush.msrb.mxu3 %v4849_v18  ;;  %v2355_v18 = vld [vmem:[%s5054_s6 + $0x18] sm:$0xff] }
 0x6e9   : > { %2451 = vmatpush.msra.mxu1 %v4815_v0 }
 0x6ea   : > { %2607 = vmatpush.msrb.mxu3 %v4843_v17  ;;  %v2354_v17 = vld [vmem:[%s5054_s6 + $0x10] sm:$0xff] }
 0x6eb   : > { %2452 = vmatpush.msra.mxu1 %v4807_v21 }
 0x6ec   : > { %2608 = vmatpush.msrb.mxu3 %v4835_v10  ;;  %2453 = vmatmul.f32.vlgmr.msra.gmra.mxu1 %v3264_v57  ;;  %v4898_v58 = vpop.f32.mrf.mxu0  ;;  %v2353_v10 = vld [vmem:[%s5054_s6 + $0x8] sm:$0xff] }
 0x6ed   : > { %2478 = vmatpush.msrb.mxu1 %v2349_v50 }
 0x6ee   : > { %2609 = vmatpush.msrb.mxu3 %v4829_v59  ;;  %v3294_v59 = vld [vmem:[%s5054_s6 + $0xa0] sm:$0xff] }
 0x6ef   : > { %2479 = vmatpush.msrb.mxu1 %v2346_v53 }
 0x6f0   : > { %2610 = vmatpush.msrb.mxu3 %v4821_v27  ;;  %v3293_v27 = vld [vmem:[%s5054_s6 + $0x98] sm:$0xff] }
 0x6f1   : > { %2480 = vmatpush.msrb.mxu1 %v2343_v2 }
 0x6f2   : > { %2611 = vmatpush.msrb.mxu3 %v4813_v62  ;;  %v3270_v62 = vld [vmem:[%s5054_s6 + $0x70] sm:$0xff] }
 0x6f3   : > { %2481 = vmatpush.msrb.mxu1 %v2340_v23  ;;  %2612 = vmatmul.f32.vlgmr.msrb.gmra.mxu3 %v3290_v51 }
 0x6f4   : > { %2456 = vmatmul.f32.gmra.mxu1 %v3265_v31  ;;  %v4906_v8 = vpop.f32.mrf.mxu0 }
 0x6f5   : > { %2482 = vmatpush.msrb.mxu1 %v2337_v49  ;;  %v3323_v49 = vld [vmem:[%s5054_s6 + $0xf8] sm:$0xff] }
 0x6f7   : > { %2483 = vmatpush.msrb.mxu1 %v2334_v30  ;;  %v3321_v30 = vld [vmem:[%s5054_s6 + $0xe8] sm:$0xff] }
 0x6f9   : > { %2484 = vmatpush.msrb.mxu1 %v4871_v54 }
 0x6fb   : > { %2485 = vmatpush.msrb.mxu1 %v4865_v45  ;;  %2615 = vmatmul.f32.gmra.mxu3 %v3291_v39  ;;  %v3318_v45 = vld [vmem:[%s5054_s6 + $0xd0] sm:$0xff] }
 0x6fc   : > { %2459 = vmatmul.f32.gmra.mxu1 %v3266_v37  ;;  %v4913_v44 = vpop.f32.mrf.mxu0 }
 0x6fd   : > { %2486 = vmatpush.msrb.mxu1 %v4861_v1  ;;  %v3316_v1 = vld [vmem:[%s5054_s6 + $0xc0] sm:$0xff] }
 0x6ff   : > { %2487 = vmatpush.msrb.mxu1 %v4857_v40  ;;  %v2357_v40 = vld [vmem:[%s5054_s6 + $0x28] sm:$0xff] }
 0x701   : > { %2488 = vmatpush.msrb.mxu1 %v4853_v46 }
 0x703   : > { %2489 = vmatpush.msrb.mxu1 %v4845_v25 }
 0x704   : > { %2462 = vmatmul.f32.gmra.mxu1 %v3267_v32  ;;  %v2683_v20 = vpop.f32.mrf.mxu0 }
 0x705   : > { %2490 = vmatpush.msrb.mxu1 %v4837_v63  ;;  %v3295_v63 = vld [vmem:[%s5054_s6 + $0xa8] sm:$0xff] }
 0x707   : > { %2491 = vmatpush.msrb.mxu1 %v4827_v6  ;;  %v2352_v6 = vld [vmem:[%s5054_s6] sm:$0xff] }
 0x709   : > { %2492 = vmatpush.msrb.mxu1 %v4819_v3  ;;  %v3271_v3 = vld [vmem:[%s5054_s6 + $0x78] sm:$0xff] }
 0x70b   : > { %2493 = vmatpush.msrb.mxu1 %v4811_v9  ;;  %v3292_v9 = vld [vmem:[%s5054_s6 + $0x90] sm:$0xff] }
 0x70c   : > { %2465 = vmatmul.f32.gmra.mxu1 %v3268_v29  ;;  %v2686_v38 = vpop.f32.mrf.mxu0  ;;  %2618 = vmatmul.f32.gmra.mxu3 %v3292_v9 }
 0x714   : > { %2468 = vmatmul.f32.gmra.mxu1 %v3269_v16  ;;  %v2689_v21 = vpop.f32.mrf.mxu0  ;;  %2621 = vmatmul.f32.gmra.mxu3 %v3293_v27 }
 0x71c   : > { %2471 = vmatmul.f32.gmra.mxu1 %v3270_v62  ;;  %v2692_v0 = vpop.f32.mrf.mxu0  ;;  %2624 = vmatmul.f32.gmra.mxu3 %v3294_v59 }
 0x724   : > { %2474 = vmatmul.f32.gmra.mxu1 %v3271_v3  ;;  %v2695_v15 = vpop.f32.mrf.mxu0  ;;  %2627 = vmatmul.f32.gmra.mxu3 %v3295_v63 }
 0x72c   : > { %2494 = vmatmul.f32.vlgmr.msrb.gmra.mxu1 %v2352_v6  ;;  %v2698_v33 = vpop.f32.mrf.mxu0  ;;  %2630 = vmatmul.f32.gmra.mxu3 %v3296_v43 }
 0x734   : > { %2497 = vmatmul.f32.gmra.mxu1 %v2353_v10  ;;  %v2701_v14 = vpop.f32.mrf.mxu0  ;;  %2633 = vmatmul.f32.gmra.mxu3 %v3297_v7 }
 0x73c   : > { %2500 = vmatmul.f32.gmra.mxu1 %v2354_v17  ;;  %v2704_v25 = vpop.f32.mrf.mxu0 }
 0x744   : > { %2503 = vmatmul.f32.gmra.mxu1 %v2355_v18  ;;  %v2707_v46 = vpop.f32.mrf.mxu0 }
 0x74c   : > { %2506 = vmatmul.f32.gmra.mxu1 %v2356_v48  ;;  %v2710_v61 = vpop.f32.mrf.mxu0 }
 0x74d   : > { %2722 = vmatpush.msra.mxu1 %v2710_v61 }
 0x74f   : > { %2723 = vmatpush.msra.mxu1 %v2707_v46 }
 0x751   : > { %2724 = vmatpush.msra.mxu1 %v2704_v25 }
 0x753   : > { %2725 = vmatpush.msra.mxu1 %v2701_v14 }
 0x754   : > { %2509 = vmatmul.f32.gmra.mxu1 %v2357_v40 }
 0x755   : > { %2726 = vmatpush.msra.mxu1 %v2698_v33 }
 0x757   : > { %2727 = vmatpush.msra.mxu1 %v2695_v15 }
 0x759   : > { %2728 = vmatpush.msra.mxu1 %v2692_v0 }
 0x75b   : > { %2729 = vmatpush.msra.mxu1 %v2689_v21 }
 0x75c   : > { %2512 = vmatmul.f32.gmra.mxu1 %v2358_v19 }
 0x75d   : > { %2730 = vmatpush.msra.mxu1 %v2686_v38 }
 0x75f   : > { %2731 = vmatpush.msra.mxu1 %v2683_v20 }
 0x761   : > { %2732 = vmatpush.msra.mxu1 %v4913_v44 }
 0x763   : > { %2733 = vmatpush.msra.mxu1 %v4906_v8 }
 0x764   : > { %2515 = vmatmul.f32.gmra.mxu1 %v2359_v52 }
 0x765   : > { %2734 = vmatpush.msra.mxu1 %v4898_v58 }
 0x767   : > { %2735 = vmatpush.msra.mxu1 %v4886_v36 }
 0x769   : > { %v2454_v28 = vpop.f32.mrf.mxu1  ;;  %2736 = vmatpush.msra.mxu1 %v4883_v12 }
 0x76b   : > { %2737 = vmatpush.msra.mxu1 %v4881_v24 }
 0x76c   : > { %2738 = vmatmul.f32.vlgmr.msra.gmra.mxu1 %v3316_v1 }
 0x771   : > { %v2457_v60 = vpop.f32.mrf.mxu1 }
 0x774   : > { %2741 = vmatmul.f32.gmra.mxu1 %v3317_v4 }
 0x776   : > { %v2613_v2 = vpop.f32.mrf.mxu3 }
 0x779   : > { %v2460_v42 = vpop.f32.mrf.mxu1 }
 0x77c   : > { %2744 = vmatmul.f32.gmra.mxu1 %v3318_v45 }
 0x77e   : > { %v2616_v53 = vpop.f32.mrf.mxu3 }
 0x781   : > { %v2463_v22 = vpop.f32.mrf.mxu1 }
 0x784   : > { %2747 = vmatmul.f32.gmra.mxu1 %v3319_v5 }
 0x789   : > { %v2466_v54 = vpop.f32.mrf.mxu1 }
 0x78c   : > { %2750 = vmatmul.f32.gmra.mxu1 %v3320_v26 }
 0x78f   : > { %v2619_v8 = vpop.f32.mrf.mxu3 }
 0x791   : > { %v2469_v56 = vpop.f32.mrf.mxu1 }
 0x794   : > { %2753 = vmatmul.f32.gmra.mxu1 %v3321_v30 }
 0x797   : > { %v2622_v39 = vpop.f32.mrf.mxu3 }
 0x799   : > { %v5010_v13 = vpop.f32.mrf.mxu1 }
 0x79c   : > { %2756 = vmatmul.f32.gmra.mxu1 %v3322_v11 }
 0x79f   : > { %v2625_v6 = vpop.f32.mrf.mxu3 }
 0x7a1   : > { %v5015_v41 = vpop.f32.mrf.mxu1 }
 0x7a4   : > { %2759 = vmatmul.f32.gmra.mxu1 %v3323_v49 }
 0x7a7   : > { %v2628_v25 = vpop.f32.mrf.mxu3 }
 0x7a9   : > { %v2495_v34 = vpop.f32.mrf.mxu1 }
 0x7aa   : > { %v2496_v57 = vadd.f32 %v2495_v34, %v2454_v28 }
 0x7ac   : > { %v2637_v50 = vadd.f32 %v2613_v2, %v2496_v57 }
 0x7af   : > { %v2631_v28 = vpop.f32.mrf.mxu3 }
 0x7b1   : > { %v2498_v47 = vpop.f32.mrf.mxu1 }
 0x7b2   : > { %v2499_v37 = vadd.f32 %v2498_v47, %v2457_v60 }
 0x7b4   : > { %v2638_v20 = vadd.f32 %v2616_v53, %v2499_v37 }
 0x7b7   : > { %v2634_v26 = vpop.f32.mrf.mxu3 }
 0x7b9   : > { %v2501_v55 = vpop.f32.mrf.mxu1 }
 0x7ba   : > { %v2502_v38 = vadd.f32 %v2501_v55, %v2460_v42 }
 0x7bc   : > { %v2639_v62 = vadd.f32 %v2619_v8, %v2502_v38 }
 0x7c1   : > { %v2504_v23 = vpop.f32.mrf.mxu1 }
 0x7c2   : > { %v2505_v3 = vadd.f32 %v2504_v23, %v2463_v22 }
 0x7c4   : > { %v2640_v59 = vadd.f32 %v2622_v39, %v2505_v3 }
 0x7c9   : > { %v2507_v35 = vpop.f32.mrf.mxu1 }
 0x7ca   : > { %v2508_v63 = vadd.f32 %v2507_v35, %v2466_v54 }
 0x7cc   : > { %v2641_v43 = vadd.f32 %v2625_v6, %v2508_v63 }
 0x7d1   : > { %v2510_v24 = vpop.f32.mrf.mxu1 }
 0x7d2   : > { %v2511_v46 = vadd.f32 %v2510_v24, %v2469_v56 }
 0x7d4   : > { %v2642_v40 = vadd.f32 %v2628_v25, %v2511_v46 }
 0x7d9   : > { %v2513_v12 = vpop.f32.mrf.mxu1 }
 0x7da   : > { %v2514_v1 = vadd.f32 %v2513_v12, %v5010_v13 }
 0x7dc   : > { %v2643_v42 = vadd.f32 %v2631_v28, %v2514_v1 }
 0x7e1   : > { %v2516_v36 = vpop.f32.mrf.mxu1 }
 0x7e2   : > { %v2517_v5 = vadd.f32 %v2516_v36, %v5015_v41 }
 0x7e4   : > { %v2644_v30 = vadd.f32 %v2634_v26, %v2517_v5 }
 0x7e9   : > { %v2739_v58 = vpop.f32.mrf.mxu1 }
 0x7ea   : > { %v2763_v31 = vadd.f32 %v2739_v58, %v2637_v50 }
 0x7ec   : > { %vm2771_vm15 = vcmp.ge.f32.partialorder %v2763_v31, 0.0  ;;  %v2779_v44 = vmul.f32 0.2, %v2763_v31 }
 0x7ee   : > { %v2787_v32 = vsel %vm2771_vm15, %v2763_v31, %v2779_v44 }
 0x7ef   : > { %2796 = vst.msk [vmem:[%s5025_s13] sm:$0xff] %vm2795_vm0, %v2787_v32 }
 0x7f1   : > { %v2742_v29 = vpop.f32.mrf.mxu1 }
 0x7f2   : > { %v2764_v51 = vadd.f32 %v2742_v29, %v2638_v20 }
 0x7f4   : > { %vm2772_vm2 = vcmp.ge.f32.partialorder %v2764_v51, 0.0  ;;  %v2780_v16 = vmul.f32 0.2, %v2764_v51 }
 0x7f6   : > { %v2788_v21 = vsel %vm2772_vm2, %v2764_v51, %v2780_v16 }
 0x7f7   : > { %2797 = vst.msk [vmem:[%s5025_s13 + $0x8] sm:$0xff] %vm2795_vm0, %v2788_v21 }
 0x7f9   : > { %v2745_v9 = vpop.f32.mrf.mxu1 }
 0x7fa   : > { %v2765_v0 = vadd.f32 %v2745_v9, %v2639_v62 }
 0x7fc   : > { %vm2773_vm3 = vcmp.ge.f32.partialorder %v2765_v0, 0.0  ;;  %v2781_v27 = vmul.f32 0.2, %v2765_v0 }
 0x7fe   : > { %v2789_v15 = vsel %vm2773_vm3, %v2765_v0, %v2781_v27 }
 0x7ff   : > { %2798 = vst.msk [vmem:[%s5025_s13 + $0x10] sm:$0xff] %vm2795_vm0, %v2789_v15 }
 0x801   : > { %v2748_v33 = vpop.f32.mrf.mxu1 }
 0x802   : > { %v2766_v10 = vadd.f32 %v2748_v33, %v2640_v59 }
 0x804   : > { %vm2774_vm4 = vcmp.ge.f32.partialorder %v2766_v10, 0.0  ;;  %v2782_v14 = vmul.f32 0.2, %v2766_v10 }
 0x806   : > { %v2790_v17 = vsel %vm2774_vm4, %v2766_v10, %v2782_v14 }
 0x807   : > { %2799 = vst.msk [vmem:[%s5025_s13 + $0x18] sm:$0xff] %vm2795_vm0, %v2790_v17 }
 0x809   : > { %v2751_v18 = vpop.f32.mrf.mxu1 }
 0x80a   : > { %v2767_v7 = vadd.f32 %v2751_v18, %v2641_v43 }
 0x80c   : > { %vm2775_vm5 = vcmp.ge.f32.partialorder %v2767_v7, 0.0  ;;  %v2783_v48 = vmul.f32 0.2, %v2767_v7 }
 0x80e   : > { %v2791_v61 = vsel %vm2775_vm5, %v2767_v7, %v2783_v48 }
 0x80f   : > { %2800 = vst.msk [vmem:[%s5025_s13 + $0x20] sm:$0xff] %vm2795_vm0, %v2791_v61 }
 0x811   : > { %v2754_v19 = vpop.f32.mrf.mxu1 }
 0x812   : > { %v2768_v52 = vadd.f32 %v2754_v19, %v2642_v40 }
 0x814   : > { %vm2776_vm6 = vcmp.ge.f32.partialorder %v2768_v52, 0.0  ;;  %v2784_v60 = vmul.f32 0.2, %v2768_v52 }
 0x816   : > { %v2792_v4 = vsel %vm2776_vm6, %v2768_v52, %v2784_v60 }
 0x817   : > { %2801 = vst.msk [vmem:[%s5025_s13 + $0x28] sm:$0xff] %vm2795_vm0, %v2792_v4 }
 0x819   : > { %v2757_v45 = vpop.f32.mrf.mxu1 }
 0x81a   : > { %v2769_v22 = vadd.f32 %v2757_v45, %v2643_v42 }
 0x81c   : > { %vm2777_vm7 = vcmp.ge.f32.partialorder %v2769_v22, 0.0  ;;  %v2785_v54 = vmul.f32 0.2, %v2769_v22 }
 0x81e   : > { %v2793_v56 = vsel %vm2777_vm7, %v2769_v22, %v2785_v54 }
 0x81f   : > { %2802 = vst.msk [vmem:[%s5025_s13 + $0x30] sm:$0xff] %vm2795_vm0, %v2793_v56 }
 0x821   : > { %v2760_v11 = vpop.f32.mrf.mxu1 }
 0x822   : > { %v2770_v13 = vadd.f32 %v2760_v11, %v2644_v30 }
 0x824   : > { %vm2778_vm8 = vcmp.ge.f32.partialorder %v2770_v13, 0.0  ;;  %v2786_v49 = vmul.f32 0.2, %v2770_v13 }
 0x826   : > { %v2794_v34 = vsel %vm2778_vm8, %v2770_v13, %v2786_v49 }
 0x827   : > { %2803 = vst.msk [vmem:[%s5025_s13 + $0x38] sm:$0xff] %vm2795_vm0, %v2794_v34 }
 0x828 PF: > { %s20_s30 = sadd.s32 1, %s3352_s30  }
 0x829   : > { %p17_p4 = scmp.ge.s32.totalorder %s20_s30, 4  }
 0x82b   :  { %19 = sbr.rel (!%p17_p4) target bundleno = 1 (0x1), region = 120 }

</bundles_post_ra>
